<compile_context>
chip_gen: v5e
topology: v5e:2x2
jax: 0.10.0
libtpu: 0.0.40
codegen_flags: <defaults>
</compile_context>

<pallas_src>
import functools

import jax
import jax.numpy as jnp
from jax.experimental import pallas as pl
from jax.experimental.pallas import tpu as pltpu

BN_EPS = 1e-5
LANE = 128
VMEM_LIMIT = 32 * 1024 * 1024


def _round_up(x, m):
    return ((x + m - 1) // m) * m


def _pad_last(a, c):
    pad = c - a.shape[-1]
    if pad > 0:
        a = jnp.pad(a, [(0, 0)] * (a.ndim - 1) + [(0, pad)])
    return a


# ---------------------------------------------------------------------------
# Pass 1: conv (as sum of shifted GEMMs) + per-channel sum / sum-of-squares
# ---------------------------------------------------------------------------
def _conv_stats_kernel(z_ref, w_ref, y_ref, sum_ref, ssq_ref, *, keff, ho, wo):
    """One image per grid step.

    z_ref:   (1, Hz, Wz, Cz)       bf16 padded (phase-transformed) input, image i
    w_ref:   (keff*keff, Cz, Cp)   bf16 effective stride-1 weight (Cout padded to Cp)
    y_ref:   (1, Ho*Wo, Cp)        raw conv output tile (pre-BN)
    sum_ref: (1, Cp) f32           per-channel sum,  accumulated across the grid
    ssq_ref: (1, Cp) f32           per-channel sum of squares, accumulated across grid
    """
    @pl.when(pl.program_id(0) == 0)
    def _init():
        sum_ref[...] = jnp.zeros_like(sum_ref)
        ssq_ref[...] = jnp.zeros_like(ssq_ref)

    cz = z_ref.shape[-1]
    cp = w_ref.shape[-1]

    acc = jnp.zeros((ho * wo, cp), jnp.float32)
    for dh in range(keff):
        for dw in range(keff):
            # shifted window of the padded input: (Ho, Wo, Cz)
            slab = z_ref[0, dh:dh + ho, dw:dw + wo, :]
            acc = acc + jnp.dot(
                slab.reshape(ho * wo, cz),
                w_ref[dh * keff + dw],
                preferred_element_type=jnp.float32,
            )

    y_ref[...] = acc.reshape(1, ho * wo, cp).astype(y_ref.dtype)
    sum_ref[...] += jnp.sum(acc, axis=0, keepdims=True)
    ssq_ref[...] += jnp.sum(acc * acc, axis=0, keepdims=True)


def conv2d_pallas(x, w_oihw, *, stride, padding, cpad, act_dtype=jnp.bfloat16):
    """Conv2d(bias=False) on NHWC input, fused with BN batch-stat accumulation.

    x:       (N, H, W, Cx)  (Cx >= true Cin; extra channels must be zero)
    w_oihw:  (Cout, Cin, K, K)
    Returns  y (N, Ho, Wo, cpad) in act_dtype, csum (1, cpad) f32, cssq (1, cpad) f32.
    """
    n, h, w_dim, cx = x.shape
    cout, cin, kk, kk2 = w_oihw.shape
    assert kk == kk2 and cout <= cpad
    s = int(stride)

    # Zero-pad the weight's input channels to match lane-padded activations.
    if cin < cx:
        w_oihw = jnp.pad(w_oihw, ((0, 0), (0, cx - cin), (0, 0), (0, 0)))

    xp = jnp.pad(x, ((0, 0), (padding, padding), (padding, padding), (0, 0)))
    xp = xp.astype(act_dtype)
    hp, wp = h + 2 * padding, w_dim + 2 * padding
    ho = (hp - kk) // s + 1
    wo = (wp - kk) // s + 1

    # Strided conv -> stride-1 conv via a space-to-depth phase transform (no im2col,
    # no HBM inflation: the re-laid-out input has the same number of elements).
    keff = (kk - 1) // s + 1
    if s > 1:
        hp2, wp2 = -(-hp // s), -(-wp // s)
        xp = jnp.pad(xp, ((0, 0), (0, hp2 * s - hp), (0, wp2 * s - wp), (0, 0)))
        xp = xp.reshape(n, hp2, s, wp2, s, cx)
        xp = xp.transpose(0, 1, 3, 2, 4, 5).reshape(n, hp2, wp2, s * s * cx)
    _, hz, wz, cz = xp.shape

    # Effective stride-1 weight: (keff*keff, Cz, cpad); output channels zero-padded.
    w_t = jnp.transpose(w_oihw, (2, 3, 1, 0)).astype(jnp.float32)   # (K, K, Cx, Cout)
    weff = jnp.zeros((keff, keff, s, s, cx, cpad), jnp.float32)
    for dh in range(keff):
        for dw in range(keff):
            for p_ in range(s):
                for q_ in range(s):
                    kh, kw = s * dh + p_, s * dw + q_
                    if kh < kk and kw < kk:
                        weff = weff.at[dh, dw, p_, q_, :, :cout].set(w_t[kh, kw])
    weff = weff.reshape(keff * keff, cz, cpad).astype(act_dtype)

    m = n * ho * wo
    kernel = functools.partial(_conv_stats_kernel, keff=keff, ho=ho, wo=wo)
    itemsize = xp.dtype.itemsize

    y, csum, cssq = pl.pallas_call(
        kernel,
        out_shape=(
            jax.ShapeDtypeStruct((n, ho * wo, cpad), act_dtype),
            jax.ShapeDtypeStruct((1, cpad), jnp.float32),
            jax.ShapeDtypeStruct((1, cpad), jnp.float32),
        ),
        grid=(n,),
        in_specs=[
            pl.BlockSpec((1, hz, wz, cz), lambda i: (i, 0, 0, 0)),
            pl.BlockSpec((keff * keff, cz, cpad), lambda i: (0, 0, 0)),
        ],
        out_specs=(
            pl.BlockSpec((1, ho * wo, cpad), lambda i: (i, 0, 0)),
            pl.BlockSpec((1, cpad), lambda i: (0, 0)),
            pl.BlockSpec((1, cpad), lambda i: (0, 0)),
        ),
        compiler_params=pltpu.CompilerParams(
            # Stats accumulate into revisited outputs -> this axis must stay sequential.
            dimension_semantics=("arbitrary",),
            vmem_limit_bytes=VMEM_LIMIT,
        ),
        cost_estimate=pl.CostEstimate(
            flops=2 * m * (keff * keff * cz) * cpad,
            transcendentals=0,
            bytes_accessed=int((xp.size + weff.size + m * cpad) * itemsize + 2 * cpad * 4),
        ),
    )(xp, weff)

    return y.reshape(n, ho, wo, cpad), csum, cssq


# ---------------------------------------------------------------------------
# Pass 2: apply folded BN (+ optional residual) + ReLU, lane-dense and M-tiled
# ---------------------------------------------------------------------------
def _bn_act_kernel(y_ref, s_ref, b_ref, o_ref, *, relu):
    v = y_ref[...].astype(jnp.float32) * s_ref[...] + b_ref[...]
    if relu:
        v = jnp.maximum(v, 0.0)
    o_ref[...] = v.astype(o_ref.dtype)


def _bn_res_relu_kernel(y_ref, s_ref, b_ref, r_ref, rs_ref, rb_ref, o_ref):
    v = y_ref[...].astype(jnp.float32) * s_ref[...] + b_ref[...]
    v = v + r_ref[...].astype(jnp.float32) * rs_ref[...] + rb_ref[...]
    o_ref[...] = jnp.maximum(v, 0.0).astype(o_ref.dtype)


def bn_apply(y_flat, scale, shift, *, relu, out_dtype,
             residual=None, r_scale=None, r_shift=None):
    m, cpad = y_flat.shape
    tm = m if m <= 512 else 512          # 512-row tiles; small problems use one block
    grid = (pl.cdiv(m, tm),)
    row_spec = pl.BlockSpec((tm, cpad), lambda i: (i, 0))
    vec_spec = pl.BlockSpec((1, cpad), lambda i: (0, 0))

    if residual is None:
        kernel = functools.partial(_bn_act_kernel, relu=relu)
        in_specs = [row_spec, vec_spec, vec_spec]
        args = (y_flat, scale, shift)
    else:
        kernel = _bn_res_relu_kernel
        in_specs = [row_spec, vec_spec, vec_spec, row_spec, vec_spec, vec_spec]
        args = (y_flat, scale, shift, residual, r_scale, r_shift)

    return pl.pallas_call(
        kernel,
        out_shape=jax.ShapeDtypeStruct((m, cpad), out_dtype),
        grid=grid,
        in_specs=in_specs,
        out_specs=row_spec,
        compiler_params=pltpu.CompilerParams(
            dimension_semantics=("parallel",),
            vmem_limit_bytes=VMEM_LIMIT,
        ),
    )(*args)


def _bn_scale_shift(csum, cssq, m, gamma, beta, cpad, eps=BN_EPS):
    """Fold training-mode BatchNorm (batch stats, biased var) into scale/shift."""
    mean = csum / m
    var = jnp.maximum(cssq / m - mean * mean, 0.0)
    inv_std = jax.lax.rsqrt(var + eps)
    g = _pad_last(gamma.reshape(1, -1).astype(jnp.float32), cpad)
    b = _pad_last(beta.reshape(1, -1).astype(jnp.float32), cpad)
    scale = g * inv_std                      # padded lanes: gamma=0 -> scale=0
    shift = b - mean * scale                 # padded lanes: 0
    return scale, shift


# ---------------------------------------------------------------------------
# SkipLayer / SkipBlock forward
# ---------------------------------------------------------------------------
def skip_layer_forward(x, p, *, stride, out_dtype, act_dtype=jnp.bfloat16):
    out_ch = p["w1"].shape[0]
    cpad = _round_up(out_ch, LANE)
    n = x.shape[0]

    # main path: conv1 -> BN1(train) -> ReLU
    y1, s1, q1 = conv2d_pallas(x, p["w1"], stride=stride, padding=1,
                               cpad=cpad, act_dtype=act_dtype)
    _, ho, wo, _ = y1.shape
    m = n * ho * wo
    sc1, sh1 = _bn_scale_shift(s1, q1, m, p["g1"], p["b1"], cpad)
    a1 = bn_apply(y1.reshape(m, cpad), sc1, sh1, relu=True, out_dtype=act_dtype)
    a1 = a1.reshape(n, ho, wo, cpad)

    # main path: conv2 -> BN2(train)  (no ReLU before the residual add)
    y2, s2, q2 = conv2d_pallas(a1, p["w2"], stride=1, padding=1,
                               cpad=cpad, act_dtype=act_dtype)
    sc2, sh2 = _bn_scale_shift(s2, q2, m, p["g2"], p["b2"], cpad)

    # shortcut branch
    if stride != 1:
        yp, sp, qp = conv2d_pallas(x, p["wp"], stride=stride, padding=0,
                                   cpad=cpad, act_dtype=act_dtype)
        assert yp.shape == y2.shape
        scp, shp = _bn_scale_shift(sp, qp, m, p["gp"], p["bp"], cpad)
        r = yp.reshape(m, cpad)
    else:
        r = _pad_last(x.astype(act_dtype), cpad).reshape(m, cpad)
        scp = jnp.ones((1, cpad), jnp.float32)
        shp = jnp.zeros((1, cpad), jnp.float32)

    # fused BN2 + (projection-BN | identity) residual add + ReLU
    out = bn_apply(y2.reshape(m, cpad), sc2, sh2, relu=True, out_dtype=out_dtype,
                   residual=r, r_scale=scp, r_shift=shp)
    return out.reshape(n, ho, wo, cpad)


def skip_block_forward(x_nchw, params, *, first_layer_stride=2):
    """SkipBlock forward. x_nchw: (N, Cin, H, W) -> (N, Cout, Ho, Wo)."""
    x = jnp.transpose(x_nchw, (0, 2, 3, 1))        # NCHW -> NHWC
    num_layers = len(params)
    for i, p in enumerate(params):
        stride = first_layer_stride if i == 0 else 1
        last = (i == num_layers - 1)
        x = skip_layer_forward(x, p, stride=stride,
                               out_dtype=jnp.float32 if last else jnp.bfloat16)
    out_ch = params[-1]["w2"].shape[0]
    x = x[..., :out_ch]                            # drop the zero lane padding
    return jnp.transpose(x, (0, 3, 1, 2))          # NHWC -> NCHW


def init_skip_block_params(key, in_ch, out_ch, kernel_size, num_layers,
                           first_layer_stride):
    """Deterministic synthetic params per SkipLayer (conv OIHW weights, BN gamma/beta)."""
    def conv_w(k, co, ci, ks):
        fan_in = ci * ks * ks
        return jax.random.normal(k, (co, ci, ks, ks), jnp.float32) * (2.0 / fan_in) ** 0.5

    params = []
    for i in range(num_layers):
        cin = in_ch if i == 0 else out_ch
        stride = first_layer_stride if i == 0 else 1
        key, k1, k2, k3, k4, k5, k6, k7, k8, k9 = jax.random.split(key, 10)
        p = {
            "w1": conv_w(k1, out_ch, cin, kernel_size),
            "g1": 1.0 + 0.1 * jax.random.normal(k2, (out_ch,), jnp.float32),
            "b1": 0.1 * jax.random.normal(k3, (out_ch,), jnp.float32),
            "w2": conv_w(k4, out_ch, out_ch, kernel_size),
            "g2": 1.0 + 0.1 * jax.random.normal(k5, (out_ch,), jnp.float32),
            "b2": 0.1 * jax.random.normal(k6, (out_ch,), jnp.float32),
        }
        if stride != 1:
            # projection shortcut: Conv2d(in_ch, 2*in_ch, 1, stride, bias=False) + BN
            assert out_ch == 2 * cin, "SkipLayer residual add requires out_ch == 2*in_ch"
            p["wp"] = conv_w(k7, cin * 2, cin, 1)
            p["gp"] = 1.0 + 0.1 * jax.random.normal(k8, (cin * 2,), jnp.float32)
            p["bp"] = 0.1 * jax.random.normal(k9, (cin * 2,), jnp.float32)
        params.append(p)
    return params


if __name__ == "__main__":
    # SkipBlock(in_ch=4, out_ch=8, kernel_size=3, num_layers=2, first_layer_stride=2)
    in_ch, out_ch = 4, 8
    kernel_size, num_layers = 3, 2
    first_layer_stride = 2

    key = jax.random.PRNGKey(0)
    key, xk = jax.random.split(key)
    x = jax.random.normal(xk, (2, in_ch, 16, 16), jnp.float32)   # NCHW input

    params = init_skip_block_params(key, in_ch, out_ch, kernel_size, num_layers,
                                    first_layer_stride)

    fwd = jax.jit(functools.partial(skip_block_forward,
                                    first_layer_stride=first_layer_stride))
    out = fwd(x, params)
    jax.block_until_ready(out)

    # stride-2 first SkipLayer halves the 16x16 spatial dims -> (2, 8, 8, 8)
    assert out.shape == (2, out_ch, 8, 8), out.shape
    print("KERNEL_OK")
</pallas_src>

<mosaic_0001>
module attributes {stable_mosaic.version = 11 : i64} {
  func.func @_conv_stats_kernel(%arg0: i32, %arg1: memref<1x9x9x16xbf16, #tpu.memory_space<vmem>>, %arg2: memref<4x16x128xbf16, #tpu.memory_space<vmem>>, %arg3: memref<1x64x128xbf16, #tpu.memory_space<vmem>>, %arg4: memref<1x128xf32, #tpu.memory_space<vmem>>, %arg5: memref<1x128xf32, #tpu.memory_space<vmem>>) attributes {dimension_semantics = [#tpu.dimension_semantics<arbitrary>], iteration_bounds = array<i64: 2>, scalar_prefetch = 0 : i64, scratch_operands = 0 : i64, tpu.core_type = #tpu.core_type<tc>, window_params = [{transform_indices = @transform_0, window_bounds = array<i64: 1, 9, 9, 16>}, {pipeline_mode = #tpu.pipeline_mode<synchronous>, transform_indices = @transform_1, window_bounds = array<i64: 4, 16, 128>}, {transform_indices = @transform_2, window_bounds = array<i64: 1, 64, 128>}, {pipeline_mode = #tpu.pipeline_mode<synchronous>, transform_indices = @transform_3, window_bounds = array<i64: 1, 128>}, {pipeline_mode = #tpu.pipeline_mode<synchronous>, transform_indices = @transform_4, window_bounds = array<i64: 1, 128>}]} {
    %c0_i32 = arith.constant 0 : i32
    %0 = arith.cmpi eq, %arg0, %c0_i32 : i32
    %1 = arith.extui %0 : i1 to i32
    %c0_i32_0 = arith.constant 0 : i32
    %2 = arith.cmpi ne, %1, %c0_i32_0 : i32
    scf.if %2 {
      %cst_42 = arith.constant 0.000000e+00 : f32
      %46 = vector.broadcast %cst_42 : f32 to vector<1x128xf32>
      %c0_43 = arith.constant 0 : index
      %c0_44 = arith.constant 0 : index
      %47 = vector.load %arg4[%c0_43, %c0_44] : memref<1x128xf32, #tpu.memory_space<vmem>>, vector<1x128xf32>
      tpu.vector_store %arg4[%c0_43, %c0_44], %46 {strides = array<i32>} : memref<1x128xf32, #tpu.memory_space<vmem>>, vector<1x128xf32>,
      %cst_45 = arith.constant 0.000000e+00 : f32
      %48 = vector.broadcast %cst_45 : f32 to vector<1x128xf32>
      %c0_46 = arith.constant 0 : index
      %c0_47 = arith.constant 0 : index
      %49 = vector.load %arg5[%c0_46, %c0_47] : memref<1x128xf32, #tpu.memory_space<vmem>>, vector<1x128xf32>
      tpu.vector_store %arg5[%c0_46, %c0_47], %48 {strides = array<i32>} : memref<1x128xf32, #tpu.memory_space<vmem>>, vector<1x128xf32>,
    } else {
    }
    %cst = arith.constant 0.000000e+00 : f32
    %3 = vector.broadcast %cst : f32 to vector<64x128xf32>
    %c0 = arith.constant 0 : index
    %c0_1 = arith.constant 0 : index
    %c0_2 = arith.constant 0 : index
    %c0_3 = arith.constant 0 : index
    %4 = vector.load %arg1[%c0, %c0_1, %c0_2, %c0_3] : memref<1x9x9x16xbf16, #tpu.memory_space<vmem>>, vector<1x8x8x16xbf16>
    %5 = vector.shape_cast %4 : vector<1x8x8x16xbf16> to vector<8x8x16xbf16>
    %6 = vector.shape_cast %5 : vector<8x8x16xbf16> to vector<64x16xbf16>
    %c0_4 = arith.constant 0 : index
    %c0_5 = arith.constant 0 : index
    %c0_6 = arith.constant 0 : index
    %7 = vector.load %arg2[%c0_4, %c0_5, %c0_6] : memref<4x16x128xbf16, #tpu.memory_space<vmem>>, vector<1x16x128xbf16>
    %8 = vector.shape_cast %7 : vector<1x16x128xbf16> to vector<16x128xbf16>
    %cst_7 = arith.constant dense<0.000000e+00> : vector<64x128xf32>
    %9 = tpu.matmul %6, %8, %cst_7 {dimension_numbers = #tpu.dot_dimension_numbers<[1], [0], [0], [1], [0, 0, 1, 1], [], []>} : vector<64x16xbf16>, vector<16x128xbf16>, vector<64x128xf32> -> vector<64x128xf32>
    %10 = arith.addf %3, %9 : vector<64x128xf32>
    %c0_8 = arith.constant 0 : index
    %c0_9 = arith.constant 0 : index
    %c1 = arith.constant 1 : index
    %c0_10 = arith.constant 0 : index
    %11 = vector.load %arg1[%c0_8, %c0_9, %c1, %c0_10] : memref<1x9x9x16xbf16, #tpu.memory_space<vmem>>, vector<1x8x8x16xbf16>
    %12 = vector.shape_cast %11 : vector<1x8x8x16xbf16> to vector<8x8x16xbf16>
    %13 = vector.shape_cast %12 : vector<8x8x16xbf16> to vector<64x16xbf16>
    %c1_11 = arith.constant 1 : index
    %c0_12 = arith.constant 0 : index
    %c0_13 = arith.constant 0 : index
    %14 = vector.load %arg2[%c1_11, %c0_12, %c0_13] : memref<4x16x128xbf16, #tpu.memory_space<vmem>>, vector<1x16x128xbf16>
    %15 = vector.shape_cast %14 : vector<1x16x128xbf16> to vector<16x128xbf16>
    %cst_14 = arith.constant dense<0.000000e+00> : vector<64x128xf32>
    %16 = tpu.matmul %13, %15, %cst_14 {dimension_numbers = #tpu.dot_dimension_numbers<[1], [0], [0], [1], [0, 0, 1, 1], [], []>} : vector<64x16xbf16>, vector<16x128xbf16>, vector<64x128xf32> -> vector<64x128xf32>
    %17 = arith.addf %10, %16 : vector<64x128xf32>
    %c0_15 = arith.constant 0 : index
    %c1_16 = arith.constant 1 : index
    %c0_17 = arith.constant 0 : index
    %c0_18 = arith.constant 0 : index
    %18 = vector.load %arg1[%c0_15, %c1_16, %c0_17, %c0_18] : memref<1x9x9x16xbf16, #tpu.memory_space<vmem>>, vector<1x8x8x16xbf16>
    %19 = vector.shape_cast %18 : vector<1x8x8x16xbf16> to vector<8x8x16xbf16>
    %20 = vector.shape_cast %19 : vector<8x8x16xbf16> to vector<64x16xbf16>
    %c2 = arith.constant 2 : index
    %c0_19 = arith.constant 0 : index
    %c0_20 = arith.constant 0 : index
    %21 = vector.load %arg2[%c2, %c0_19, %c0_20] : memref<4x16x128xbf16, #tpu.memory_space<vmem>>, vector<1x16x128xbf16>
    %22 = vector.shape_cast %21 : vector<1x16x128xbf16> to vector<16x128xbf16>
    %cst_21 = arith.constant dense<0.000000e+00> : vector<64x128xf32>
    %23 = tpu.matmul %20, %22, %cst_21 {dimension_numbers = #tpu.dot_dimension_numbers<[1], [0], [0], [1], [0, 0, 1, 1], [], []>} : vector<64x16xbf16>, vector<16x128xbf16>, vector<64x128xf32> -> vector<64x128xf32>
    %24 = arith.addf %17, %23 : vector<64x128xf32>
    %c0_22 = arith.constant 0 : index
    %c1_23 = arith.constant 1 : index
    %c1_24 = arith.constant 1 : index
    %c0_25 = arith.constant 0 : index
    %25 = vector.load %arg1[%c0_22, %c1_23, %c1_24, %c0_25] : memref<1x9x9x16xbf16, #tpu.memory_space<vmem>>, vector<1x8x8x16xbf16>
    %26 = vector.shape_cast %25 : vector<1x8x8x16xbf16> to vector<8x8x16xbf16>
    %27 = vector.shape_cast %26 : vector<8x8x16xbf16> to vector<64x16xbf16>
    %c3 = arith.constant 3 : index
    %c0_26 = arith.constant 0 : index
    %c0_27 = arith.constant 0 : index
    %28 = vector.load %arg2[%c3, %c0_26, %c0_27] : memref<4x16x128xbf16, #tpu.memory_space<vmem>>, vector<1x16x128xbf16>
    %29 = vector.shape_cast %28 : vector<1x16x128xbf16> to vector<16x128xbf16>
    %cst_28 = arith.constant dense<0.000000e+00> : vector<64x128xf32>
    %30 = tpu.matmul %27, %29, %cst_28 {dimension_numbers = #tpu.dot_dimension_numbers<[1], [0], [0], [1], [0, 0, 1, 1], [], []>} : vector<64x16xbf16>, vector<16x128xbf16>, vector<64x128xf32> -> vector<64x128xf32>
    %31 = arith.addf %24, %30 : vector<64x128xf32>
    %32 = vector.shape_cast %31 : vector<64x128xf32> to vector<1x64x128xf32>
    %33 = arith.truncf %32 : vector<1x64x128xf32> to vector<1x64x128xbf16>
    %c0_29 = arith.constant 0 : index
    %c0_30 = arith.constant 0 : index
    %c0_31 = arith.constant 0 : index
    %34 = vector.load %arg3[%c0_29, %c0_30, %c0_31] : memref<1x64x128xbf16, #tpu.memory_space<vmem>>, vector<1x64x128xbf16>
    tpu.vector_store %arg3[%c0_29, %c0_30, %c0_31], %33 {strides = array<i32>} : memref<1x64x128xbf16, #tpu.memory_space<vmem>>, vector<1x64x128xbf16>,
    %c0_32 = arith.constant 0 : index
    %c0_33 = arith.constant 0 : index
    %35 = vector.load %arg4[%c0_32, %c0_33] : memref<1x128xf32, #tpu.memory_space<vmem>>, vector<1x128xf32>
    %cst_34 = arith.constant dense<0.000000e+00> : vector<128xf32>
    %36 = vector.multi_reduction <add>, %31, %cst_34 [0] : vector<64x128xf32> to vector<128xf32>
    %37 = vector.shape_cast %36 : vector<128xf32> to vector<1x128xf32>
    %38 = arith.addf %35, %37 : vector<1x128xf32>
    %c0_35 = arith.constant 0 : index
    %c0_36 = arith.constant 0 : index
    %39 = vector.load %arg4[%c0_35, %c0_36] : memref<1x128xf32, #tpu.memory_space<vmem>>, vector<1x128xf32>
    tpu.vector_store %arg4[%c0_35, %c0_36], %38 {strides = array<i32>} : memref<1x128xf32, #tpu.memory_space<vmem>>, vector<1x128xf32>,
    %c0_37 = arith.constant 0 : index
    %c0_38 = arith.constant 0 : index
    %40 = vector.load %arg5[%c0_37, %c0_38] : memref<1x128xf32, #tpu.memory_space<vmem>>, vector<1x128xf32>
    %41 = arith.mulf %31, %31 : vector<64x128xf32>
    %cst_39 = arith.constant dense<0.000000e+00> : vector<128xf32>
    %42 = vector.multi_reduction <add>, %41, %cst_39 [0] : vector<64x128xf32> to vector<128xf32>
    %43 = vector.shape_cast %42 : vector<128xf32> to vector<1x128xf32>
    %44 = arith.addf %40, %43 : vector<1x128xf32>
    %c0_40 = arith.constant 0 : index
    %c0_41 = arith.constant 0 : index
    %45 = vector.load %arg5[%c0_40, %c0_41] : memref<1x128xf32, #tpu.memory_space<vmem>>, vector<1x128xf32>
    tpu.vector_store %arg5[%c0_40, %c0_41], %44 {strides = array<i32>} : memref<1x128xf32, #tpu.memory_space<vmem>>, vector<1x128xf32>,
    return
  }
  func.func @transform_0(%arg0: i32) -> (i32, i32, i32, i32) {
    %c0_i32 = arith.constant 0 : i32
    %c0_i32_0 = arith.constant 0 : i32
    %c0_i32_1 = arith.constant 0 : i32
    %c0_i32_2 = arith.constant 0 : i32
    return %arg0, %c0_i32, %c0_i32_0, %c0_i32_1 : i32, i32, i32, i32
  }
  func.func @transform_1(%arg0: i32) -> (i32, i32, i32) {
    %c0_i32 = arith.constant 0 : i32
    %c0_i32_0 = arith.constant 0 : i32
    %c0_i32_1 = arith.constant 0 : i32
    %c0_i32_2 = arith.constant 0 : i32
    return %c0_i32, %c0_i32_0, %c0_i32_1 : i32, i32, i32
  }
  func.func @transform_2(%arg0: i32) -> (i32, i32, i32) {
    %c0_i32 = arith.constant 0 : i32
    %c0_i32_0 = arith.constant 0 : i32
    %c0_i32_1 = arith.constant 0 : i32
    return %arg0, %c0_i32, %c0_i32_0 : i32, i32, i32
  }
  func.func @transform_3(%arg0: i32) -> (i32, i32) {
    %c0_i32 = arith.constant 0 : i32
    %c0_i32_0 = arith.constant 0 : i32
    %c0_i32_1 = arith.constant 0 : i32
    return %c0_i32, %c0_i32_0 : i32, i32
  }
  func.func @transform_4(%arg0: i32) -> (i32, i32) {
    %c0_i32 = arith.constant 0 : i32
    %c0_i32_0 = arith.constant 0 : i32
    %c0_i32_1 = arith.constant 0 : i32
    return %c0_i32, %c0_i32_0 : i32, i32
  }
}

module attributes {stable_mosaic.version = 11 : i64} {
  func.func @_bn_act_kernel(%arg0: i32, %arg1: memref<128x128xbf16, #tpu.memory_space<vmem>>, %arg2: memref<1x128xf32, #tpu.memory_space<vmem>>, %arg3: memref<1x128xf32, #tpu.memory_space<vmem>>, %arg4: memref<128x128xbf16, #tpu.memory_space<vmem>>) attributes {dimension_semantics = [#tpu.dimension_semantics<parallel>], iteration_bounds = array<i64: 1>, scalar_prefetch = 0 : i64, scratch_operands = 0 : i64, tpu.core_type = #tpu.core_type<tc>, window_params = [{transform_indices = @transform_0, window_bounds = array<i64: 128, 128>}, {pipeline_mode = #tpu.pipeline_mode<synchronous>, transform_indices = @transform_1, window_bounds = array<i64: 1, 128>}, {pipeline_mode = #tpu.pipeline_mode<synchronous>, transform_indices = @transform_2, window_bounds = array<i64: 1, 128>}, {transform_indices = @transform_3, window_bounds = array<i64: 128, 128>}]} {
    %c0 = arith.constant 0 : index
    %c0_0 = arith.constant 0 : index
    %0 = vector.load %arg1[%c0, %c0_0] : memref<128x128xbf16, #tpu.memory_space<vmem>>, vector<128x128xbf16>
    %1 = arith.extf %0 : vector<128x128xbf16> to vector<128x128xf32>
    %c0_1 = arith.constant 0 : index
    %c0_2 = arith.constant 0 : index
    %2 = vector.load %arg2[%c0_1, %c0_2] : memref<1x128xf32, #tpu.memory_space<vmem>>, vector<1x128xf32>
    %3 = vector.broadcast %2 : vector<1x128xf32> to vector<128x128xf32>
    %4 = arith.mulf %1, %3 : vector<128x128xf32>
    %c0_3 = arith.constant 0 : index
    %c0_4 = arith.constant 0 : index
    %5 = vector.load %arg3[%c0_3, %c0_4] : memref<1x128xf32, #tpu.memory_space<vmem>>, vector<1x128xf32>
    %6 = vector.broadcast %5 : vector<1x128xf32> to vector<128x128xf32>
    %7 = arith.addf %4, %6 : vector<128x128xf32>
    %cst = arith.constant 0.000000e+00 : f32
    %8 = vector.broadcast %cst : f32 to vector<128x128xf32>
    %9 = arith.maximumf %7, %8 : vector<128x128xf32>
    %10 = arith.truncf %9 : vector<128x128xf32> to vector<128x128xbf16>
    %c0_5 = arith.constant 0 : index
    %c0_6 = arith.constant 0 : index
    %11 = vector.load %arg4[%c0_5, %c0_6] : memref<128x128xbf16, #tpu.memory_space<vmem>>, vector<128x128xbf16>
    tpu.vector_store %arg4[%c0_5, %c0_6], %10 {strides = array<i32>} : memref<128x128xbf16, #tpu.memory_space<vmem>>, vector<128x128xbf16>,
    return
  }
  func.func @transform_0(%arg0: i32) -> (i32, i32) {
    %c0_i32 = arith.constant 0 : i32
    %c0_i32_0 = arith.constant 0 : i32
    return %arg0, %c0_i32 : i32, i32
  }
  func.func @transform_1(%arg0: i32) -> (i32, i32) {
    %c0_i32 = arith.constant 0 : i32
    %c0_i32_0 = arith.constant 0 : i32
    %c0_i32_1 = arith.constant 0 : i32
    return %c0_i32, %c0_i32_0 : i32, i32
  }
  func.func @transform_2(%arg0: i32) -> (i32, i32) {
    %c0_i32 = arith.constant 0 : i32
    %c0_i32_0 = arith.constant 0 : i32
    %c0_i32_1 = arith.constant 0 : i32
    return %c0_i32, %c0_i32_0 : i32, i32
  }
  func.func @transform_3(%arg0: i32) -> (i32, i32) {
    %c0_i32 = arith.constant 0 : i32
    %c0_i32_0 = arith.constant 0 : i32
    return %arg0, %c0_i32 : i32, i32
  }
}

module attributes {stable_mosaic.version = 11 : i64} {
  func.func @_conv_stats_kernel(%arg0: i32, %arg1: memref<1x10x10x128xbf16, #tpu.memory_space<vmem>>, %arg2: memref<9x128x128xbf16, #tpu.memory_space<vmem>>, %arg3: memref<1x64x128xbf16, #tpu.memory_space<vmem>>, %arg4: memref<1x128xf32, #tpu.memory_space<vmem>>, %arg5: memref<1x128xf32, #tpu.memory_space<vmem>>) attributes {dimension_semantics = [#tpu.dimension_semantics<arbitrary>], iteration_bounds = array<i64: 2>, scalar_prefetch = 0 : i64, scratch_operands = 0 : i64, tpu.core_type = #tpu.core_type<tc>, window_params = [{transform_indices = @transform_0, window_bounds = array<i64: 1, 10, 10, 128>}, {pipeline_mode = #tpu.pipeline_mode<synchronous>, transform_indices = @transform_1, window_bounds = array<i64: 9, 128, 128>}, {transform_indices = @transform_2, window_bounds = array<i64: 1, 64, 128>}, {pipeline_mode = #tpu.pipeline_mode<synchronous>, transform_indices = @transform_3, window_bounds = array<i64: 1, 128>}, {pipeline_mode = #tpu.pipeline_mode<synchronous>, transform_indices = @transform_4, window_bounds = array<i64: 1, 128>}]} {
    %c0_i32 = arith.constant 0 : i32
    %0 = arith.cmpi eq, %arg0, %c0_i32 : i32
    %1 = arith.extui %0 : i1 to i32
    %c0_i32_0 = arith.constant 0 : i32
    %2 = arith.cmpi ne, %1, %c0_i32_0 : i32
    scf.if %2 {
      %cst_77 = arith.constant 0.000000e+00 : f32
      %81 = vector.broadcast %cst_77 : f32 to vector<1x128xf32>
      %c0_78 = arith.constant 0 : index
      %c0_79 = arith.constant 0 : index
      %82 = vector.load %arg4[%c0_78, %c0_79] : memref<1x128xf32, #tpu.memory_space<vmem>>, vector<1x128xf32>
      tpu.vector_store %arg4[%c0_78, %c0_79], %81 {strides = array<i32>} : memref<1x128xf32, #tpu.memory_space<vmem>>, vector<1x128xf32>,
      %cst_80 = arith.constant 0.000000e+00 : f32
      %83 = vector.broadcast %cst_80 : f32 to vector<1x128xf32>
      %c0_81 = arith.constant 0 : index
      %c0_82 = arith.constant 0 : index
      %84 = vector.load %arg5[%c0_81, %c0_82] : memref<1x128xf32, #tpu.memory_space<vmem>>, vector<1x128xf32>
      tpu.vector_store %arg5[%c0_81, %c0_82], %83 {strides = array<i32>} : memref<1x128xf32, #tpu.memory_space<vmem>>, vector<1x128xf32>,
    } else {
    }
    %cst = arith.constant 0.000000e+00 : f32
    %3 = vector.broadcast %cst : f32 to vector<64x128xf32>
    %c0 = arith.constant 0 : index
    %c0_1 = arith.constant 0 : index
    %c0_2 = arith.constant 0 : index
    %c0_3 = arith.constant 0 : index
    %4 = vector.load %arg1[%c0, %c0_1, %c0_2, %c0_3] : memref<1x10x10x128xbf16, #tpu.memory_space<vmem>>, vector<1x8x8x128xbf16>
    %5 = vector.shape_cast %4 : vector<1x8x8x128xbf16> to vector<8x8x128xbf16>
    %6 = vector.shape_cast %5 : vector<8x8x128xbf16> to vector<64x128xbf16>
    %c0_4 = arith.constant 0 : index
    %c0_5 = arith.constant 0 : index
    %c0_6 = arith.constant 0 : index
    %7 = vector.load %arg2[%c0_4, %c0_5, %c0_6] : memref<9x128x128xbf16, #tpu.memory_space<vmem>>, vector<1x128x128xbf16>
    %8 = vector.shape_cast %7 : vector<1x128x128xbf16> to vector<128x128xbf16>
    %cst_7 = arith.constant dense<0.000000e+00> : vector<64x128xf32>
    %9 = tpu.matmul %6, %8, %cst_7 {dimension_numbers = #tpu.dot_dimension_numbers<[1], [0], [0], [1], [0, 0, 1, 1], [], []>} : vector<64x128xbf16>, vector<128x128xbf16>, vector<64x128xf32> -> vector<64x128xf32>
    %10 = arith.addf %3, %9 : vector<64x128xf32>
    %c0_8 = arith.constant 0 : index
    %c0_9 = arith.constant 0 : index
    %c1 = arith.constant 1 : index
    %c0_10 = arith.constant 0 : index
    %11 = vector.load %arg1[%c0_8, %c0_9, %c1, %c0_10] : memref<1x10x10x128xbf16, #tpu.memory_space<vmem>>, vector<1x8x8x128xbf16>
    %12 = vector.shape_cast %11 : vector<1x8x8x128xbf16> to vector<8x8x128xbf16>
    %13 = vector.shape_cast %12 : vector<8x8x128xbf16> to vector<64x128xbf16>
    %c1_11 = arith.constant 1 : index
    %c0_12 = arith.constant 0 : index
    %c0_13 = arith.constant 0 : index
    %14 = vector.load %arg2[%c1_11, %c0_12, %c0_13] : memref<9x128x128xbf16, #tpu.memory_space<vmem>>, vector<1x128x128xbf16>
    %15 = vector.shape_cast %14 : vector<1x128x128xbf16> to vector<128x128xbf16>
    %cst_14 = arith.constant dense<0.000000e+00> : vector<64x128xf32>
    %16 = tpu.matmul %13, %15, %cst_14 {dimension_numbers = #tpu.dot_dimension_numbers<[1], [0], [0], [1], [0, 0, 1, 1], [], []>} : vector<64x128xbf16>, vector<128x128xbf16>, vector<64x128xf32> -> vector<64x128xf32>
    %17 = arith.addf %10, %16 : vector<64x128xf32>
    %c0_15 = arith.constant 0 : index
    %c0_16 = arith.constant 0 : index
    %c2 = arith.constant 2 : index
    %c0_17 = arith.constant 0 : index
    %18 = vector.load %arg1[%c0_15, %c0_16, %c2, %c0_17] : memref<1x10x10x128xbf16, #tpu.memory_space<vmem>>, vector<1x8x8x128xbf16>
    %19 = vector.shape_cast %18 : vector<1x8x8x128xbf16> to vector<8x8x128xbf16>
    %20 = vector.shape_cast %19 : vector<8x8x128xbf16> to vector<64x128xbf16>
    %c2_18 = arith.constant 2 : index
    %c0_19 = arith.constant 0 : index
    %c0_20 = arith.constant 0 : index
    %21 = vector.load %arg2[%c2_18, %c0_19, %c0_20] : memref<9x128x128xbf16, #tpu.memory_space<vmem>>, vector<1x128x128xbf16>
    %22 = vector.shape_cast %21 : vector<1x128x128xbf16> to vector<128x128xbf16>
    %cst_21 = arith.constant dense<0.000000e+00> : vector<64x128xf32>
    %23 = tpu.matmul %20, %22, %cst_21 {dimension_numbers = #tpu.dot_dimension_numbers<[1], [0], [0], [1], [0, 0, 1, 1], [], []>} : vector<64x128xbf16>, vector<128x128xbf16>, vector<64x128xf32> -> vector<64x128xf32>
    %24 = arith.addf %17, %23 : vector<64x128xf32>
    %c0_22 = arith.constant 0 : index
    %c1_23 = arith.constant 1 : index
    %c0_24 = arith.constant 0 : index
    %c0_25 = arith.constant 0 : index
    %25 = vector.load %arg1[%c0_22, %c1_23, %c0_24, %c0_25] : memref<1x10x10x128xbf16, #tpu.memory_space<vmem>>, vector<1x8x8x128xbf16>
    %26 = vector.shape_cast %25 : vector<1x8x8x128xbf16> to vector<8x8x128xbf16>
    %27 = vector.shape_cast %26 : vector<8x8x128xbf16> to vector<64x128xbf16>
    %c3 = arith.constant 3 : index
    %c0_26 = arith.constant 0 : index
    %c0_27 = arith.constant 0 : index
    %28 = vector.load %arg2[%c3, %c0_26, %c0_27] : memref<9x128x128xbf16, #tpu.memory_space<vmem>>, vector<1x128x128xbf16>
    %29 = vector.shape_cast %28 : vector<1x128x128xbf16> to vector<128x128xbf16>
    %cst_28 = arith.constant dense<0.000000e+00> : vector<64x128xf32>
    %30 = tpu.matmul %27, %29, %cst_28 {dimension_numbers = #tpu.dot_dimension_numbers<[1], [0], [0], [1], [0, 0, 1, 1], [], []>} : vector<64x128xbf16>, vector<128x128xbf16>, vector<64x128xf32> -> vector<64x128xf32>
    %31 = arith.addf %24, %30 : vector<64x128xf32>
    %c0_29 = arith.constant 0 : index
    %c1_30 = arith.constant 1 : index
    %c1_31 = arith.constant 1 : index
    %c0_32 = arith.constant 0 : index
    %32 = vector.load %arg1[%c0_29, %c1_30, %c1_31, %c0_32] : memref<1x10x10x128xbf16, #tpu.memory_space<vmem>>, vector<1x8x8x128xbf16>
    %33 = vector.shape_cast %32 : vector<1x8x8x128xbf16> to vector<8x8x128xbf16>
    %34 = vector.shape_cast %33 : vector<8x8x128xbf16> to vector<64x128xbf16>
    %c4 = arith.constant 4 : index
    %c0_33 = arith.constant 0 : index
    %c0_34 = arith.constant 0 : index
    %35 = vector.load %arg2[%c4, %c0_33, %c0_34] : memref<9x128x128xbf16, #tpu.memory_space<vmem>>, vector<1x128x128xbf16>
    %36 = vector.shape_cast %35 : vector<1x128x128xbf16> to vector<128x128xbf16>
    %cst_35 = arith.constant dense<0.000000e+00> : vector<64x128xf32>
    %37 = tpu.matmul %34, %36, %cst_35 {dimension_numbers = #tpu.dot_dimension_numbers<[1], [0], [0], [1], [0, 0, 1, 1], [], []>} : vector<64x128xbf16>, vector<128x128xbf16>, vector<64x128xf32> -> vector<64x128xf32>
    %38 = arith.addf %31, %37 : vector<64x128xf32>
    %c0_36 = arith.constant 0 : index
    %c1_37 = arith.constant 1 : index
    %c2_38 = arith.constant 2 : index
    %c0_39 = arith.constant 0 : index
    %39 = vector.load %arg1[%c0_36, %c1_37, %c2_38, %c0_39] : memref<1x10x10x128xbf16, #tpu.memory_space<vmem>>, vector<1x8x8x128xbf16>
    %40 = vector.shape_cast %39 : vector<1x8x8x128xbf16> to vector<8x8x128xbf16>
    %41 = vector.shape_cast %40 : vector<8x8x128xbf16> to vector<64x128xbf16>
    %c5 = arith.constant 5 : index
    %c0_40 = arith.constant 0 : index
    %c0_41 = arith.constant 0 : index
    %42 = vector.load %arg2[%c5, %c0_40, %c0_41] : memref<9x128x128xbf16, #tpu.memory_space<vmem>>, vector<1x128x128xbf16>
    %43 = vector.shape_cast %42 : vector<1x128x128xbf16> to vector<128x128xbf16>
    %cst_42 = arith.constant dense<0.000000e+00> : vector<64x128xf32>
    %44 = tpu.matmul %41, %43, %cst_42 {dimension_numbers = #tpu.dot_dimension_numbers<[1], [0], [0], [1], [0, 0, 1, 1], [], []>} : vector<64x128xbf16>, vector<128x128xbf16>, vector<64x128xf32> -> vector<64x128xf32>
    %45 = arith.addf %38, %44 : vector<64x128xf32>
    %c0_43 = arith.constant 0 : index
    %c2_44 = arith.constant 2 : index
    %c0_45 = arith.constant 0 : index
    %c0_46 = arith.constant 0 : index
    %46 = vector.load %arg1[%c0_43, %c2_44, %c0_45, %c0_46] : memref<1x10x10x128xbf16, #tpu.memory_space<vmem>>, vector<1x8x8x128xbf16>
    %47 = vector.shape_cast %46 : vector<1x8x8x128xbf16> to vector<8x8x128xbf16>
    %48 = vector.shape_cast %47 : vector<8x8x128xbf16> to vector<64x128xbf16>
    %c6 = arith.constant 6 : index
    %c0_47 = arith.constant 0 : index
    %c0_48 = arith.constant 0 : index
    %49 = vector.load %arg2[%c6, %c0_47, %c0_48] : memref<9x128x128xbf16, #tpu.memory_space<vmem>>, vector<1x128x128xbf16>
    %50 = vector.shape_cast %49 : vector<1x128x128xbf16> to vector<128x128xbf16>
    %cst_49 = arith.constant dense<0.000000e+00> : vector<64x128xf32>
    %51 = tpu.matmul %48, %50, %cst_49 {dimension_numbers = #tpu.dot_dimension_numbers<[1], [0], [0], [1], [0, 0, 1, 1], [], []>} : vector<64x128xbf16>, vector<128x128xbf16>, vector<64x128xf32> -> vector<64x128xf32>
    %52 = arith.addf %45, %51 : vector<64x128xf32>
    %c0_50 = arith.constant 0 : index
    %c2_51 = arith.constant 2 : index
    %c1_52 = arith.constant 1 : index
    %c0_53 = arith.constant 0 : index
    %53 = vector.load %arg1[%c0_50, %c2_51, %c1_52, %c0_53] : memref<1x10x10x128xbf16, #tpu.memory_space<vmem>>, vector<1x8x8x128xbf16>
    %54 = vector.shape_cast %53 : vector<1x8x8x128xbf16> to vector<8x8x128xbf16>
    %55 = vector.shape_cast %54 : vector<8x8x128xbf16> to vector<64x128xbf16>
    %c7 = arith.constant 7 : index
    %c0_54 = arith.constant 0 : index
    %c0_55 = arith.constant 0 : index
    %56 = vector.load %arg2[%c7, %c0_54, %c0_55] : memref<9x128x128xbf16, #tpu.memory_space<vmem>>, vector<1x128x128xbf16>
    %57 = vector.shape_cast %56 : vector<1x128x128xbf16> to vector<128x128xbf16>
    %cst_56 = arith.constant dense<0.000000e+00> : vector<64x128xf32>
    %58 = tpu.matmul %55, %57, %cst_56 {dimension_numbers = #tpu.dot_dimension_numbers<[1], [0], [0], [1], [0, 0, 1, 1], [], []>} : vector<64x128xbf16>, vector<128x128xbf16>, vector<64x128xf32> -> vector<64x128xf32>
    %59 = arith.addf %52, %58 : vector<64x128xf32>
    %c0_57 = arith.constant 0 : index
    %c2_58 = arith.constant 2 : index
    %c2_59 = arith.constant 2 : index
    %c0_60 = arith.constant 0 : index
    %60 = vector.load %arg1[%c0_57, %c2_58, %c2_59, %c0_60] : memref<1x10x10x128xbf16, #tpu.memory_space<vmem>>, vector<1x8x8x128xbf16>
    %61 = vector.shape_cast %60 : vector<1x8x8x128xbf16> to vector<8x8x128xbf16>
    %62 = vector.shape_cast %61 : vector<8x8x128xbf16> to vector<64x128xbf16>
    %c8 = arith.constant 8 : index
    %c0_61 = arith.constant 0 : index
    %c0_62 = arith.constant 0 : index
    %63 = vector.load %arg2[%c8, %c0_61, %c0_62] : memref<9x128x128xbf16, #tpu.memory_space<vmem>>, vector<1x128x128xbf16>
    %64 = vector.shape_cast %63 : vector<1x128x128xbf16> to vector<128x128xbf16>
    %cst_63 = arith.constant dense<0.000000e+00> : vector<64x128xf32>
    %65 = tpu.matmul %62, %64, %cst_63 {dimension_numbers = #tpu.dot_dimension_numbers<[1], [0], [0], [1], [0, 0, 1, 1], [], []>} : vector<64x128xbf16>, vector<128x128xbf16>, vector<64x128xf32> -> vector<64x128xf32>
    %66 = arith.addf %59, %65 : vector<64x128xf32>
    %67 = vector.shape_cast %66 : vector<64x128xf32> to vector<1x64x128xf32>
    %68 = arith.truncf %67 : vector<1x64x128xf32> to vector<1x64x128xbf16>
    %c0_64 = arith.constant 0 : index
    %c0_65 = arith.constant 0 : index
    %c0_66 = arith.constant 0 : index
    %69 = vector.load %arg3[%c0_64, %c0_65, %c0_66] : memref<1x64x128xbf16, #tpu.memory_space<vmem>>, vector<1x64x128xbf16>
    tpu.vector_store %arg3[%c0_64, %c0_65, %c0_66], %68 {strides = array<i32>} : memref<1x64x128xbf16, #tpu.memory_space<vmem>>, vector<1x64x128xbf16>,
    %c0_67 = arith.constant 0 : index
    %c0_68 = arith.constant 0 : index
    %70 = vector.load %arg4[%c0_67, %c0_68] : memref<1x128xf32, #tpu.memory_space<vmem>>, vector<1x128xf32>
    %cst_69 = arith.constant dense<0.000000e+00> : vector<128xf32>
    %71 = vector.multi_reduction <add>, %66, %cst_69 [0] : vector<64x128xf32> to vector<128xf32>
    %72 = vector.shape_cast %71 : vector<128xf32> to vector<1x128xf32>
    %73 = arith.addf %70, %72 : vector<1x128xf32>
    %c0_70 = arith.constant 0 : index
    %c0_71 = arith.constant 0 : index
    %74 = vector.load %arg4[%c0_70, %c0_71] : memref<1x128xf32, #tpu.memory_space<vmem>>, vector<1x128xf32>
    tpu.vector_store %arg4[%c0_70, %c0_71], %73 {strides = array<i32>} : memref<1x128xf32, #tpu.memory_space<vmem>>, vector<1x128xf32>,
    %c0_72 = arith.constant 0 : index
    %c0_73 = arith.constant 0 : index
    %75 = vector.load %arg5[%c0_72, %c0_73] : memref<1x128xf32, #tpu.memory_space<vmem>>, vector<1x128xf32>
    %76 = arith.mulf %66, %66 : vector<64x128xf32>
    %cst_74 = arith.constant dense<0.000000e+00> : vector<128xf32>
    %77 = vector.multi_reduction <add>, %76, %cst_74 [0] : vector<64x128xf32> to vector<128xf32>
    %78 = vector.shape_cast %77 : vector<128xf32> to vector<1x128xf32>
    %79 = arith.addf %75, %78 : vector<1x128xf32>
    %c0_75 = arith.constant 0 : index
    %c0_76 = arith.constant 0 : index
    %80 = vector.load %arg5[%c0_75, %c0_76] : memref<1x128xf32, #tpu.memory_space<vmem>>, vector<1x128xf32>
    tpu.vector_store %arg5[%c0_75, %c0_76], %79 {strides = array<i32>} : memref<1x128xf32, #tpu.memory_space<vmem>>, vector<1x128xf32>,
    return
  }
  func.func @transform_0(%arg0: i32) -> (i32, i32, i32, i32) {
    %c0_i32 = arith.constant 0 : i32
    %c0_i32_0 = arith.constant 0 : i32
    %c0_i32_1 = arith.constant 0 : i32
    %c0_i32_2 = arith.constant 0 : i32
    return %arg0, %c0_i32, %c0_i32_0, %c0_i32_1 : i32, i32, i32, i32
  }
  func.func @transform_1(%arg0: i32) -> (i32, i32, i32) {
    %c0_i32 = arith.constant 0 : i32
    %c0_i32_0 = arith.constant 0 : i32
    %c0_i32_1 = arith.constant 0 : i32
    %c0_i32_2 = arith.constant 0 : i32
    return %c0_i32, %c0_i32_0, %c0_i32_1 : i32, i32, i32
  }
  func.func @transform_2(%arg0: i32) -> (i32, i32, i32) {
    %c0_i32 = arith.constant 0 : i32
    %c0_i32_0 = arith.constant 0 : i32
    %c0_i32_1 = arith.constant 0 : i32
    return %arg0, %c0_i32, %c0_i32_0 : i32, i32, i32
  }
  func.func @transform_3(%arg0: i32) -> (i32, i32) {
    %c0_i32 = arith.constant 0 : i32
    %c0_i32_0 = arith.constant 0 : i32
    %c0_i32_1 = arith.constant 0 : i32
    return %c0_i32, %c0_i32_0 : i32, i32
  }
  func.func @transform_4(%arg0: i32) -> (i32, i32) {
    %c0_i32 = arith.constant 0 : i32
    %c0_i32_0 = arith.constant 0 : i32
    %c0_i32_1 = arith.constant 0 : i32
    return %c0_i32, %c0_i32_0 : i32, i32
  }
}

module attributes {stable_mosaic.version = 11 : i64} {
  func.func @_bn_res_relu_kernel(%arg0: i32, %arg1: memref<128x128xbf16, #tpu.memory_space<vmem>>, %arg2: memref<1x128xf32, #tpu.memory_space<vmem>>, %arg3: memref<1x128xf32, #tpu.memory_space<vmem>>, %arg4: memref<128x128xbf16, #tpu.memory_space<vmem>>, %arg5: memref<1x128xf32, #tpu.memory_space<vmem>>, %arg6: memref<1x128xf32, #tpu.memory_space<vmem>>, %arg7: memref<128x128xbf16, #tpu.memory_space<vmem>>) attributes {dimension_semantics = [#tpu.dimension_semantics<parallel>], iteration_bounds = array<i64: 1>, scalar_prefetch = 0 : i64, scratch_operands = 0 : i64, tpu.core_type = #tpu.core_type<tc>, window_params = [{transform_indices = @transform_0, window_bounds = array<i64: 128, 128>}, {pipeline_mode = #tpu.pipeline_mode<synchronous>, transform_indices = @transform_1, window_bounds = array<i64: 1, 128>}, {pipeline_mode = #tpu.pipeline_mode<synchronous>, transform_indices = @transform_2, window_bounds = array<i64: 1, 128>}, {transform_indices = @transform_3, window_bounds = array<i64: 128, 128>}, {pipeline_mode = #tpu.pipeline_mode<synchronous>, transform_indices = @transform_4, window_bounds = array<i64: 1, 128>}, {pipeline_mode = #tpu.pipeline_mode<synchronous>, transform_indices = @transform_5, window_bounds = array<i64: 1, 128>}, {transform_indices = @transform_6, window_bounds = array<i64: 128, 128>}]} {
    %c0 = arith.constant 0 : index
    %c0_0 = arith.constant 0 : index
    %0 = vector.load %arg1[%c0, %c0_0] : memref<128x128xbf16, #tpu.memory_space<vmem>>, vector<128x128xbf16>
    %1 = arith.extf %0 : vector<128x128xbf16> to vector<128x128xf32>
    %c0_1 = arith.constant 0 : index
    %c0_2 = arith.constant 0 : index
    %2 = vector.load %arg2[%c0_1, %c0_2] : memref<1x128xf32, #tpu.memory_space<vmem>>, vector<1x128xf32>
    %3 = vector.broadcast %2 : vector<1x128xf32> to vector<128x128xf32>
    %4 = arith.mulf %1, %3 : vector<128x128xf32>
    %c0_3 = arith.constant 0 : index
    %c0_4 = arith.constant 0 : index
    %5 = vector.load %arg3[%c0_3, %c0_4] : memref<1x128xf32, #tpu.memory_space<vmem>>, vector<1x128xf32>
    %6 = vector.broadcast %5 : vector<1x128xf32> to vector<128x128xf32>
    %7 = arith.addf %4, %6 : vector<128x128xf32>
    %c0_5 = arith.constant 0 : index
    %c0_6 = arith.constant 0 : index
    %8 = vector.load %arg4[%c0_5, %c0_6] : memref<128x128xbf16, #tpu.memory_space<vmem>>, vector<128x128xbf16>
    %9 = arith.extf %8 : vector<128x128xbf16> to vector<128x128xf32>
    %c0_7 = arith.constant 0 : index
    %c0_8 = arith.constant 0 : index
    %10 = vector.load %arg5[%c0_7, %c0_8] : memref<1x128xf32, #tpu.memory_space<vmem>>, vector<1x128xf32>
    %11 = vector.broadcast %10 : vector<1x128xf32> to vector<128x128xf32>
    %12 = arith.mulf %9, %11 : vector<128x128xf32>
    %13 = arith.addf %7, %12 : vector<128x128xf32>
    %c0_9 = arith.constant 0 : index
    %c0_10 = arith.constant 0 : index
    %14 = vector.load %arg6[%c0_9, %c0_10] : memref<1x128xf32, #tpu.memory_space<vmem>>, vector<1x128xf32>
    %15 = vector.broadcast %14 : vector<1x128xf32> to vector<128x128xf32>
    %16 = arith.addf %13, %15 : vector<128x128xf32>
    %cst = arith.constant 0.000000e+00 : f32
    %17 = vector.broadcast %cst : f32 to vector<128x128xf32>
    %18 = arith.maximumf %16, %17 : vector<128x128xf32>
    %19 = arith.truncf %18 : vector<128x128xf32> to vector<128x128xbf16>
    %c0_11 = arith.constant 0 : index
    %c0_12 = arith.constant 0 : index
    %20 = vector.load %arg7[%c0_11, %c0_12] : memref<128x128xbf16, #tpu.memory_space<vmem>>, vector<128x128xbf16>
    tpu.vector_store %arg7[%c0_11, %c0_12], %19 {strides = array<i32>} : memref<128x128xbf16, #tpu.memory_space<vmem>>, vector<128x128xbf16>,
    return
  }
  func.func @transform_0(%arg0: i32) -> (i32, i32) {
    %c0_i32 = arith.constant 0 : i32
    %c0_i32_0 = arith.constant 0 : i32
    return %arg0, %c0_i32 : i32, i32
  }
  func.func @transform_1(%arg0: i32) -> (i32, i32) {
    %c0_i32 = arith.constant 0 : i32
    %c0_i32_0 = arith.constant 0 : i32
    %c0_i32_1 = arith.constant 0 : i32
    return %c0_i32, %c0_i32_0 : i32, i32
  }
  func.func @transform_2(%arg0: i32) -> (i32, i32) {
    %c0_i32 = arith.constant 0 : i32
    %c0_i32_0 = arith.constant 0 : i32
    %c0_i32_1 = arith.constant 0 : i32
    return %c0_i32, %c0_i32_0 : i32, i32
  }
  func.func @transform_3(%arg0: i32) -> (i32, i32) {
    %c0_i32 = arith.constant 0 : i32
    %c0_i32_0 = arith.constant 0 : i32
    return %arg0, %c0_i32 : i32, i32
  }
  func.func @transform_4(%arg0: i32) -> (i32, i32) {
    %c0_i32 = arith.constant 0 : i32
    %c0_i32_0 = arith.constant 0 : i32
    %c0_i32_1 = arith.constant 0 : i32
    return %c0_i32, %c0_i32_0 : i32, i32
  }
  func.func @transform_5(%arg0: i32) -> (i32, i32) {
    %c0_i32 = arith.constant 0 : i32
    %c0_i32_0 = arith.constant 0 : i32
    %c0_i32_1 = arith.constant 0 : i32
    return %c0_i32, %c0_i32_0 : i32, i32
  }
  func.func @transform_6(%arg0: i32) -> (i32, i32) {
    %c0_i32 = arith.constant 0 : i32
    %c0_i32_0 = arith.constant 0 : i32
    return %arg0, %c0_i32 : i32, i32
  }
}

module attributes {stable_mosaic.version = 11 : i64} {
  func.func @_conv_stats_kernel(%arg0: i32, %arg1: memref<1x8x8x16xbf16, #tpu.memory_space<vmem>>, %arg2: memref<1x16x128xbf16, #tpu.memory_space<vmem>>, %arg3: memref<1x64x128xbf16, #tpu.memory_space<vmem>>, %arg4: memref<1x128xf32, #tpu.memory_space<vmem>>, %arg5: memref<1x128xf32, #tpu.memory_space<vmem>>) attributes {dimension_semantics = [#tpu.dimension_semantics<arbitrary>], iteration_bounds = array<i64: 2>, scalar_prefetch = 0 : i64, scratch_operands = 0 : i64, tpu.core_type = #tpu.core_type<tc>, window_params = [{transform_indices = @transform_0, window_bounds = array<i64: 1, 8, 8, 16>}, {pipeline_mode = #tpu.pipeline_mode<synchronous>, transform_indices = @transform_1, window_bounds = array<i64: 1, 16, 128>}, {transform_indices = @transform_2, window_bounds = array<i64: 1, 64, 128>}, {pipeline_mode = #tpu.pipeline_mode<synchronous>, transform_indices = @transform_3, window_bounds = array<i64: 1, 128>}, {pipeline_mode = #tpu.pipeline_mode<synchronous>, transform_indices = @transform_4, window_bounds = array<i64: 1, 128>}]} {
    %c0_i32 = arith.constant 0 : i32
    %0 = arith.cmpi eq, %arg0, %c0_i32 : i32
    %1 = arith.extui %0 : i1 to i32
    %c0_i32_0 = arith.constant 0 : i32
    %2 = arith.cmpi ne, %1, %c0_i32_0 : i32
    scf.if %2 {
      %cst_21 = arith.constant 0.000000e+00 : f32
      %25 = vector.broadcast %cst_21 : f32 to vector<1x128xf32>
      %c0_22 = arith.constant 0 : index
      %c0_23 = arith.constant 0 : index
      %26 = vector.load %arg4[%c0_22, %c0_23] : memref<1x128xf32, #tpu.memory_space<vmem>>, vector<1x128xf32>
      tpu.vector_store %arg4[%c0_22, %c0_23], %25 {strides = array<i32>} : memref<1x128xf32, #tpu.memory_space<vmem>>, vector<1x128xf32>,
      %cst_24 = arith.constant 0.000000e+00 : f32
      %27 = vector.broadcast %cst_24 : f32 to vector<1x128xf32>
      %c0_25 = arith.constant 0 : index
      %c0_26 = arith.constant 0 : index
      %28 = vector.load %arg5[%c0_25, %c0_26] : memref<1x128xf32, #tpu.memory_space<vmem>>, vector<1x128xf32>
      tpu.vector_store %arg5[%c0_25, %c0_26], %27 {strides = array<i32>} : memref<1x128xf32, #tpu.memory_space<vmem>>, vector<1x128xf32>,
    } else {
    }
    %cst = arith.constant 0.000000e+00 : f32
    %3 = vector.broadcast %cst : f32 to vector<64x128xf32>
    %c0 = arith.constant 0 : index
    %c0_1 = arith.constant 0 : index
    %c0_2 = arith.constant 0 : index
    %c0_3 = arith.constant 0 : index
    %4 = vector.load %arg1[%c0, %c0_1, %c0_2, %c0_3] : memref<1x8x8x16xbf16, #tpu.memory_space<vmem>>, vector<1x8x8x16xbf16>
    %5 = vector.shape_cast %4 : vector<1x8x8x16xbf16> to vector<8x8x16xbf16>
    %6 = vector.shape_cast %5 : vector<8x8x16xbf16> to vector<64x16xbf16>
    %c0_4 = arith.constant 0 : index
    %c0_5 = arith.constant 0 : index
    %c0_6 = arith.constant 0 : index
    %7 = vector.load %arg2[%c0_4, %c0_5, %c0_6] : memref<1x16x128xbf16, #tpu.memory_space<vmem>>, vector<1x16x128xbf16>
    %8 = vector.shape_cast %7 : vector<1x16x128xbf16> to vector<16x128xbf16>
    %cst_7 = arith.constant dense<0.000000e+00> : vector<64x128xf32>
    %9 = tpu.matmul %6, %8, %cst_7 {dimension_numbers = #tpu.dot_dimension_numbers<[1], [0], [0], [1], [0, 0, 1, 1], [], []>} : vector<64x16xbf16>, vector<16x128xbf16>, vector<64x128xf32> -> vector<64x128xf32>
    %10 = arith.addf %3, %9 : vector<64x128xf32>
    %11 = vector.shape_cast %10 : vector<64x128xf32> to vector<1x64x128xf32>
    %12 = arith.truncf %11 : vector<1x64x128xf32> to vector<1x64x128xbf16>
    %c0_8 = arith.constant 0 : index
    %c0_9 = arith.constant 0 : index
    %c0_10 = arith.constant 0 : index
    %13 = vector.load %arg3[%c0_8, %c0_9, %c0_10] : memref<1x64x128xbf16, #tpu.memory_space<vmem>>, vector<1x64x128xbf16>
    tpu.vector_store %arg3[%c0_8, %c0_9, %c0_10], %12 {strides = array<i32>} : memref<1x64x128xbf16, #tpu.memory_space<vmem>>, vector<1x64x128xbf16>,
    %c0_11 = arith.constant 0 : index
    %c0_12 = arith.constant 0 : index
    %14 = vector.load %arg4[%c0_11, %c0_12] : memref<1x128xf32, #tpu.memory_space<vmem>>, vector<1x128xf32>
    %cst_13 = arith.constant dense<0.000000e+00> : vector<128xf32>
    %15 = vector.multi_reduction <add>, %10, %cst_13 [0] : vector<64x128xf32> to vector<128xf32>
    %16 = vector.shape_cast %15 : vector<128xf32> to vector<1x128xf32>
    %17 = arith.addf %14, %16 : vector<1x128xf32>
    %c0_14 = arith.constant 0 : index
    %c0_15 = arith.constant 0 : index
    %18 = vector.load %arg4[%c0_14, %c0_15] : memref<1x128xf32, #tpu.memory_space<vmem>>, vector<1x128xf32>
    tpu.vector_store %arg4[%c0_14, %c0_15], %17 {strides = array<i32>} : memref<1x128xf32, #tpu.memory_space<vmem>>, vector<1x128xf32>,
    %c0_16 = arith.constant 0 : index
    %c0_17 = arith.constant 0 : index
    %19 = vector.load %arg5[%c0_16, %c0_17] : memref<1x128xf32, #tpu.memory_space<vmem>>, vector<1x128xf32>
    %20 = arith.mulf %10, %10 : vector<64x128xf32>
    %cst_18 = arith.constant dense<0.000000e+00> : vector<128xf32>
    %21 = vector.multi_reduction <add>, %20, %cst_18 [0] : vector<64x128xf32> to vector<128xf32>
    %22 = vector.shape_cast %21 : vector<128xf32> to vector<1x128xf32>
    %23 = arith.addf %19, %22 : vector<1x128xf32>
    %c0_19 = arith.constant 0 : index
    %c0_20 = arith.constant 0 : index
    %24 = vector.load %arg5[%c0_19, %c0_20] : memref<1x128xf32, #tpu.memory_space<vmem>>, vector<1x128xf32>
    tpu.vector_store %arg5[%c0_19, %c0_20], %23 {strides = array<i32>} : memref<1x128xf32, #tpu.memory_space<vmem>>, vector<1x128xf32>,
    return
  }
  func.func @transform_0(%arg0: i32) -> (i32, i32, i32, i32) {
    %c0_i32 = arith.constant 0 : i32
    %c0_i32_0 = arith.constant 0 : i32
    %c0_i32_1 = arith.constant 0 : i32
    %c0_i32_2 = arith.constant 0 : i32
    return %arg0, %c0_i32, %c0_i32_0, %c0_i32_1 : i32, i32, i32, i32
  }
  func.func @transform_1(%arg0: i32) -> (i32, i32, i32) {
    %c0_i32 = arith.constant 0 : i32
    %c0_i32_0 = arith.constant 0 : i32
    %c0_i32_1 = arith.constant 0 : i32
    %c0_i32_2 = arith.constant 0 : i32
    return %c0_i32, %c0_i32_0, %c0_i32_1 : i32, i32, i32
  }
  func.func @transform_2(%arg0: i32) -> (i32, i32, i32) {
    %c0_i32 = arith.constant 0 : i32
    %c0_i32_0 = arith.constant 0 : i32
    %c0_i32_1 = arith.constant 0 : i32
    return %arg0, %c0_i32, %c0_i32_0 : i32, i32, i32
  }
  func.func @transform_3(%arg0: i32) -> (i32, i32) {
    %c0_i32 = arith.constant 0 : i32
    %c0_i32_0 = arith.constant 0 : i32
    %c0_i32_1 = arith.constant 0 : i32
    return %c0_i32, %c0_i32_0 : i32, i32
  }
  func.func @transform_4(%arg0: i32) -> (i32, i32) {
    %c0_i32 = arith.constant 0 : i32
    %c0_i32_0 = arith.constant 0 : i32
    %c0_i32_1 = arith.constant 0 : i32
    return %c0_i32, %c0_i32_0 : i32, i32
  }
}

module attributes {stable_mosaic.version = 11 : i64} {
  func.func @_bn_res_relu_kernel(%arg0: i32, %arg1: memref<128x128xbf16, #tpu.memory_space<vmem>>, %arg2: memref<1x128xf32, #tpu.memory_space<vmem>>, %arg3: memref<1x128xf32, #tpu.memory_space<vmem>>, %arg4: memref<128x128xbf16, #tpu.memory_space<vmem>>, %arg5: memref<1x128xf32, #tpu.memory_space<vmem>>, %arg6: memref<1x128xf32, #tpu.memory_space<vmem>>, %arg7: memref<128x128xf32, #tpu.memory_space<vmem>>) attributes {dimension_semantics = [#tpu.dimension_semantics<parallel>], iteration_bounds = array<i64: 1>, scalar_prefetch = 0 : i64, scratch_operands = 0 : i64, tpu.core_type = #tpu.core_type<tc>, window_params = [{transform_indices = @transform_0, window_bounds = array<i64: 128, 128>}, {pipeline_mode = #tpu.pipeline_mode<synchronous>, transform_indices = @transform_1, window_bounds = array<i64: 1, 128>}, {pipeline_mode = #tpu.pipeline_mode<synchronous>, transform_indices = @transform_2, window_bounds = array<i64: 1, 128>}, {transform_indices = @transform_3, window_bounds = array<i64: 128, 128>}, {pipeline_mode = #tpu.pipeline_mode<synchronous>, transform_indices = @transform_4, window_bounds = array<i64: 1, 128>}, {pipeline_mode = #tpu.pipeline_mode<synchronous>, transform_indices = @transform_5, window_bounds = array<i64: 1, 128>}, {transform_indices = @transform_6, window_bounds = array<i64: 128, 128>}]} {
    %c0 = arith.constant 0 : index
    %c0_0 = arith.constant 0 : index
    %0 = vector.load %arg1[%c0, %c0_0] : memref<128x128xbf16, #tpu.memory_space<vmem>>, vector<128x128xbf16>
    %1 = arith.extf %0 : vector<128x128xbf16> to vector<128x128xf32>
    %c0_1 = arith.constant 0 : index
    %c0_2 = arith.constant 0 : index
    %2 = vector.load %arg2[%c0_1, %c0_2] : memref<1x128xf32, #tpu.memory_space<vmem>>, vector<1x128xf32>
    %3 = vector.broadcast %2 : vector<1x128xf32> to vector<128x128xf32>
    %4 = arith.mulf %1, %3 : vector<128x128xf32>
    %c0_3 = arith.constant 0 : index
    %c0_4 = arith.constant 0 : index
    %5 = vector.load %arg3[%c0_3, %c0_4] : memref<1x128xf32, #tpu.memory_space<vmem>>, vector<1x128xf32>
    %6 = vector.broadcast %5 : vector<1x128xf32> to vector<128x128xf32>
    %7 = arith.addf %4, %6 : vector<128x128xf32>
    %c0_5 = arith.constant 0 : index
    %c0_6 = arith.constant 0 : index
    %8 = vector.load %arg4[%c0_5, %c0_6] : memref<128x128xbf16, #tpu.memory_space<vmem>>, vector<128x128xbf16>
    %9 = arith.extf %8 : vector<128x128xbf16> to vector<128x128xf32>
    %c0_7 = arith.constant 0 : index
    %c0_8 = arith.constant 0 : index
    %10 = vector.load %arg5[%c0_7, %c0_8] : memref<1x128xf32, #tpu.memory_space<vmem>>, vector<1x128xf32>
    %11 = vector.broadcast %10 : vector<1x128xf32> to vector<128x128xf32>
    %12 = arith.mulf %9, %11 : vector<128x128xf32>
    %13 = arith.addf %7, %12 : vector<128x128xf32>
    %c0_9 = arith.constant 0 : index
    %c0_10 = arith.constant 0 : index
    %14 = vector.load %arg6[%c0_9, %c0_10] : memref<1x128xf32, #tpu.memory_space<vmem>>, vector<1x128xf32>
    %15 = vector.broadcast %14 : vector<1x128xf32> to vector<128x128xf32>
    %16 = arith.addf %13, %15 : vector<128x128xf32>
    %cst = arith.constant 0.000000e+00 : f32
    %17 = vector.broadcast %cst : f32 to vector<128x128xf32>
    %18 = arith.maximumf %16, %17 : vector<128x128xf32>
    %c0_11 = arith.constant 0 : index
    %c0_12 = arith.constant 0 : index
    %19 = vector.load %arg7[%c0_11, %c0_12] : memref<128x128xf32, #tpu.memory_space<vmem>>, vector<128x128xf32>
    tpu.vector_store %arg7[%c0_11, %c0_12], %18 {strides = array<i32>} : memref<128x128xf32, #tpu.memory_space<vmem>>, vector<128x128xf32>,
    return
  }
  func.func @transform_0(%arg0: i32) -> (i32, i32) {
    %c0_i32 = arith.constant 0 : i32
    %c0_i32_0 = arith.constant 0 : i32
    return %arg0, %c0_i32 : i32, i32
  }
  func.func @transform_1(%arg0: i32) -> (i32, i32) {
    %c0_i32 = arith.constant 0 : i32
    %c0_i32_0 = arith.constant 0 : i32
    %c0_i32_1 = arith.constant 0 : i32
    return %c0_i32, %c0_i32_0 : i32, i32
  }
  func.func @transform_2(%arg0: i32) -> (i32, i32) {
    %c0_i32 = arith.constant 0 : i32
    %c0_i32_0 = arith.constant 0 : i32
    %c0_i32_1 = arith.constant 0 : i32
    return %c0_i32, %c0_i32_0 : i32, i32
  }
  func.func @transform_3(%arg0: i32) -> (i32, i32) {
    %c0_i32 = arith.constant 0 : i32
    %c0_i32_0 = arith.constant 0 : i32
    return %arg0, %c0_i32 : i32, i32
  }
  func.func @transform_4(%arg0: i32) -> (i32, i32) {
    %c0_i32 = arith.constant 0 : i32
    %c0_i32_0 = arith.constant 0 : i32
    %c0_i32_1 = arith.constant 0 : i32
    return %c0_i32, %c0_i32_0 : i32, i32
  }
  func.func @transform_5(%arg0: i32) -> (i32, i32) {
    %c0_i32 = arith.constant 0 : i32
    %c0_i32_0 = arith.constant 0 : i32
    %c0_i32_1 = arith.constant 0 : i32
    return %c0_i32, %c0_i32_0 : i32, i32
  }
  func.func @transform_6(%arg0: i32) -> (i32, i32) {
    %c0_i32 = arith.constant 0 : i32
    %c0_i32_0 = arith.constant 0 : i32
    return %arg0, %c0_i32 : i32, i32
  }
}

</mosaic_0001>

<bundles_post_ra>
// kernel: skip_block_forward.10
= control target key start
LH: loop header
LB: loop body
LE: loop exit
PB: predicated region body
PF: predicated region fallthrough
CT: control target
= control target key end

     0   :  { %s336_s0 = inlined_call_operand.vmem [shape: bf16[128,128], index: 0, kind: input, shape index: {}]   ;;  %s337_s1 = inlined_call_operand.vmem [shape: f32[1,128], index: 1, kind: input, shape index: {}]   ;;  %s338_s2 = inlined_call_operand.vmem [shape: f32[1,128], index: 2, kind: input, shape index: {}]   ;;  %s339_s3 = inlined_call_operand.vmem [shape: bf16[128,128], index: 3, kind: output, shape index: {}]  }
   0x1   :  { %v139_v0 = vld [vmem:[%s336_s0] sm:$0xff]   ;;  %v210_v5 = vld [vmem:[%s336_s0 + $0x8] sm:$0xff]   ;;  %v211_v8 = vld [vmem:[%s336_s0 + $0x10] sm:$0xff]  }
   0x2   :  { %v252_v1 = vld [vmem:[%s337_s1] ss:$0 sm:$0xff]  ;;  %v140_v2 = vunpack.c.l.bf16 %v139_v0  ;;  %v141_v3 = vunpack.c.h.bf16 %v139_v0  ;;  %v144_v6 = vunpack.c.l.bf16 %v210_v5  ;;  %v145_v7 = vunpack.c.h.bf16 %v210_v5  ;;  %v212_v9 = vld [vmem:[%s336_s0 + $0x18] sm:$0xff]   ;;  %v214_v35 = vld [vmem:[%s336_s0 + $0x28] sm:$0xff]  }
   0x3   :  { %v257_v4 = vld [vmem:[%s338_s2] ss:$0 sm:$0xff]  ;;  %v148_v12 = vunpack.c.l.bf16 %v211_v8  ;;  %v149_v13 = vunpack.c.h.bf16 %v211_v8  ;;  %v152_v16 = vunpack.c.l.bf16 %v212_v9  ;;  %v153_v17 = vunpack.c.h.bf16 %v212_v9  ;;  %v215_v40 = vld [vmem:[%s336_s0 + $0x30] sm:$0xff]   ;;  %v216_v45 = vld [vmem:[%s336_s0 + $0x38] sm:$0xff]  }
   0x4   :  { %v50_v10 = vmul.f32 %v252_v1, %v140_v2  ;;  %v51_v11 = vmul.f32 %v252_v1, %v141_v3  ;;  %v52_v14 = vmul.f32 %v252_v1, %v144_v6  ;;  %v53_v15 = vmul.f32 %v252_v1, %v145_v7  ;;  %v213_v26 = vld [vmem:[%s336_s0 + $0x20] sm:$0xff]  }
   0x5   :  { %v54_v20 = vmul.f32 %v252_v1, %v148_v12  ;;  %v55_v21 = vmul.f32 %v252_v1, %v149_v13  ;;  %v56_v24 = vmul.f32 %v252_v1, %v152_v16  ;;  %v57_v25 = vmul.f32 %v252_v1, %v153_v17 }
   0x6   :  { %v70_v18 = vadd.f32 %v257_v4, %v50_v10  ;;  %v71_v19 = vadd.f32 %v257_v4, %v51_v11  ;;  %v72_v22 = vadd.f32 %v257_v4, %v52_v14  ;;  %v73_v23 = vadd.f32 %v257_v4, %v53_v15 }
   0x7   :  { %v74_v29 = vadd.f32 %v257_v4, %v54_v20  ;;  %v75_v30 = vadd.f32 %v257_v4, %v55_v21  ;;  %v76_v33 = vadd.f32 %v257_v4, %v56_v24  ;;  %v77_v34 = vadd.f32 %v257_v4, %v57_v25 }
   0x8   :  { %v86_v27 = vmax.f32 %v70_v18, 0.0  ;;  %v87_v28 = vmax.f32 %v71_v19, 0.0  ;;  %v88_v31 = vmax.f32 %v72_v22, 0.0  ;;  %v89_v32 = vmax.f32 %v73_v23, 0.0 }
   0x9   :  { %v90_v37 = vmax.f32 %v74_v29, 0.0  ;;  %v91_v38 = vmax.f32 %v75_v30, 0.0  ;;  %v156_v39 = vunpack.c.l.bf16 %v213_v26  ;;  %v92_v42 = vmax.f32 %v76_v33, 0.0 }
   0xa   :  { %v173_v36 = vpack.c.bf16 %v87_v28, %v86_v27  ;;  %v178_v41 = vpack.c.bf16 %v89_v32, %v88_v31  ;;  %v93_v43 = vmax.f32 %v77_v34, 0.0  ;;  %v157_v44 = vunpack.c.h.bf16 %v213_v26 }
   0xb   :  { %v183_v46 = vpack.c.bf16 %v91_v38, %v90_v37  ;;  %v58_v47 = vmul.f32 %v252_v1, %v156_v39  ;;  %v160_v48 = vunpack.c.l.bf16 %v214_v35  ;;  %v161_v49 = vunpack.c.h.bf16 %v214_v35 }
   0xc   :  { %174 = vst [vmem:[%s339_s3] sm:$0xff] %v173_v36   ;;  %v188_v50 = vpack.c.bf16 %v93_v43, %v92_v42  ;;  %v59_v51 = vmul.f32 %v252_v1, %v157_v44  ;;  %v164_v52 = vunpack.c.l.bf16 %v215_v40  ;;  %v165_v53 = vunpack.c.h.bf16 %v215_v40 }
   0xd   :  { %217 = vst [vmem:[%s339_s3 + $0x8] sm:$0xff] %v178_v41   ;;  %v78_v54 = vadd.f32 %v257_v4, %v58_v47  ;;  %v60_v55 = vmul.f32 %v252_v1, %v160_v48  ;;  %v61_v56 = vmul.f32 %v252_v1, %v161_v49  ;;  %v168_v57 = vunpack.c.l.bf16 %v216_v45 }
   0xe   :  { %218 = vst [vmem:[%s339_s3 + $0x10] sm:$0xff] %v183_v46   ;;  %v79_v58 = vadd.f32 %v257_v4, %v59_v51  ;;  %v62_v59 = vmul.f32 %v252_v1, %v164_v52  ;;  %v63_v60 = vmul.f32 %v252_v1, %v165_v53  ;;  %v169_v61 = vunpack.c.h.bf16 %v216_v45 }
   0xf   :  { %219 = vst [vmem:[%s339_s3 + $0x18] sm:$0xff] %v188_v50   ;;  %v94_v62 = vmax.f32 %v78_v54, 0.0  ;;  %v80_v63 = vadd.f32 %v257_v4, %v60_v55  ;;  %v81_v0 = vadd.f32 %v257_v4, %v61_v56  ;;  %v64_v2 = vmul.f32 %v252_v1, %v168_v57 }
  0x10   :  { %v95_v3 = vmax.f32 %v79_v58, 0.0  ;;  %v82_v5 = vadd.f32 %v257_v4, %v62_v59  ;;  %v83_v6 = vadd.f32 %v257_v4, %v63_v60  ;;  %v65_v7 = vmul.f32 %v252_v1, %v169_v61 }
  0x11   :  { %v96_v8 = vmax.f32 %v80_v63, 0.0  ;;  %v97_v9 = vmax.f32 %v81_v0, 0.0  ;;  %v84_v10 = vadd.f32 %v257_v4, %v64_v2 }
  0x12   :  { %v193_v11 = vpack.c.bf16 %v95_v3, %v94_v62  ;;  %v98_v12 = vmax.f32 %v82_v5, 0.0  ;;  %v99_v13 = vmax.f32 %v83_v6, 0.0  ;;  %v85_v14 = vadd.f32 %v257_v4, %v65_v7 }
  0x13   :  { %v198_v15 = vpack.c.bf16 %v97_v9, %v96_v8  ;;  %v100_v16 = vmax.f32 %v84_v10, 0.0 }
  0x14   :  { %220 = vst [vmem:[%s339_s3 + $0x20] sm:$0xff] %v193_v11   ;;  %v203_v17 = vpack.c.bf16 %v99_v13, %v98_v12  ;;  %v101_v18 = vmax.f32 %v85_v14, 0.0 }
  0x15   :  { %221 = vst [vmem:[%s339_s3 + $0x28] sm:$0xff] %v198_v15  }
  0x16   :  { %222 = vst [vmem:[%s339_s3 + $0x30] sm:$0xff] %v203_v17   ;;  %v208_v1 = vpack.c.bf16 %v101_v18, %v100_v16 }
  0x18   :  { %223 = vst [vmem:[%s339_s3 + $0x38] sm:$0xff] %v208_v1  }

// kernel: skip_block_forward.9
= control target key start
LH: loop header
LB: loop body
LE: loop exit
PB: predicated region body
PF: predicated region fallthrough
CT: control target
= control target key end

     0   :  { %s1056_s15 = smov 0   ;;  %s1213_s0 = inlined_call_operand.vmem [shape: bf16[2,9,9,16], index: 0, kind: input, shape index: {}]   ;;  %s1214_s1 = inlined_call_operand.vmem [shape: bf16[4,16,128], index: 1, kind: input, shape index: {}]   ;;  %s1215_s2 = inlined_call_operand.vmem [shape: bf16[2,64,128], index: 2, kind: output, shape index: {0}]   ;;  %s1216_s3 = inlined_call_operand.vmem [shape: f32[1,128], index: 3, kind: output, shape index: {1}]   ;;  %s1217_s4 = inlined_call_operand.vmem [shape: f32[1,128], index: 4, kind: output, shape index: {2}]  }
   0x1 LB: > { %s871_s16 = sadd.s32 4294967295, %s1028_s15   ;;  %p875_p0 = scmp.ge.s32.totalorder %s1028_s15, 1  ;;  %s1028_s15 = sphi %s1056_s15, %s15_s15  }
   0x2   : > { %p157_p1 = scmp.lt.s32.totalorder %s1028_s15, 3 }
   0x4   : > { %p158_p2 = pnand %p875_p0, %p157_p1 }
   0x5   : > { %p183_p3 = scmp.lt.s32.totalorder (!%p158_p2), %s871_s16, 1  ;;  %p879_p4 = scmp.ne.s32.totalorder (!%p158_p2), %s871_s16, 0 }
   0x6   : > { %161 = sbr.rel (%p158_p2) target bundleno = 251 (0xfb), region = 28 }
   0xb   : > { %s184_s17 = scalar_select %p183_p3, %s871_s16, 1 }
   0xc   : > { %197 = sbr.rel (%p879_p4) target bundleno = 20 (0x14), region = 32 }
   0xd   : > { %s1012_s18 = smul.u32 72, %s184_s17  ;;  %s976_s19 = sshll.u32 %s184_s17, 5 }
   0xe   : > { %s1067_s22 = scalar_lea.vmem %s1215_s2, %s976_s19 }
   0xf   : > { %s1072_s25 = scalar_lea.vmem %s1213_s0, %s1012_s18 }
  0x11   : > { %v1030_v0 = vmov 0.0  }
  0x12   : > { %198 = vst [vmem:[%s1216_s3] sm:$0x1] %v1030_v0 }
  0x13   : > { %199 = vst [vmem:[%s1217_s4] sm:$0x1] %v1030_v0 }
  0x14 PF: > { %v987_v1 = vld [vmem:[%s1214_s1 + $0x10] sm:$0xff]  ;;  %v981_v2 = vld [vmem:[%s1214_s1] sm:$0xff]  ;;  %vm354_vm0 = vcmask 130048   ;;  %v926_v3 = vld [vmem:[%s1072_s25 + $0x8] sm:$0xf] }
  0x15   : > { %v983_v4 = vld [vmem:[%s1072_s25 + $0xc] sm:$0xf0]  ;;  %v892_v5 = vld [vmem:[%s1072_s25] sm:$0xf]  ;;  %v977_v6 = vld [vmem:[%s1072_s25 + $0x4] sm:$0xf0]  ;;  %520 = vmatpush.bf16.msra.mxu2 %v987_v1  ;;  %441 = vmatpush.bf16.msra.mxu1 %v981_v2 }
  0x16   : > { %v927_v7 = vor.u32 %v983_v4, %v926_v3  ;;  %v893_v8 = vor.u32 %v977_v6, %v892_v5  ;;  %v982_v9 = vld [vmem:[%s1214_s1 + $0x8] sm:$0xff]  ;;  %v988_v10 = vld [vmem:[%s1214_s1 + $0x18] sm:$0xff]  ;;  %v200_v11 = vld [vmem:[%s1072_s25] sm:$0xf]  ;;  %vm218_vm1 = vsmask.f32 3328 }
  0x17   : > { %v201_v12 = vld [vmem:[%s1072_s25 + $0x8] sm:$0xf]  ;;  %v210_v13 = vld [vmem:[%s1072_s25 + $0x4] sm:$0x1]  ;;  %v211_v14 = vld [vmem:[%s1072_s25 + $0xc] sm:$0x1]  ;;  %374 = vmatpush.bf16.msra.mxu0 %v982_v9  ;;  %718 = vmatpush.bf16.msra.mxu3 %v988_v10 }
  0x18   : > { %vm219_vm2 = vsmask.f32 7440  ;;  %v222_v15 = vshrl.u32 %v200_v11, 16  ;;  %v225_v16 = vshll.u32 %v200_v11, 16  ;;  %v231_v17 = vshll.u32 %v210_v13, 16  ;;  %944 = vmatmul.msk.bf16.vlgmr.msra.gmra.mxu2 %vm354_vm0, %v927_v7  ;;  %910 = vmatmul.msk.bf16.vlgmr.msra.gmra.mxu1 %vm354_vm0, %v893_v8 }
  0x19   : > { %v236_v18 = vshrl.u32 %v201_v12, 16  ;;  %v239_v19 = vshll.u32 %v201_v12, 16  ;;  %v245_v20 = vshll.u32 %v211_v14, 16  ;;  %v948_v21 = vld [vmem:[%s1072_s25 + $0x8] sm:$0xf]  ;;  %vm1108_vm3 = vmor %vm218_vm1, %vm219_vm2 }
  0x1a   : > { %v224_v22 = vrot.slane %v222_v15, 4  ;;  %v227_v23 = vrot.slane %v225_v16, 5  ;;  %v233_v24 = vrot.slane %v231_v17, 5  ;;  %v949_v25 = vld [vmem:[%s1072_s25 + $0xc] sm:$0x1]  ;;  %v567_v26 = vshrl.u32 %v948_v21, 16 }
  0x1b   : > { %v238_v27 = vrot.slane %v236_v18, 4  ;;  %v241_v28 = vrot.slane %v239_v19, 5  ;;  %v247_v29 = vrot.slane %v245_v20, 5  ;;  %v950_v30 = vld [vmem:[%s1072_s25 + $0x10] sm:$0xf]  ;;  %v570_v31 = vshll.u32 %v948_v21, 16 }
  0x1c   : > { %v228_v32 = vor.u32 %v227_v23, %v224_v22  ;;  %v951_v33 = vld [vmem:[%s1072_s25 + $0x14] sm:$0x1]  ;;  %v569_v34 = vrot.slane %v567_v26, 4  ;;  %v576_v35 = vshll.u32 %v949_v25, 16  ;;  %v581_v36 = vshrl.u32 %v950_v30, 16 }
  0x1d   : > { %v242_v38 = vor.u32 %v241_v28, %v238_v27  ;;  %v572_v39 = vrot.slane %v570_v31, 5  ;;  %v584_v40 = vshll.u32 %v950_v30, 16  ;;  %v590_v41 = vshll.u32 %v951_v33, 16  ;;  %v930_v42 = vld [vmem:[%s1072_s25 + $0x18] sm:$0xf] }
  0x1e   : > { %v229_v43 = vrot.slane %v228_v32, 4  ;;  %v578_v44 = vrot.slane %v576_v35, 5  ;;  %v583_v45 = vrot.slane %v581_v36, 4  ;;  %v984_v46 = vld [vmem:[%s1072_s25 + $0x1c] sm:$0xf0] }
  0x1f   : > { %v243_v47 = vrot.slane %v242_v38, 4  ;;  %v573_v48 = vor.u32 %v572_v39, %v569_v34  ;;  %v586_v49 = vrot.slane %v584_v40, 5  ;;  %v592_v50 = vrot.slane %v590_v41, 5  ;;  %v896_v51 = vld [vmem:[%s1072_s25 + $0x10] sm:$0xf] }
  0x20   : > { %v234_v52 = vsel %vm1108_vm3, %v229_v43, %v233_v24  ;;  %v931_v53 = vor.u32 %v984_v46, %v930_v42  ;;  %v978_v54 = vld [vmem:[%s1072_s25 + $0x14] sm:$0xf0]  ;;  %v202_v55 = vld [vmem:[%s1072_s25 + $0x10] sm:$0xf]  ;;  %v212_v61 = vld [vmem:[%s1072_s25 + $0x14] sm:$0x1] }
  0x21   : > { %v203_v56 = vld [vmem:[%s1072_s25 + $0x18] sm:$0xf]  ;;  %v248_v57 = vsel %vm1108_vm3, %v243_v47, %v247_v29  ;;  %v336_v58 = vunpack.c.l.b16 %v234_v52  ;;  %v574_v59 = vrot.slane %v573_v48, 4  ;;  %v587_v60 = vor.u32 %v586_v49, %v583_v45  ;;  %v213_v0 = vld [vmem:[%s1072_s25 + $0x1c] sm:$0x1] }
  0x22   : > { %v337_v62 = vunpack.c.l.b16 %v248_v57  ;;  %v897_v63 = vor.u32 %v978_v54, %v896_v51  ;;  %v250_v1 = vshrl.u32 %v202_v55, 16  ;;  %v253_v2 = vshll.u32 %v202_v55, 16  ;;  %v952_v7 = vld [vmem:[%s1072_s25 + $0x18] sm:$0xf]  ;;  %v953_v12 = vld [vmem:[%s1072_s25 + $0x1c] sm:$0x1] }
  0x23   : > { %v579_v3 = vsel %vm1108_vm3, %v574_v59, %v578_v44  ;;  %v588_v4 = vrot.slane %v587_v60, 4  ;;  %v259_v5 = vshll.u32 %v212_v61, 16  ;;  %v264_v6 = vshrl.u32 %v203_v56, 16  ;;  %v954_v13 = vld [vmem:[%s1072_s25 + $0x20] sm:$0xf] }
  0x24   : > { %v344_v8 = vpack.c.b16 %v337_v62, %v336_v58  ;;  %v681_v9 = vunpack.c.l.b16 %v579_v3  ;;  %v252_v10 = vrot.slane %v250_v1, 4  ;;  %v255_v11 = vrot.slane %v253_v2, 5  ;;  %v955_v23 = vld [vmem:[%s1072_s25 + $0x24] sm:$0x1]  ;;  %v204_v33 = vld [vmem:[%s1072_s25 + $0x20] sm:$0xf] }
  0x25   : > { %v593_v14 = vsel %vm1108_vm3, %v588_v4, %v592_v50  ;;  %v261_v15 = vrot.slane %v259_v5, 5  ;;  %v266_v16 = vrot.slane %v264_v6, 4  ;;  %v267_v17 = vshll.u32 %v203_v56, 16  ;;  %v205_v39 = vld [vmem:[%s1072_s25 + $0x28] sm:$0xf] }
  0x26   : > { %886 = vmatmul.msk.bf16.vlgmr.msra.gmra.mxu0 %vm354_vm0, %v344_v8  ;;  %v682_v18 = vunpack.c.l.b16 %v593_v14  ;;  %v256_v19 = vor.u32 %v255_v11, %v252_v10  ;;  %v273_v20 = vshll.u32 %v213_v0, 16  ;;  %v595_v21 = vshrl.u32 %v952_v7, 16  ;;  %v934_v43 = vld [vmem:[%s1072_s25 + $0x28] sm:$0xf]  ;;  %v985_v46 = vld [vmem:[%s1072_s25 + $0x2c] sm:$0xf0] }
  0x27   : > { %v269_v22 = vrot.slane %v267_v17, 5  ;;  %v598_v24 = vshll.u32 %v952_v7, 16  ;;  %v604_v25 = vshll.u32 %v953_v12, 16  ;;  %v609_v26 = vshrl.u32 %v954_v13, 16  ;;  %v214_v52 = vld [vmem:[%s1072_s25 + $0x24] sm:$0x1] }
  0x28   : > { %v689_v27 = vpack.c.b16 %v682_v18, %v681_v9  ;;  %v257_v28 = vrot.slane %v256_v19, 4  ;;  %v597_v29 = vrot.slane %v595_v21, 4  ;;  %945 = vmatmul.msk.bf16.gmra.mxu2 %vm354_vm0, %v931_v53  ;;  %911 = vmatmul.msk.bf16.gmra.mxu1 %vm354_vm0, %v897_v63  ;;  %v275_v31 = vrot.slane %v273_v20, 5  ;;  %v215_v56 = vld [vmem:[%s1072_s25 + $0x2c] sm:$0x1] }
  0x29   : > { %v270_v30 = vor.u32 %v269_v22, %v266_v16  ;;  %v600_v32 = vrot.slane %v598_v24, 5  ;;  %v611_v35 = vrot.slane %v609_v26, 4  ;;  %v612_v36 = vshll.u32 %v954_v13, 16  ;;  %v956_v59 = vld [vmem:[%s1072_s25 + $0x28] sm:$0xf] }
  0x2a   : > { %970 = vmatmul.msk.bf16.vlgmr.msra.gmra.mxu3 %vm354_vm0, %v689_v27  ;;  %v262_v34 = vsel %vm1108_vm3, %v257_v28, %v261_v15  ;;  %v618_v38 = vshll.u32 %v955_v23, 16  ;;  %v606_v42 = vrot.slane %v604_v25, 5  ;;  %v278_v47 = vshrl.u32 %v204_v33, 16  ;;  %v958_v63 = vld [vmem:[%s1072_s25 + $0x30] sm:$0xf] }
  0x2b   : > { %v271_v40 = vrot.slane %v270_v30, 4  ;;  %v601_v41 = vor.u32 %v600_v32, %v597_v29  ;;  %v338_v44 = vunpack.c.l.b16 %v262_v34  ;;  %v614_v45 = vrot.slane %v612_v36, 5  ;;  %v900_v2 = vld [vmem:[%s1072_s25 + $0x20] sm:$0xf]  ;;  %v979_v3 = vld [vmem:[%s1072_s25 + $0x24] sm:$0xf0] }
  0x2c   : > { %v281_v48 = vshll.u32 %v204_v33, 16  ;;  %v620_v51 = vrot.slane %v618_v38, 5  ;;  %v292_v53 = vshrl.u32 %v205_v39, 16  ;;  %v280_v57 = vrot.slane %v278_v47, 4  ;;  %v957_v8 = vld [vmem:[%s1072_s25 + $0x2c] sm:$0x1] }
  0x2d   : > { %v276_v49 = vsel %vm1108_vm3, %v271_v40, %v275_v31  ;;  %v602_v50 = vrot.slane %v601_v41, 4  ;;  %v615_v55 = vor.u32 %v614_v45, %v611_v35  ;;  %v295_v62 = vshll.u32 %v205_v39, 16  ;;  %v959_v21 = vld [vmem:[%s1072_s25 + $0x34] sm:$0x1]  ;;  %v206_v30 = vld [vmem:[%s1072_s25 + $0x30] sm:$0xf] }
  0x2e   : > { %v339_v54 = vunpack.c.l.b16 %v276_v49  ;;  %v283_v58 = vrot.slane %v281_v48, 5  ;;  %v294_v61 = vrot.slane %v292_v53, 4  ;;  %v935_v1 = vor.u32 %v985_v46, %v934_v43  ;;  %v207_v33 = vld [vmem:[%s1072_s25 + $0x38] sm:$0xf]  ;;  %v962_v47 = vld [vmem:[%s1072_s25 + $0x40] sm:$0xf] }
  0x2f   : > { %v607_v60 = vsel %vm1108_vm3, %v602_v50, %v606_v42  ;;  %v616_v0 = vrot.slane %v615_v55, 4  ;;  %v287_v5 = vshll.u32 %v214_v52, 16  ;;  %v297_v6 = vrot.slane %v295_v62, 5  ;;  %v960_v46 = vld [vmem:[%s1072_s25 + $0x38] sm:$0xf] }
  0x30   : > { %v284_v4 = vor.u32 %v283_v58, %v280_v57  ;;  %v301_v7 = vshll.u32 %v215_v56, 16  ;;  %v623_v9 = vshrl.u32 %v956_v59, 16  ;;  %v626_v10 = vshll.u32 %v956_v59, 16  ;;  %v216_v52 = vld [vmem:[%s1072_s25 + $0x34] sm:$0x1] }
  0x31   : > { %v345_v11 = vpack.c.b16 %v339_v54, %v338_v44  ;;  %v621_v12 = vsel %vm1108_vm3, %v616_v0, %v620_v51  ;;  %v683_v13 = vunpack.c.l.b16 %v607_v60  ;;  %v637_v14 = vshrl.u32 %v958_v63, 16  ;;  %v217_v57 = vld [vmem:[%s1072_s25 + $0x3c] sm:$0x1]  ;;  %v938_v0 = vld [vmem:[%s1072_s25 + $0x38] sm:$0xf] }
  0x32   : > { %v684_v15 = vunpack.c.l.b16 %v621_v12  ;;  %v901_v16 = vor.u32 %v979_v3, %v900_v2  ;;  %v298_v17 = vor.u32 %v297_v6, %v294_v61  ;;  %v625_v18 = vrot.slane %v623_v9, 4  ;;  %v961_v9 = vld [vmem:[%s1072_s25 + $0x3c] sm:$0x1] }
  0x33   : > { %v285_v19 = vrot.slane %v284_v4, 4  ;;  %v289_v20 = vrot.slane %v287_v5, 5  ;;  %v628_v22 = vrot.slane %v626_v10, 5  ;;  %v632_v23 = vshll.u32 %v957_v8, 16  ;;  %v904_v4 = vld [vmem:[%s1072_s25 + $0x30] sm:$0xf] }
  0x34   : > { %v299_v24 = vrot.slane %v298_v17, 4  ;;  %v303_v25 = vrot.slane %v301_v7, 5  ;;  %v639_v26 = vrot.slane %v637_v14, 4  ;;  %v640_v27 = vshll.u32 %v958_v63, 16  ;;  %v980_v5 = vld [vmem:[%s1072_s25 + $0x34] sm:$0xf0] }
  0x35   : > { %v690_v28 = vpack.c.b16 %v684_v15, %v683_v13  ;;  %v629_v29 = vor.u32 %v628_v22, %v625_v18  ;;  %v646_v32 = vshll.u32 %v959_v21, 16  ;;  %v290_v34 = vsel %vm1108_vm3, %v285_v19, %v289_v20  ;;  %v963_v14 = vld [vmem:[%s1072_s25 + $0x44] sm:$0x1] }
  0x36   : > { %887 = vmatmul.msk.bf16.gmra.mxu0 %vm354_vm0, %v345_v11  ;;  %v642_v31 = vrot.slane %v640_v27, 5  ;;  %v304_v35 = vsel %vm1108_vm3, %v299_v24, %v303_v25  ;;  %v634_v36 = vrot.slane %v632_v23, 5  ;;  %v306_v39 = vshrl.u32 %v206_v30, 16 }
  0x37   : > { %v630_v40 = vrot.slane %v629_v29, 4  ;;  %v309_v41 = vshll.u32 %v206_v30, 16  ;;  %v320_v42 = vshrl.u32 %v207_v33, 16  ;;  %v323_v43 = vshll.u32 %v207_v33, 16 }
  0x38   : > { %946 = vmatmul.msk.bf16.gmra.mxu2 %vm354_vm0, %v935_v1  ;;  %912 = vmatmul.msk.bf16.gmra.mxu1 %vm354_vm0, %v901_v16  ;;  %v643_v38 = vor.u32 %v642_v31, %v639_v26  ;;  %v648_v45 = vrot.slane %v646_v32, 5  ;;  %v340_v48 = vunpack.c.l.b16 %v290_v34  ;;  %v341_v49 = vunpack.c.l.b16 %v304_v35  ;;  %v986_v1 = vld [vmem:[%s1072_s25 + $0x3c] sm:$0xf0] }
  0x39   : > { %v308_v50 = vrot.slane %v306_v39, 4  ;;  %v635_v51 = vsel %vm1108_vm3, %v630_v40, %v634_v36  ;;  %v311_v53 = vrot.slane %v309_v41, 5  ;;  %v322_v54 = vrot.slane %v320_v42, 4 }
  0x3a   : > { %971 = vmatmul.msk.bf16.gmra.mxu3 %vm354_vm0, %v690_v28  ;;  %v644_v44 = vrot.slane %v643_v38, 4  ;;  %v325_v55 = vrot.slane %v323_v43, 5  ;;  %v651_v58 = vshrl.u32 %v960_v46, 16  ;;  %v654_v59 = vshll.u32 %v960_v46, 16 }
  0x3b   : > { %v665_v60 = vshrl.u32 %v962_v47, 16  ;;  %v668_v61 = vshll.u32 %v962_v47, 16  ;;  %v346_v62 = vpack.c.b16 %v341_v49, %v340_v48  ;;  %v685_v63 = vunpack.c.l.b16 %v635_v51 }
  0x3c   : > { %v649_v56 = vsel %vm1108_vm3, %v644_v44, %v648_v45  ;;  %v315_v2 = vshll.u32 %v216_v52, 16  ;;  %v312_v6 = vor.u32 %v311_v53, %v308_v50  ;;  %v326_v7 = vor.u32 %v325_v55, %v322_v54 }
  0x3d   : > { %v686_v3 = vunpack.c.l.b16 %v649_v56  ;;  %v329_v8 = vshll.u32 %v217_v57, 16  ;;  %v653_v10 = vrot.slane %v651_v58, 4  ;;  %v656_v11 = vrot.slane %v654_v59, 5 }
  0x3e   : > { %v667_v12 = vrot.slane %v665_v60, 4  ;;  %v670_v13 = vrot.slane %v668_v61, 5  ;;  %v939_v15 = vor.u32 %v986_v1, %v938_v0  ;;  %v905_v16 = vor.u32 %v980_v5, %v904_v4 }
  0x3f   : > { %v317_v17 = vrot.slane %v315_v2, 5  ;;  %v691_v18 = vpack.c.b16 %v686_v3, %v685_v63  ;;  %v313_v19 = vrot.slane %v312_v6, 4  ;;  %v331_v20 = vrot.slane %v329_v8, 5 }
  0x40   : > { %v660_v21 = vshll.u32 %v961_v9, 16  ;;  %v327_v22 = vrot.slane %v326_v7, 4  ;;  %v657_v23 = vor.u32 %v656_v11, %v653_v10  ;;  %v671_v24 = vor.u32 %v670_v13, %v667_v12 }
  0x41   : > { %v674_v25 = vshll.u32 %v963_v14, 16  ;;  %v318_v26 = vsel %vm1108_vm3, %v313_v19, %v317_v17 }
  0x42   : > { %v662_v27 = vrot.slane %v660_v21, 5  ;;  %v332_v28 = vsel %vm1108_vm3, %v327_v22, %v331_v20  ;;  %v658_v29 = vrot.slane %v657_v23, 4  ;;  %v672_v30 = vrot.slane %v671_v24, 4 }
  0x43   : > { %v676_v31 = vrot.slane %v674_v25, 5  ;;  %v342_v32 = vunpack.c.l.b16 %v318_v26  ;;  %v343_v33 = vunpack.c.l.b16 %v332_v28 }
  0x44   : > { %v663_v34 = vsel %vm1108_vm3, %v658_v29, %v662_v27 }
  0x45   : > { %v677_v35 = vsel %vm1108_vm3, %v672_v30, %v676_v31  ;;  %v347_v36 = vpack.c.b16 %v343_v33, %v342_v32  ;;  %v687_v38 = vunpack.c.l.b16 %v663_v34 }
  0x46   : > { %888 = vmatmul.msk.bf16.gmra.mxu0 %vm354_vm0, %v346_v62  ;;  %v688_v39 = vunpack.c.l.b16 %v677_v35 }
  0x48   : > { %947 = vmatmul.msk.bf16.gmra.mxu2 %vm354_vm0, %v939_v15  ;;  %913 = vmatmul.msk.bf16.gmra.mxu1 %vm354_vm0, %v905_v16  ;;  %v692_v40 = vpack.c.b16 %v688_v39, %v687_v38 }
  0x4a   : > { %972 = vmatmul.msk.bf16.gmra.mxu3 %vm354_vm0, %v691_v18 }
  0x56   : > { %889 = vmatmul.msk.bf16.gmra.mxu0 %vm354_vm0, %v347_v36 }
  0x5a   : > { %973 = vmatmul.msk.bf16.gmra.mxu3 %vm354_vm0, %v692_v40 }
  0x95   : > { %v443_v41 = vpop.f32.mrf.mxu1 }
  0x9b   : > { %v522_v42 = vpop.f32.mrf.mxu2 }
  0x9d   : > { %v445_v44 = vpop.f32.mrf.mxu1 }
  0xa3   : > { %v376_v43 = vpop.f32.mrf.mxu0  ;;  %v524_v45 = vpop.f32.mrf.mxu2 }
  0xa4   : > { %v444_v49 = vadd.f32 %v443_v41, %v376_v43 }
  0xa5   : > { %v448_v48 = vpop.f32.mrf.mxu1 }
  0xa6   : > { %v542_v51 = vadd.f32 %v522_v42, %v444_v49 }
  0xab   : > { %v378_v46 = vpop.f32.mrf.mxu0  ;;  %v527_v50 = vpop.f32.mrf.mxu2 }
  0xac   : > { %v446_v37 = vadd.f32 %v445_v44, %v378_v46 }
  0xad   : > { %v720_v47 = vpop.f32.mrf.mxu3  ;;  %v450_v57 = vpop.f32.mrf.mxu1 }
  0xae   : > { %v543_v53 = vadd.f32 %v524_v45, %v446_v37  ;;  %v740_v55 = vadd.f32 %v720_v47, %v542_v51 }
  0xb0   : > { %v781_v26 = vmul.f32 %v740_v55, %v740_v55 }
  0xb3   : > { %v381_v52 = vpop.f32.mrf.mxu0  ;;  %v529_v59 = vpop.f32.mrf.mxu2 }
  0xb4   : > { %v449_v62 = vadd.f32 %v448_v48, %v381_v52 }
  0xb5   : > { %v722_v54 = vpop.f32.mrf.mxu3  ;;  %v453_v0 = vpop.f32.mrf.mxu1 }
  0xb6   : > { %v741_v56 = vadd.f32 %v722_v54, %v543_v53  ;;  %v544_v1 = vadd.f32 %v527_v50, %v449_v62 }
  0xb8   : > { %v992_v58 = vpack.c.bf16 %v741_v56, %v740_v55  ;;  %v782_v24 = vmul.f32 %v741_v56, %v741_v56  ;;  %v765_v28 = vadd.f32 %v741_v56, %v740_v55 }
  0xba   : > { %993 = vst [vmem:[%s1067_s22] sm:$0xff] %v992_v58   ;;  %v789_v30 = vadd.f32 %v782_v24, %v781_v26 }
  0xbb   : > { %v383_v60 = vpop.f32.mrf.mxu0  ;;  %v532_v4 = vpop.f32.mrf.mxu2 }
  0xbc   : > { %v451_v63 = vadd.f32 %v450_v57, %v383_v60 }
  0xbd   : > { %v725_v61 = vpop.f32.mrf.mxu3  ;;  %v455_v9 = vpop.f32.mrf.mxu1 }
  0xbe   : > { %v545_v3 = vadd.f32 %v529_v59, %v451_v63  ;;  %v742_v6 = vadd.f32 %v725_v61, %v544_v1 }
  0xc0   : > { %v783_v27 = vmul.f32 %v742_v6, %v742_v6  ;;  %v766_v33 = vadd.f32 %v765_v28, %v742_v6 }
  0xc2   : > { %v790_v35 = vadd.f32 %v789_v30, %v783_v27 }
  0xc3   : > { %v386_v2 = vpop.f32.mrf.mxu0  ;;  %v534_v13 = vpop.f32.mrf.mxu2 }
  0xc4   : > { %v454_v12 = vadd.f32 %v453_v0, %v386_v2 }
  0xc5   : > { %v727_v5 = vpop.f32.mrf.mxu3  ;;  %v458_v18 = vpop.f32.mrf.mxu1 }
  0xc6   : > { %v743_v7 = vadd.f32 %v727_v5, %v545_v3  ;;  %v546_v15 = vadd.f32 %v532_v4, %v454_v12  ;;  %v764_v3 = vld [vmem:[%s1216_s3] sm:$0x1] }
  0xc8   : > { %v997_v8 = vpack.c.bf16 %v743_v7, %v742_v6  ;;  %v784_v34 = vmul.f32 %v743_v7, %v743_v7  ;;  %v767_v38 = vadd.f32 %v766_v33, %v743_v7  ;;  %v780_v6 = vld [vmem:[%s1217_s4] sm:$0x1] }
  0xca   : > { %1009 = vst [vmem:[%s1067_s22 + $0x8] sm:$0xff] %v997_v8   ;;  %v791_v42 = vadd.f32 %v790_v35, %v784_v34 }
  0xcb   : > { %v388_v10 = vpop.f32.mrf.mxu0  ;;  %v537_v25 = vpop.f32.mrf.mxu2 }
  0xcc   : > { %v456_v14 = vadd.f32 %v455_v9, %v388_v10 }
  0xcd   : > { %v730_v11 = vpop.f32.mrf.mxu3  ;;  %v460_v36 = vpop.f32.mrf.mxu1 }
  0xce   : > { %v547_v17 = vadd.f32 %v534_v13, %v456_v14  ;;  %v744_v20 = vadd.f32 %v730_v11, %v546_v15 }
  0xd0   : > { %v785_v39 = vmul.f32 %v744_v20, %v744_v20  ;;  %v768_v43 = vadd.f32 %v767_v38, %v744_v20 }
  0xd2   : > { %v792_v46 = vadd.f32 %v791_v42, %v785_v39 }
  0xd3   : > { %v391_v16 = vpop.f32.mrf.mxu0  ;;  %v539_v45 = vpop.f32.mrf.mxu2 }
  0xd4   : > { %v459_v23 = vadd.f32 %v458_v18, %v391_v16 }
  0xd5   : > { %v732_v19 = vpop.f32.mrf.mxu3 }
  0xd6   : > { %v745_v21 = vadd.f32 %v732_v19, %v547_v17  ;;  %v548_v29 = vadd.f32 %v537_v25, %v459_v23 }
  0xd8   : > { %v1002_v22 = vpack.c.bf16 %v745_v21, %v744_v20  ;;  %v786_v44 = vmul.f32 %v745_v21, %v745_v21  ;;  %v769_v47 = vadd.f32 %v768_v43, %v745_v21 }
  0xda   : > { %1010 = vst [vmem:[%s1067_s22 + $0x10] sm:$0xff] %v1002_v22   ;;  %v793_v50 = vadd.f32 %v792_v46, %v786_v44 }
  0xdb   : > { %v393_v32 = vpop.f32.mrf.mxu0 }
  0xdc   : > { %v461_v41 = vadd.f32 %v460_v36, %v393_v32 }
  0xdd   : > { %v735_v31 = vpop.f32.mrf.mxu3 }
  0xde   : > { %v746_v40 = vadd.f32 %v735_v31, %v548_v29  ;;  %v549_v49 = vadd.f32 %v539_v45, %v461_v41 }
  0xe0   : > { %v787_v48 = vmul.f32 %v746_v40, %v746_v40  ;;  %v770_v51 = vadd.f32 %v769_v47, %v746_v40 }
  0xe2   : > { %v794_v53 = vadd.f32 %v793_v50, %v787_v48 }
  0xe5   : > { %v737_v37 = vpop.f32.mrf.mxu3 }
  0xe6   : > { %v747_v52 = vadd.f32 %v737_v37, %v549_v49 }
  0xe8   : > { %v1007_v54 = vpack.c.bf16 %v747_v52, %v746_v40  ;;  %v771_v55 = vadd.f32 %v770_v51, %v747_v52  ;;  %v788_v56 = vmul.f32 %v747_v52, %v747_v52 }
  0xea   : > { %1011 = vst [vmem:[%s1067_s22 + $0x18] sm:$0xff] %v1007_v54   ;;  %v772_v57 = vrot.slane %v771_v55, 4  ;;  %v795_v58 = vadd.f32 %v794_v53, %v788_v56 }
  0xec   : > { %v773_v59 = vadd.f32 %v772_v57, %v771_v55  ;;  %v796_v60 = vrot.slane %v795_v58, 4 }
  0xee   : > { %v774_v61 = vrot.slane %v773_v59, 2  ;;  %v797_v62 = vadd.f32 %v796_v60, %v795_v58 }
  0xf0   : > { %v775_v63 = vadd.f32 %v774_v61, %v773_v59  ;;  %v798_v0 = vrot.slane %v797_v62, 2 }
  0xf2   : > { %v776_v1 = vrot.slane %v775_v63, 1  ;;  %v799_v2 = vadd.f32 %v798_v0, %v797_v62 }
  0xf4   : > { %v777_v4 = vadd.f32 %v776_v1, %v775_v63  ;;  %v800_v5 = vrot.slane %v799_v2, 1 }
  0xf6   : > { %v778_v7 = vadd.f32 %v777_v4, %v764_v3  ;;  %v801_v8 = vadd.f32 %v800_v5, %v799_v2 }
  0xf8   : > { %779 = vst [vmem:[%s1216_s3] sm:$0x1] %v778_v7  ;;  %v802_v9 = vadd.f32 %v801_v8, %v780_v6 }
  0xfa   : > { %803 = vst [vmem:[%s1217_s4] sm:$0x1] %v802_v9 }
  0xfb PF: > { %s15_s15 = sadd.s32 1, %s1028_s15  }
  0xfc   : > { %p12_p5 = scmp.ge.s32.totalorder %s15_s15, 4  }
  0xfe   :  { %14 = sbr.rel (!%p12_p5) target bundleno = 1 (0x1), region = 82 }

// kernel: skip_block_forward.13
= control target key start
LH: loop header
LB: loop body
LE: loop exit
PB: predicated region body
PF: predicated region fallthrough
CT: control target
= control target key end

     0   :  { %s555_s0 = inlined_call_operand.vmem [shape: bf16[128,128], index: 0, kind: input, shape index: {}]   ;;  %s556_s1 = inlined_call_operand.vmem [shape: f32[1,128], index: 1, kind: input, shape index: {}]   ;;  %s557_s2 = inlined_call_operand.vmem [shape: f32[1,128], index: 2, kind: input, shape index: {}]   ;;  %s558_s3 = inlined_call_operand.vmem [shape: bf16[128,128], index: 3, kind: input, shape index: {}]   ;;  %s559_s4 = inlined_call_operand.vmem [shape: f32[1,128], index: 4, kind: input, shape index: {}]   ;;  %s560_s5 = inlined_call_operand.vmem [shape: f32[1,128], index: 5, kind: input, shape index: {}]   ;;  %s561_s6 = inlined_call_operand.vmem [shape: bf16[128,128], index: 6, kind: output, shape index: {}]  }
   0x1   :  { %v236_v0 = vld [vmem:[%s555_s0] sm:$0xff]   ;;  %v339_v11 = vld [vmem:[%s555_s0 + $0x8] sm:$0xff]   ;;  %v340_v17 = vld [vmem:[%s555_s0 + $0x10] sm:$0xff]  }
   0x2   :  { %v405_v1 = vld [vmem:[%s556_s1] ss:$0 sm:$0xff]  ;;  %v237_v2 = vunpack.c.l.bf16 %v236_v0  ;;  %v238_v3 = vunpack.c.h.bf16 %v236_v0  ;;  %v346_v12 = vld [vmem:[%s558_s3 + $0x8] sm:$0xff]   ;;  %v241_v15 = vunpack.c.l.bf16 %v339_v11  ;;  %v242_v16 = vunpack.c.h.bf16 %v339_v11  ;;  %v347_v27 = vld [vmem:[%s558_s3 + $0x10] sm:$0xff]  }
   0x3   :  { %v410_v4 = vld [vmem:[%s557_s2] ss:$0 sm:$0xff]  ;;  %v273_v21 = vunpack.c.l.bf16 %v346_v12  ;;  %v274_v22 = vunpack.c.h.bf16 %v346_v12  ;;  %v245_v25 = vunpack.c.l.bf16 %v340_v17  ;;  %v246_v26 = vunpack.c.h.bf16 %v340_v17  ;;  %v341_v40 = vld [vmem:[%s555_s0 + $0x18] sm:$0xff]   ;;  %v343_v11 = vld [vmem:[%s555_s0 + $0x28] sm:$0xff]  }
   0x4   :  { %v268_v5 = vld [vmem:[%s558_s3] sm:$0xff]   ;;  %v59_v9 = vmul.f32 %v405_v1, %v237_v2  ;;  %v60_v10 = vmul.f32 %v405_v1, %v238_v3  ;;  %v61_v23 = vmul.f32 %v405_v1, %v241_v15  ;;  %v62_v24 = vmul.f32 %v405_v1, %v242_v16  ;;  %v348_v45 = vld [vmem:[%s558_s3 + $0x18] sm:$0xff]  }
   0x5   :  { %v269_v6 = vunpack.c.l.bf16 %v268_v5  ;;  %v270_v7 = vunpack.c.h.bf16 %v268_v5  ;;  %v418_v8 = vld [vmem:[%s559_s4] ss:$0 sm:$0xff]  ;;  %v63_v34 = vmul.f32 %v405_v1, %v245_v25  ;;  %v64_v35 = vmul.f32 %v405_v1, %v246_v26  ;;  %v350_v25 = vld [vmem:[%s558_s3 + $0x28] sm:$0xff]  }
   0x6   :  { %v79_v18 = vadd.f32 %v410_v4, %v59_v9  ;;  %v80_v19 = vadd.f32 %v410_v4, %v60_v10  ;;  %v438_v20 = vld [vmem:[%s560_s5] ss:$0 sm:$0xff]  ;;  %v133_v30 = vmul.f32 %v418_v8, %v273_v21  ;;  %v134_v31 = vmul.f32 %v418_v8, %v274_v22 }
   0x7   :  { %v131_v13 = vmul.f32 %v418_v8, %v269_v6  ;;  %v132_v14 = vmul.f32 %v418_v8, %v270_v7  ;;  %v81_v32 = vadd.f32 %v410_v4, %v61_v23  ;;  %v82_v33 = vadd.f32 %v410_v4, %v62_v24  ;;  %v342_v58 = vld [vmem:[%s555_s0 + $0x20] sm:$0xff]  }
   0x8   :  { %v277_v38 = vunpack.c.l.bf16 %v347_v27  ;;  %v278_v39 = vunpack.c.h.bf16 %v347_v27  ;;  %v83_v43 = vadd.f32 %v410_v4, %v63_v34  ;;  %v84_v44 = vadd.f32 %v410_v4, %v64_v35  ;;  %v349_v5 = vld [vmem:[%s558_s3 + $0x20] sm:$0xff]   ;;  %v344_v34 = vld [vmem:[%s555_s0 + $0x30] sm:$0xff]  }
   0x9   :  { %v147_v28 = vadd.f32 %v131_v13, %v79_v18  ;;  %v148_v29 = vadd.f32 %v132_v14, %v80_v19  ;;  %v149_v41 = vadd.f32 %v133_v30, %v81_v32  ;;  %v150_v42 = vadd.f32 %v134_v31, %v82_v33 }
   0xa   :  { %v135_v48 = vmul.f32 %v418_v8, %v277_v38  ;;  %v136_v49 = vmul.f32 %v418_v8, %v278_v39  ;;  %v249_v52 = vunpack.c.l.bf16 %v341_v40  ;;  %v250_v53 = vunpack.c.h.bf16 %v341_v40 }
   0xb   :  { %v167_v36 = vadd.f32 %v438_v20, %v147_v28  ;;  %v168_v37 = vadd.f32 %v438_v20, %v148_v29  ;;  %v169_v50 = vadd.f32 %v438_v20, %v149_v41  ;;  %v170_v51 = vadd.f32 %v438_v20, %v150_v42 }
   0xc   :  { %v151_v55 = vadd.f32 %v135_v48, %v83_v43  ;;  %v152_v56 = vadd.f32 %v136_v49, %v84_v44  ;;  %v281_v57 = vunpack.c.l.bf16 %v348_v45  ;;  %v65_v61 = vmul.f32 %v405_v1, %v249_v52  ;;  %v351_v43 = vld [vmem:[%s558_s3 + $0x30] sm:$0xff]   ;;  %v345_v52 = vld [vmem:[%s555_s0 + $0x38] sm:$0xff]  }
   0xd   :  { %v183_v46 = vmax.f32 %v167_v36, 0.0  ;;  %v184_v47 = vmax.f32 %v168_v37, 0.0  ;;  %v185_v59 = vmax.f32 %v169_v50, 0.0  ;;  %v186_v60 = vmax.f32 %v170_v51, 0.0 }
   0xe   :  { %v66_v62 = vmul.f32 %v405_v1, %v250_v53  ;;  %v171_v63 = vadd.f32 %v438_v20, %v151_v55  ;;  %v172_v0 = vadd.f32 %v438_v20, %v152_v56  ;;  %v282_v2 = vunpack.c.h.bf16 %v348_v45 }
   0xf   :  { %v302_v54 = vpack.c.bf16 %v184_v47, %v183_v46  ;;  %v137_v3 = vmul.f32 %v418_v8, %v281_v57  ;;  %v307_v6 = vpack.c.bf16 %v186_v60, %v185_v59  ;;  %v85_v7 = vadd.f32 %v410_v4, %v65_v61 }
  0x10   :  { %v86_v9 = vadd.f32 %v410_v4, %v66_v62  ;;  %v253_v10 = vunpack.c.l.bf16 %v342_v58  ;;  %v187_v12 = vmax.f32 %v171_v63, 0.0  ;;  %v188_v13 = vmax.f32 %v172_v0, 0.0 }
  0x11   :  { %303 = vst [vmem:[%s561_s6] sm:$0xff] %v302_v54   ;;  %v138_v14 = vmul.f32 %v418_v8, %v282_v2  ;;  %v254_v15 = vunpack.c.h.bf16 %v342_v58  ;;  %v153_v16 = vadd.f32 %v137_v3, %v85_v7  ;;  %v285_v18 = vunpack.c.l.bf16 %v349_v5  ;;  %v352_v2 = vld [vmem:[%s558_s3 + $0x38] sm:$0xff]  }
  0x12   :  { %353 = vst [vmem:[%s561_s6 + $0x8] sm:$0xff] %v307_v6   ;;  %v67_v17 = vmul.f32 %v405_v1, %v253_v10  ;;  %v286_v19 = vunpack.c.h.bf16 %v349_v5  ;;  %v312_v21 = vpack.c.bf16 %v188_v13, %v187_v12  ;;  %v257_v24 = vunpack.c.l.bf16 %v343_v11 }
  0x13   :  { %v154_v22 = vadd.f32 %v138_v14, %v86_v9  ;;  %v68_v23 = vmul.f32 %v405_v1, %v254_v15  ;;  %v173_v26 = vadd.f32 %v438_v20, %v153_v16  ;;  %v139_v28 = vmul.f32 %v418_v8, %v285_v18 }
  0x14   :  { %v87_v27 = vadd.f32 %v410_v4, %v67_v17  ;;  %v140_v29 = vmul.f32 %v418_v8, %v286_v19  ;;  %354 = vst [vmem:[%s561_s6 + $0x10] sm:$0xff] %v312_v21   ;;  %v258_v32 = vunpack.c.h.bf16 %v343_v11  ;;  %v69_v33 = vmul.f32 %v405_v1, %v257_v24 }
  0x15   :  { %v174_v30 = vadd.f32 %v438_v20, %v154_v22  ;;  %v88_v31 = vadd.f32 %v410_v4, %v68_v23  ;;  %v189_v35 = vmax.f32 %v173_v26, 0.0  ;;  %v289_v37 = vunpack.c.l.bf16 %v350_v25 }
  0x16   :  { %v155_v36 = vadd.f32 %v139_v28, %v87_v27  ;;  %v290_v38 = vunpack.c.h.bf16 %v350_v25  ;;  %v70_v41 = vmul.f32 %v405_v1, %v258_v32  ;;  %v89_v42 = vadd.f32 %v410_v4, %v69_v33 }
  0x17   :  { %v190_v39 = vmax.f32 %v174_v30, 0.0  ;;  %v156_v40 = vadd.f32 %v140_v29, %v88_v31  ;;  %v141_v45 = vmul.f32 %v418_v8, %v289_v37  ;;  %v261_v47 = vunpack.c.l.bf16 %v344_v34 }
  0x18   :  { %v175_v44 = vadd.f32 %v438_v20, %v155_v36  ;;  %v142_v46 = vmul.f32 %v418_v8, %v290_v38  ;;  %v90_v50 = vadd.f32 %v410_v4, %v70_v41  ;;  %v262_v51 = vunpack.c.h.bf16 %v344_v34 }
  0x19   :  { %v317_v48 = vpack.c.bf16 %v190_v39, %v189_v35  ;;  %v176_v49 = vadd.f32 %v438_v20, %v156_v40  ;;  %v157_v54 = vadd.f32 %v141_v45, %v89_v42  ;;  %v71_v55 = vmul.f32 %v405_v1, %v261_v47 }
  0x1a   :  { %v191_v53 = vmax.f32 %v175_v44, 0.0  ;;  %v293_v56 = vunpack.c.l.bf16 %v351_v43  ;;  %v158_v58 = vadd.f32 %v142_v46, %v90_v50  ;;  %v72_v59 = vmul.f32 %v405_v1, %v262_v51 }
  0x1b   :  { %355 = vst [vmem:[%s561_s6 + $0x18] sm:$0xff] %v317_v48   ;;  %v192_v57 = vmax.f32 %v176_v49, 0.0  ;;  %v294_v60 = vunpack.c.h.bf16 %v351_v43  ;;  %v177_v61 = vadd.f32 %v438_v20, %v157_v54  ;;  %v91_v62 = vadd.f32 %v410_v4, %v71_v55 }
  0x1c   :  { %v143_v63 = vmul.f32 %v418_v8, %v293_v56  ;;  %v265_v0 = vunpack.c.l.bf16 %v345_v52  ;;  %v178_v5 = vadd.f32 %v438_v20, %v158_v58  ;;  %v92_v6 = vadd.f32 %v410_v4, %v72_v59 }
  0x1d   :  { %v322_v3 = vpack.c.bf16 %v192_v57, %v191_v53  ;;  %v144_v7 = vmul.f32 %v418_v8, %v294_v60  ;;  %v193_v9 = vmax.f32 %v177_v61, 0.0  ;;  %v266_v11 = vunpack.c.h.bf16 %v345_v52 }
  0x1e   :  { %v159_v10 = vadd.f32 %v143_v63, %v91_v62  ;;  %v73_v12 = vmul.f32 %v405_v1, %v265_v0  ;;  %v194_v13 = vmax.f32 %v178_v5, 0.0  ;;  %v297_v15 = vunpack.c.l.bf16 %v352_v2 }
  0x1f   :  { %356 = vst [vmem:[%s561_s6 + $0x20] sm:$0xff] %v322_v3   ;;  %v160_v14 = vadd.f32 %v144_v7, %v92_v6  ;;  %v298_v16 = vunpack.c.h.bf16 %v352_v2  ;;  %v74_v18 = vmul.f32 %v405_v1, %v266_v11 }
  0x20   :  { %v179_v17 = vadd.f32 %v438_v20, %v159_v10  ;;  %v93_v19 = vadd.f32 %v410_v4, %v73_v12  ;;  %v327_v21 = vpack.c.bf16 %v194_v13, %v193_v9  ;;  %v145_v23 = vmul.f32 %v418_v8, %v297_v15 }
  0x21   :  { %v180_v22 = vadd.f32 %v438_v20, %v160_v14  ;;  %v146_v24 = vmul.f32 %v418_v8, %v298_v16  ;;  %v94_v26 = vadd.f32 %v410_v4, %v74_v18 }
  0x22   :  { %v195_v25 = vmax.f32 %v179_v17, 0.0  ;;  %357 = vst [vmem:[%s561_s6 + $0x28] sm:$0xff] %v327_v21   ;;  %v161_v28 = vadd.f32 %v145_v23, %v93_v19 }
  0x23   :  { %v196_v27 = vmax.f32 %v180_v22, 0.0  ;;  %v162_v29 = vadd.f32 %v146_v24, %v94_v26 }
  0x24   :  { %v181_v30 = vadd.f32 %v438_v20, %v161_v28 }
  0x25   :  { %v332_v1 = vpack.c.bf16 %v196_v27, %v195_v25  ;;  %v182_v31 = vadd.f32 %v438_v20, %v162_v29 }
  0x26   :  { %v197_v8 = vmax.f32 %v181_v30, 0.0 }
  0x27   :  { %358 = vst [vmem:[%s561_s6 + $0x30] sm:$0xff] %v332_v1   ;;  %v198_v32 = vmax.f32 %v182_v31, 0.0 }
  0x29   :  { %v337_v33 = vpack.c.bf16 %v198_v32, %v197_v8 }
  0x2b   :  { %359 = vst [vmem:[%s561_s6 + $0x38] sm:$0xff] %v337_v33  }

// kernel: skip_block_forward.12
= control target key start
LH: loop header
LB: loop body
LE: loop exit
PB: predicated region body
PF: predicated region fallthrough
CT: control target
= control target key end

     0   :  { %s513_s15 = smov 0   ;;  %s557_s0 = inlined_call_operand.vmem [shape: bf16[2,8,8,16], index: 0, kind: input, shape index: {}]   ;;  %s558_s1 = inlined_call_operand.vmem [shape: bf16[1,16,128], index: 1, kind: input, shape index: {}]   ;;  %s559_s2 = inlined_call_operand.vmem [shape: bf16[2,64,128], index: 2, kind: output, shape index: {0}]   ;;  %s560_s3 = inlined_call_operand.vmem [shape: f32[1,128], index: 3, kind: output, shape index: {1}]   ;;  %s561_s4 = inlined_call_operand.vmem [shape: f32[1,128], index: 4, kind: output, shape index: {2}]  }
   0x1 LB: > { %s401_s16 = sadd.s32 4294967295, %s485_s15   ;;  %p405_p0 = scmp.ge.s32.totalorder %s485_s15, 1  ;;  %s485_s15 = sphi %s513_s15, %s15_s15  }
   0x2   : > { %p157_p1 = scmp.lt.s32.totalorder %s485_s15, 3 }
   0x4   : > { %p158_p2 = pnand %p405_p0, %p157_p1 }
   0x5   : > { %p183_p3 = scmp.lt.s32.totalorder (!%p158_p2), %s401_s16, 1  ;;  %p410_p4 = scmp.ne.s32.totalorder (!%p158_p2), %s401_s16, 0 }
   0x6   : > { %161 = sbr.rel (%p158_p2) target bundleno = 189 (0xbd), region = 28 }
   0xb   : > { %s184_s17 = scalar_select %p183_p3, %s401_s16, 1 }
   0xc   : > { %197 = sbr.rel (%p410_p4) target bundleno = 20 (0x14), region = 32 }
   0xd   : > { %s437_s18 = sshll.u32 %s184_s17, 5 }
   0xe   : > { %s187_s21 = scalar_lea.vmem %s557_s0, %s437_s18  ;;  %s527_s24 = scalar_lea.vmem %s559_s2, %s437_s18 }
  0x11   : > { %v487_v0 = vmov 0.0  }
  0x12   : > { %198 = vst [vmem:[%s560_s3] sm:$0x1] %v487_v0 }
  0x13   : > { %199 = vst [vmem:[%s561_s4] sm:$0x1] %v487_v0 }
  0x14 PF: > { %v443_v1 = vld [vmem:[%s558_s1] sm:$0xff]  ;;  %v440_v3 = vld [vmem:[%s187_s21 + $0x8] sm:$0xff]  ;;  %vm236_vm0 = vcmask 130048   ;;  %v441_v4 = vld [vmem:[%s187_s21 + $0x10] sm:$0xff] }
  0x15   : > { %v439_v2 = vld [vmem:[%s187_s21] sm:$0xff]  ;;  %256 = vmatpush.bf16.msra.mxu0 %v443_v1  ;;  %467 = vmatpush.bf16.msra.mxu1 %v443_v1  ;;  %v442_v5 = vld [vmem:[%s187_s21 + $0x18] sm:$0xff] }
  0x16   : > { %468 = vmatpush.bf16.msra.mxu2 %v443_v1  ;;  %469 = vmatpush.bf16.msra.mxu3 %v443_v1 }
  0x18   : > { %431 = vmatmul.msk.bf16.vlgmr.msra.gmra.mxu0 %vm236_vm0, %v439_v2  ;;  %432 = vmatmul.msk.bf16.vlgmr.msra.gmra.mxu1 %vm236_vm0, %v440_v3 }
  0x19   : > { %433 = vmatmul.msk.bf16.vlgmr.msra.gmra.mxu2 %vm236_vm0, %v441_v4  ;;  %434 = vmatmul.msk.bf16.vlgmr.msra.gmra.mxu3 %vm236_vm0, %v442_v5  ;;  %v294_v49 = vld [vmem:[%s560_s3] sm:$0x1] }
  0x1a   : > { %v310_v52 = vld [vmem:[%s561_s4] sm:$0x1] }
  0x95   : > { %v258_v6 = vpop.f32.mrf.mxu0  ;;  %v263_v7 = vpop.f32.mrf.mxu1 }
  0x96   : > { %v311_v10 = vmul.f32 %v258_v6, %v258_v6  ;;  %v313_v17 = vmul.f32 %v263_v7, %v263_v7 }
  0x9c   : > { %v268_v8 = vpop.f32.mrf.mxu2  ;;  %v273_v9 = vpop.f32.mrf.mxu3 }
  0x9d   : > { %v260_v11 = vpop.f32.mrf.mxu0  ;;  %v265_v12 = vpop.f32.mrf.mxu1  ;;  %v315_v23 = vmul.f32 %v268_v8, %v268_v8  ;;  %v317_v33 = vmul.f32 %v273_v9, %v273_v9 }
  0x9e   : > { %v447_v13 = vpack.c.bf16 %v260_v11, %v258_v6  ;;  %v295_v14 = vadd.f32 %v260_v11, %v258_v6  ;;  %v312_v15 = vmul.f32 %v260_v11, %v260_v11  ;;  %v452_v16 = vpack.c.bf16 %v265_v12, %v263_v7 }
  0x9f   : > { %v314_v21 = vmul.f32 %v265_v12, %v265_v12 }
  0xa0   : > { %448 = vst [vmem:[%s527_s24] sm:$0xff] %v447_v13   ;;  %v319_v18 = vadd.f32 %v312_v15, %v311_v10  ;;  %v296_v19 = vadd.f32 %v295_v14, %v263_v7 }
  0xa1   : > { %464 = vst [vmem:[%s527_s24 + $0x8] sm:$0xff] %v452_v16  }
  0xa2   : > { %v297_v20 = vadd.f32 %v296_v19, %v265_v12  ;;  %v320_v22 = vadd.f32 %v319_v18, %v313_v17 }
  0xa4   : > { %v321_v24 = vadd.f32 %v320_v22, %v314_v21  ;;  %v270_v25 = vpop.f32.mrf.mxu2  ;;  %v298_v26 = vadd.f32 %v297_v20, %v268_v8  ;;  %v275_v27 = vpop.f32.mrf.mxu3 }
  0xa5   : > { %v457_v28 = vpack.c.bf16 %v270_v25, %v268_v8  ;;  %v462_v29 = vpack.c.bf16 %v275_v27, %v273_v9  ;;  %v316_v31 = vmul.f32 %v270_v25, %v270_v25  ;;  %v318_v37 = vmul.f32 %v275_v27, %v275_v27 }
  0xa6   : > { %v299_v30 = vadd.f32 %v298_v26, %v270_v25  ;;  %v322_v32 = vadd.f32 %v321_v24, %v315_v23 }
  0xa7   : > { %465 = vst [vmem:[%s527_s24 + $0x10] sm:$0xff] %v457_v28  }
  0xa8   : > { %v323_v34 = vadd.f32 %v322_v32, %v316_v31  ;;  %466 = vst [vmem:[%s527_s24 + $0x18] sm:$0xff] %v462_v29   ;;  %v300_v35 = vadd.f32 %v299_v30, %v273_v9 }
  0xaa   : > { %v301_v36 = vadd.f32 %v300_v35, %v275_v27  ;;  %v324_v38 = vadd.f32 %v323_v34, %v317_v33 }
  0xac   : > { %v302_v39 = vrot.slane %v301_v36, 4  ;;  %v325_v40 = vadd.f32 %v324_v38, %v318_v37 }
  0xae   : > { %v303_v41 = vadd.f32 %v302_v39, %v301_v36  ;;  %v326_v42 = vrot.slane %v325_v40, 4 }
  0xb0   : > { %v304_v43 = vrot.slane %v303_v41, 2  ;;  %v327_v44 = vadd.f32 %v326_v42, %v325_v40 }
  0xb2   : > { %v305_v45 = vadd.f32 %v304_v43, %v303_v41  ;;  %v328_v46 = vrot.slane %v327_v44, 2 }
  0xb4   : > { %v306_v47 = vrot.slane %v305_v45, 1  ;;  %v329_v48 = vadd.f32 %v328_v46, %v327_v44 }
  0xb6   : > { %v307_v50 = vadd.f32 %v306_v47, %v305_v45  ;;  %v330_v51 = vrot.slane %v329_v48, 1 }
  0xb8   : > { %v308_v53 = vadd.f32 %v307_v50, %v294_v49  ;;  %v331_v54 = vadd.f32 %v330_v51, %v329_v48 }
  0xba   : > { %309 = vst [vmem:[%s560_s3] sm:$0x1] %v308_v53  ;;  %v332_v55 = vadd.f32 %v331_v54, %v310_v52 }
  0xbc   : > { %333 = vst [vmem:[%s561_s4] sm:$0x1] %v332_v55 }
  0xbd PF: > { %s15_s15 = sadd.s32 1, %s485_s15  }
  0xbe   : > { %p12_p5 = scmp.ge.s32.totalorder %s15_s15, 4  }
  0xc0   :  { %14 = sbr.rel (!%p12_p5) target bundleno = 1 (0x1), region = 78 }

// kernel: skip_block_forward.17
= control target key start
LH: loop header
LB: loop body
LE: loop exit
PB: predicated region body
PF: predicated region fallthrough
CT: control target
= control target key end

     0   :  { %s516_s0 = inlined_call_operand.vmem [shape: bf16[128,128], index: 0, kind: input, shape index: {}]   ;;  %s517_s1 = inlined_call_operand.vmem [shape: f32[1,128], index: 1, kind: input, shape index: {}]   ;;  %s518_s2 = inlined_call_operand.vmem [shape: f32[1,128], index: 2, kind: input, shape index: {}]   ;;  %s519_s3 = inlined_call_operand.vmem [shape: bf16[128,128], index: 3, kind: input, shape index: {}]   ;;  %s520_s4 = inlined_call_operand.vmem [shape: f32[1,128], index: 4, kind: input, shape index: {}]   ;;  %s521_s5 = inlined_call_operand.vmem [shape: f32[1,128], index: 5, kind: input, shape index: {}]   ;;  %s522_s6 = inlined_call_operand.vmem [shape: f32[128,128], index: 6, kind: output, shape index: {}]  }
   0x1   :  { %v220_v0 = vld [vmem:[%s516_s0] sm:$0xff]   ;;  %v283_v11 = vld [vmem:[%s516_s0 + $0x8] sm:$0xff]   ;;  %v284_v17 = vld [vmem:[%s516_s0 + $0x10] sm:$0xff]  }
   0x2   :  { %v342_v1 = vld [vmem:[%s517_s1] ss:$0 sm:$0xff]  ;;  %v221_v2 = vunpack.c.l.bf16 %v220_v0  ;;  %v222_v5 = vunpack.c.h.bf16 %v220_v0  ;;  %v290_v12 = vld [vmem:[%s519_s3 + $0x8] sm:$0xff]   ;;  %v225_v15 = vunpack.c.l.bf16 %v283_v11  ;;  %v291_v18 = vld [vmem:[%s519_s3 + $0x10] sm:$0xff]   ;;  %v226_v22 = vunpack.c.h.bf16 %v283_v11 }
   0x3   :  { %v347_v3 = vld [vmem:[%s518_s2] ss:$0 sm:$0xff]  ;;  %v257_v16 = vunpack.c.l.bf16 %v290_v12  ;;  %v258_v23 = vunpack.c.h.bf16 %v290_v12  ;;  %v229_v26 = vunpack.c.l.bf16 %v284_v17  ;;  %v261_v27 = vunpack.c.l.bf16 %v291_v18  ;;  %v285_v32 = vld [vmem:[%s516_s0 + $0x18] sm:$0xff]  }
   0x4   :  { %v252_v4 = vld [vmem:[%s519_s3] sm:$0xff]   ;;  %v59_v9 = vmul.f32 %v342_v1, %v221_v2  ;;  %v60_v10 = vmul.f32 %v342_v1, %v222_v5  ;;  %v61_v24 = vmul.f32 %v342_v1, %v225_v15  ;;  %v62_v30 = vmul.f32 %v342_v1, %v226_v22  ;;  %v292_v45 = vld [vmem:[%s519_s3 + $0x18] sm:$0xff]  }
   0x5   :  { %v253_v6 = vunpack.c.l.bf16 %v252_v4  ;;  %v355_v7 = vld [vmem:[%s520_s4] ss:$0 sm:$0xff]  ;;  %v254_v8 = vunpack.c.h.bf16 %v252_v4  ;;  %v63_v34 = vmul.f32 %v342_v1, %v229_v26  ;;  %v230_v36 = vunpack.c.h.bf16 %v284_v17 }
   0x6   :  { %v79_v19 = vadd.f32 %v347_v3, %v59_v9  ;;  %v377_v20 = vld [vmem:[%s521_s5] ss:$0 sm:$0xff]  ;;  %v80_v21 = vadd.f32 %v347_v3, %v60_v10  ;;  %v133_v25 = vmul.f32 %v355_v7, %v257_v16  ;;  %v134_v31 = vmul.f32 %v355_v7, %v258_v23  ;;  %v294_v16 = vld [vmem:[%s519_s3 + $0x28] sm:$0xff]  }
   0x7   :  { %v131_v13 = vmul.f32 %v355_v7, %v253_v6  ;;  %v132_v14 = vmul.f32 %v355_v7, %v254_v8  ;;  %v81_v33 = vadd.f32 %v347_v3, %v61_v24  ;;  %v135_v35 = vmul.f32 %v355_v7, %v261_v27  ;;  %v286_v58 = vld [vmem:[%s516_s0 + $0x20] sm:$0xff]   ;;  %v287_v6 = vld [vmem:[%s516_s0 + $0x28] sm:$0xff]  }
   0x8   :  { %v82_v39 = vadd.f32 %v347_v3, %v62_v30  ;;  %v262_v40 = vunpack.c.h.bf16 %v291_v18  ;;  %v83_v42 = vadd.f32 %v347_v3, %v63_v34  ;;  %v64_v43 = vmul.f32 %v342_v1, %v230_v36  ;;  %v293_v59 = vld [vmem:[%s519_s3 + $0x20] sm:$0xff]   ;;  %v288_v30 = vld [vmem:[%s516_s0 + $0x30] sm:$0xff]  }
   0x9   :  { %v147_v28 = vadd.f32 %v131_v13, %v79_v19  ;;  %v148_v29 = vadd.f32 %v132_v14, %v80_v21  ;;  %v149_v41 = vadd.f32 %v133_v25, %v81_v33  ;;  %v233_v44 = vunpack.c.l.bf16 %v285_v32 }
   0xa   :  { %v150_v48 = vadd.f32 %v134_v31, %v82_v39  ;;  %v136_v49 = vmul.f32 %v355_v7, %v262_v40  ;;  %v151_v51 = vadd.f32 %v135_v35, %v83_v42  ;;  %v84_v52 = vadd.f32 %v347_v3, %v64_v43  ;;  %v295_v35 = vld [vmem:[%s519_s3 + $0x30] sm:$0xff]  }
   0xb   :  { %v167_v37 = vadd.f32 %v377_v20, %v147_v28  ;;  %v168_v38 = vadd.f32 %v377_v20, %v148_v29  ;;  %v169_v50 = vadd.f32 %v377_v20, %v149_v41  ;;  %v65_v53 = vmul.f32 %v342_v1, %v233_v44 }
   0xc   :  { %v170_v54 = vadd.f32 %v377_v20, %v150_v48  ;;  %v265_v55 = vunpack.c.l.bf16 %v292_v45  ;;  %v234_v56 = vunpack.c.h.bf16 %v285_v32  ;;  %v266_v57 = vunpack.c.h.bf16 %v292_v45 }
   0xd   :  { %v183_v46 = vmax.f32 %v167_v37, 0.0  ;;  %v184_v47 = vmax.f32 %v168_v38, 0.0  ;;  %v185_v60 = vmax.f32 %v169_v50, 0.0  ;;  %v171_v61 = vadd.f32 %v377_v20, %v151_v51 }
   0xe   :  { %v152_v62 = vadd.f32 %v136_v49, %v84_v52  ;;  %v85_v63 = vadd.f32 %v347_v3, %v65_v53  ;;  %v186_v0 = vmax.f32 %v170_v54, 0.0  ;;  %v137_v2 = vmul.f32 %v355_v7, %v265_v55  ;;  %v289_v52 = vld [vmem:[%s516_s0 + $0x38] sm:$0xff]  }
   0xf   :  { %199 = vst [vmem:[%s522_s6] sm:$0xff] %v183_v46  ;;  %v66_v4 = vmul.f32 %v342_v1, %v234_v56  ;;  %v138_v5 = vmul.f32 %v355_v7, %v266_v57  ;;  %v187_v8 = vmax.f32 %v171_v61, 0.0  ;;  %v237_v10 = vunpack.c.l.bf16 %v286_v58  ;;  %v296_v53 = vld [vmem:[%s519_s3 + $0x38] sm:$0xff]  }
  0x10   :  { %200 = vst [vmem:[%s522_s6 + $0x8] sm:$0xff] %v184_v47  ;;  %v172_v9 = vadd.f32 %v377_v20, %v152_v62  ;;  %v269_v11 = vunpack.c.l.bf16 %v293_v59  ;;  %v153_v12 = vadd.f32 %v137_v2, %v85_v63  ;;  %v238_v14 = vunpack.c.h.bf16 %v286_v58 }
  0x11   :  { %201 = vst [vmem:[%s522_s6 + $0x10] sm:$0xff] %v185_v60  ;;  %v86_v13 = vadd.f32 %v347_v3, %v66_v4  ;;  %v270_v15 = vunpack.c.h.bf16 %v293_v59  ;;  %v67_v18 = vmul.f32 %v342_v1, %v237_v10  ;;  %v241_v21 = vunpack.c.l.bf16 %v287_v6 }
  0x12   :  { %202 = vst [vmem:[%s522_s6 + $0x18] sm:$0xff] %v186_v0  ;;  %v188_v17 = vmax.f32 %v172_v9, 0.0  ;;  %v139_v19 = vmul.f32 %v355_v7, %v269_v11  ;;  %v173_v22 = vadd.f32 %v377_v20, %v153_v12  ;;  %v68_v24 = vmul.f32 %v342_v1, %v238_v14 }
  0x13   :  { %203 = vst [vmem:[%s522_s6 + $0x20] sm:$0xff] %v187_v8  ;;  %v154_v23 = vadd.f32 %v138_v5, %v86_v13  ;;  %v140_v25 = vmul.f32 %v355_v7, %v270_v15  ;;  %v87_v26 = vadd.f32 %v347_v3, %v67_v18  ;;  %v69_v27 = vmul.f32 %v342_v1, %v241_v21 }
  0x14   :  { %204 = vst [vmem:[%s522_s6 + $0x28] sm:$0xff] %v188_v17  ;;  %v273_v28 = vunpack.c.l.bf16 %v294_v16  ;;  %v242_v29 = vunpack.c.h.bf16 %v287_v6  ;;  %v189_v31 = vmax.f32 %v173_v22, 0.0  ;;  %v88_v33 = vadd.f32 %v347_v3, %v68_v24 }
  0x15   :  { %v174_v32 = vadd.f32 %v377_v20, %v154_v23  ;;  %v274_v34 = vunpack.c.h.bf16 %v294_v16  ;;  %v155_v36 = vadd.f32 %v139_v19, %v87_v26  ;;  %v89_v37 = vadd.f32 %v347_v3, %v69_v27 }
  0x16   :  { %v141_v38 = vmul.f32 %v355_v7, %v273_v28  ;;  %v70_v39 = vmul.f32 %v342_v1, %v242_v29  ;;  %205 = vst [vmem:[%s522_s6 + $0x30] sm:$0xff] %v189_v31  ;;  %v156_v41 = vadd.f32 %v140_v25, %v88_v33  ;;  %v245_v43 = vunpack.c.l.bf16 %v288_v30 }
  0x17   :  { %v190_v40 = vmax.f32 %v174_v32, 0.0  ;;  %v142_v42 = vmul.f32 %v355_v7, %v274_v34  ;;  %v175_v44 = vadd.f32 %v377_v20, %v155_v36  ;;  %v277_v47 = vunpack.c.l.bf16 %v295_v35 }
  0x18   :  { %v157_v45 = vadd.f32 %v141_v38, %v89_v37  ;;  %v90_v46 = vadd.f32 %v347_v3, %v70_v39  ;;  %v176_v48 = vadd.f32 %v377_v20, %v156_v41  ;;  %v71_v49 = vmul.f32 %v342_v1, %v245_v43 }
  0x19   :  { %206 = vst [vmem:[%s522_s6 + $0x38] sm:$0xff] %v190_v40  ;;  %v246_v50 = vunpack.c.h.bf16 %v288_v30  ;;  %v278_v51 = vunpack.c.h.bf16 %v295_v35  ;;  %v191_v54 = vmax.f32 %v175_v44, 0.0  ;;  %v143_v57 = vmul.f32 %v355_v7, %v277_v47 }
  0x1a   :  { %v177_v55 = vadd.f32 %v377_v20, %v157_v45  ;;  %v158_v56 = vadd.f32 %v142_v42, %v90_v46  ;;  %v192_v58 = vmax.f32 %v176_v48, 0.0  ;;  %v91_v59 = vadd.f32 %v347_v3, %v71_v49 }
  0x1b   :  { %v72_v60 = vmul.f32 %v342_v1, %v246_v50  ;;  %v144_v61 = vmul.f32 %v355_v7, %v278_v51  ;;  %207 = vst [vmem:[%s522_s6 + $0x40] sm:$0xff] %v191_v54  ;;  %v249_v0 = vunpack.c.l.bf16 %v289_v52  ;;  %v281_v2 = vunpack.c.l.bf16 %v296_v53 }
  0x1c   :  { %v193_v62 = vmax.f32 %v177_v55, 0.0  ;;  %v178_v63 = vadd.f32 %v377_v20, %v158_v56  ;;  %208 = vst [vmem:[%s522_s6 + $0x48] sm:$0xff] %v192_v58  ;;  %v159_v4 = vadd.f32 %v143_v57, %v91_v59  ;;  %v250_v6 = vunpack.c.h.bf16 %v289_v52 }
  0x1d   :  { %v92_v5 = vadd.f32 %v347_v3, %v72_v60  ;;  %v282_v8 = vunpack.c.h.bf16 %v296_v53  ;;  %v73_v10 = vmul.f32 %v342_v1, %v249_v0  ;;  %v145_v11 = vmul.f32 %v355_v7, %v281_v2 }
  0x1e   :  { %209 = vst [vmem:[%s522_s6 + $0x50] sm:$0xff] %v193_v62  ;;  %v194_v9 = vmax.f32 %v178_v63, 0.0  ;;  %v179_v12 = vadd.f32 %v377_v20, %v159_v4  ;;  %v74_v14 = vmul.f32 %v342_v1, %v250_v6 }
  0x1f   :  { %v160_v13 = vadd.f32 %v144_v61, %v92_v5  ;;  %v146_v15 = vmul.f32 %v355_v7, %v282_v8  ;;  %v93_v16 = vadd.f32 %v347_v3, %v73_v10 }
  0x20   :  { %210 = vst [vmem:[%s522_s6 + $0x58] sm:$0xff] %v194_v9  ;;  %v195_v17 = vmax.f32 %v179_v12, 0.0  ;;  %v94_v19 = vadd.f32 %v347_v3, %v74_v14 }
  0x21   :  { %v180_v18 = vadd.f32 %v377_v20, %v160_v13  ;;  %v161_v21 = vadd.f32 %v145_v11, %v93_v16 }
  0x22   :  { %211 = vst [vmem:[%s522_s6 + $0x60] sm:$0xff] %v195_v17  ;;  %v162_v1 = vadd.f32 %v146_v15, %v94_v19 }
  0x23   :  { %v196_v22 = vmax.f32 %v180_v18, 0.0  ;;  %v181_v7 = vadd.f32 %v377_v20, %v161_v21 }
  0x24   :  { %v182_v23 = vadd.f32 %v377_v20, %v162_v1 }
  0x25   :  { %212 = vst [vmem:[%s522_s6 + $0x68] sm:$0xff] %v196_v22  ;;  %v197_v24 = vmax.f32 %v181_v7, 0.0 }
  0x26   :  { %v198_v25 = vmax.f32 %v182_v23, 0.0 }
  0x27   :  { %213 = vst [vmem:[%s522_s6 + $0x70] sm:$0xff] %v197_v24 }
  0x28   :  { %214 = vst [vmem:[%s522_s6 + $0x78] sm:$0xff] %v198_v25 }

// kernel: skip_block_forward.11
= control target key start
LH: loop header
LB: loop body
LE: loop exit
PB: predicated region body
PF: predicated region fallthrough
CT: control target
= control target key end

     0   :  { %s2698_s15 = smov 0   ;;  %s3335_s0 = inlined_call_operand.vmem [shape: bf16[2,10,10,128], index: 0, kind: input, shape index: {}]   ;;  %s3336_s1 = inlined_call_operand.vmem [shape: bf16[9,128,128], index: 1, kind: input, shape index: {}]   ;;  %s3337_s2 = inlined_call_operand.vmem [shape: bf16[2,64,128], index: 2, kind: output, shape index: {0}]   ;;  %s3338_s3 = inlined_call_operand.vmem [shape: f32[1,128], index: 3, kind: output, shape index: {1}]   ;;  %s3339_s4 = inlined_call_operand.vmem [shape: f32[1,128], index: 4, kind: output, shape index: {2}]  }
   0x1 LB: > { %s1967_s16 = sadd.s32 4294967295, %s2670_s15   ;;  %p1971_p0 = scmp.ge.s32.totalorder %s2670_s15, 1  ;;  %s2670_s15 = sphi %s2698_s15, %s15_s15  }
   0x2   : > { %p157_p1 = scmp.lt.s32.totalorder %s2670_s15, 3 }
   0x4   : > { %p158_p2 = pnand %p1971_p0, %p157_p1 }
   0x5   : > { %p183_p3 = scmp.lt.s32.totalorder (!%p158_p2), %s1967_s16, 1  ;;  %p1975_p4 = scmp.ne.s32.totalorder (!%p158_p2), %s1967_s16, 0 }
   0x6   : > { %161 = sbr.rel (%p158_p2) target bundleno = 357 (0x165), region = 28 }
   0xb   : > { %s184_s17 = scalar_select %p183_p3, %s1967_s16, 1 }
   0xc   : > { %196 = sbr.rel (%p1975_p4) target bundleno = 20 (0x14), region = 32 }
   0xd   : > { %s2654_s18 = smul.u32 80, %s184_s17  ;;  %s2530_s19 = sshll.u32 %s184_s17, 5 }
   0xe   : > { %s2709_s22 = scalar_lea.vmem %s3337_s2, %s2530_s19 }
   0xf   : > { %s2714_s25 = scalar_lea.vmem %s3335_s0, %s2654_s18 }
  0x11   : > { %v2672_v0 = vmov 0.0  }
  0x12   : > { %197 = vst [vmem:[%s3338_s3] sm:$0x1] %v2672_v0 }
  0x13   : > { %198 = vst [vmem:[%s3339_s4] sm:$0x1] %v2672_v0 }
  0x14 PF: > { %v2550_v1 = vld [vmem:[%s3336_s1 + $0x78] sm:$0xff]  ;;  %v2549_v3 = vld [vmem:[%s3336_s1 + $0x70] sm:$0xff]  ;;  %v203_v7 = vld [vmem:[%s2714_s25 + $0x20] sm:$0xf]  ;;  %vm231_vm0 = vsmask.f32 3328 }
  0x15   : > { %v2558_v2 = vld [vmem:[%s3336_s1 + $0xb8] sm:$0xff]  ;;  %2638 = vmatpush.bf16.msra.mxu1 %v2550_v1  ;;  %427 = vmatpush.bf16.msra.mxu0 %v2550_v1  ;;  %v2557_v4 = vld [vmem:[%s3336_s1 + $0xb0] sm:$0xff]  ;;  %v2548_v8 = vld [vmem:[%s3336_s1 + $0x68] sm:$0xff]  ;;  %v291_v12 = vshrl.u32 %v203_v7, 16  ;;  %v294_v13 = vshll.u32 %v203_v7, 16  ;;  %vm581_vm3 = vcmask 1042432  }
  0x16   : > { %697 = vmatpush.bf16.msra.mxu2 %v2558_v2  ;;  %v2570_v5 = vld [vmem:[%s3336_s1 + $0xf8] sm:$0xff]  ;;  %v2569_v6 = vld [vmem:[%s3336_s1 + $0xf0] sm:$0xff]  ;;  %v204_v9 = vld [vmem:[%s2714_s25 + $0x28] sm:$0xf]  ;;  %vm232_vm1 = vsmask.f32 7440 }
  0x17   : > { %832 = vmatpush.bf16.msra.mxu3 %v2570_v5  ;;  %v2556_v10 = vld [vmem:[%s3336_s1 + $0xa8] sm:$0xff]  ;;  %v2749_v11 = vld [vmem:[%s2714_s25 + $0x24] sm:$0x1]  ;;  %v305_v14 = vshrl.u32 %v204_v9, 16  ;;  %v308_v17 = vshll.u32 %v204_v9, 16  ;;  %v293_v19 = vrot.slane %v291_v12, 4  ;;  %vm2786_vm2 = vmor %vm231_vm0, %vm232_vm1 }
  0x18   : > { %v2547_v15 = vld [vmem:[%s3336_s1 + $0x60] sm:$0xff]  ;;  %v2755_v16 = vld [vmem:[%s2714_s25 + $0x2c] sm:$0x1]  ;;  %v296_v20 = vrot.slane %v294_v13, 5  ;;  %v300_v23 = vshll.u32 %v2749_v11, 16  ;;  %v2546_v41 = vld [vmem:[%s3336_s1 + $0x58] sm:$0xff] }
  0x19   : > { %2639 = vmatpush.bf16.msra.mxu1 %v2549_v3  ;;  %428 = vmatpush.bf16.msra.mxu0 %v2549_v3  ;;  %v2568_v18 = vld [vmem:[%s3336_s1 + $0xe8] sm:$0xff]  ;;  %v307_v21 = vrot.slane %v305_v14, 4  ;;  %v199_v22 = vld [vmem:[%s2714_s25] sm:$0xf]  ;;  %v310_v24 = vrot.slane %v308_v17, 5  ;;  %v314_v29 = vshll.u32 %v2755_v16, 16 }
  0x1a   : > { %698 = vmatpush.bf16.msra.mxu2 %v2557_v4  ;;  %v200_v25 = vld [vmem:[%s2714_s25 + $0x8] sm:$0xf]  ;;  %v2764_v26 = vld [vmem:[%s2714_s25 + $0x4] sm:$0x1]  ;;  %v297_v28 = vor.u32 %v296_v20, %v293_v19  ;;  %v2771_v30 = vld [vmem:[%s2714_s25 + $0xc] sm:$0x1] }
  0x1b   : > { %833 = vmatpush.bf16.msra.mxu3 %v2569_v6  ;;  %v2555_v27 = vld [vmem:[%s3336_s1 + $0xa0] sm:$0xff]  ;;  %v235_v31 = vshrl.u32 %v199_v22, 16  ;;  %v238_v32 = vshll.u32 %v199_v22, 16  ;;  %v311_v33 = vor.u32 %v310_v24, %v307_v21  ;;  %v244_v34 = vshll.u32 %v2764_v26, 16  ;;  %v2554_v46 = vld [vmem:[%s3336_s1 + $0x98] sm:$0xff]  ;;  %v2545_v59 = vld [vmem:[%s3336_s1 + $0x50] sm:$0xff] }
  0x1c   : > { %v249_v35 = vshrl.u32 %v200_v25, 16  ;;  %v252_v36 = vshll.u32 %v200_v25, 16  ;;  %v2567_v37 = vld [vmem:[%s3336_s1 + $0xe0] sm:$0xff]  ;;  %v258_v40 = vshll.u32 %v2771_v30, 16  ;;  %v298_v42 = vrot.slane %v297_v28, 4  ;;  %v2566_v58 = vld [vmem:[%s3336_s1 + $0xd8] sm:$0xff] }
  0x1d   : > { %2640 = vmatpush.bf16.msra.mxu1 %v2548_v8  ;;  %429 = vmatpush.bf16.msra.mxu0 %v2548_v8  ;;  %v237_v38 = vrot.slane %v235_v31, 4  ;;  %v240_v39 = vrot.slane %v238_v32, 5  ;;  %v302_v43 = vrot.slane %v300_v23, 5  ;;  %v312_v48 = vrot.slane %v311_v33, 4  ;;  %v557_v51 = vld [vmem:[%s2714_s25] sm:$0xe] }
  0x1e   : > { %699 = vmatpush.bf16.msra.mxu2 %v2556_v10  ;;  %v251_v44 = vrot.slane %v249_v35, 4  ;;  %v254_v45 = vrot.slane %v252_v36, 5  ;;  %v316_v49 = vrot.slane %v314_v29, 5  ;;  %v246_v52 = vrot.slane %v244_v34, 5  ;;  %v558_v54 = vld [vmem:[%s2714_s25 + $0x8] sm:$0xe] }
  0x1f   : > { %834 = vmatpush.bf16.msra.mxu3 %v2568_v18  ;;  %v241_v50 = vor.u32 %v240_v39, %v237_v38  ;;  %vm582_vm4 = vcmask 1046532   ;;  %v205_v55 = vld [vmem:[%s2714_s25 + $0x30] sm:$0xf]  ;;  %v260_v57 = vrot.slane %v258_v40, 5  ;;  %v303_v60 = vsel %vm2786_vm2, %v298_v42, %v302_v43  ;;  %v206_v0 = vld [vmem:[%s2714_s25 + $0x38] sm:$0xf] }
  0x20   : > { %v255_v53 = vor.u32 %v254_v45, %v251_v44  ;;  %v2072_v62 = vrot.slane %v557_v51, 9  ;;  %v586_v63 = vrot.slane %v2764_v26, 5  ;;  %v2553_v1 = vld [vmem:[%s3336_s1 + $0x90] sm:$0xff]  ;;  %v317_v2 = vsel %vm2786_vm2, %v312_v48, %v316_v49  ;;  %vm2810_vm5 = vmor %vm581_vm3, %vm582_vm4  ;;  %v202_v20 = vld [vmem:[%s2714_s25 + $0x18] sm:$0xf] }
  0x21   : > { %2641 = vmatpush.bf16.msra.mxu1 %v2547_v15  ;;  %430 = vmatpush.bf16.msra.mxu0 %v2547_v15  ;;  %v242_v56 = vrot.slane %v241_v50, 4  ;;  %v2073_v4 = vrot.slane %v558_v54, 9  ;;  %v590_v5 = vrot.slane %v2771_v30, 5  ;;  %v319_v6 = vshrl.u32 %v205_v55, 16  ;;  %v201_v7 = vld [vmem:[%s2714_s25 + $0x10] sm:$0xf] }
  0x22   : > { %700 = vmatpush.bf16.msra.mxu2 %v2555_v27  ;;  %v256_v61 = vrot.slane %v255_v53, 4  ;;  %v322_v9 = vshll.u32 %v205_v55, 16  ;;  %v2818_v10 = vunpack.c.l.b16 %v303_v60  ;;  %v2565_v13 = vld [vmem:[%s3336_s1 + $0xd0] sm:$0xff]  ;;  %v333_v14 = vshrl.u32 %v206_v0, 16  ;;  %v2544_v15 = vld [vmem:[%s3336_s1 + $0x48] sm:$0xff]  ;;  %v2543_v39 = vld [vmem:[%s3336_s1 + $0x40] sm:$0xff] }
  0x23   : > { %835 = vmatpush.bf16.msra.mxu3 %v2567_v37  ;;  %v247_v8 = vsel %vm2786_vm2, %v242_v56, %v246_v52  ;;  %v2828_v17 = vunpack.c.l.b16 %v317_v2  ;;  %v587_v18 = vsel %vm2810_vm5, %v2072_v62, %v586_v63  ;;  %v336_v19 = vshll.u32 %v206_v0, 16  ;;  %v2552_v22 = vld [vmem:[%s3336_s1 + $0x88] sm:$0xff]  ;;  %v2841_v25 = vld [vmem:[%s2714_s25 + $0x34] sm:$0x1]  ;;  %v2847_v30 = vld [vmem:[%s2714_s25 + $0x3c] sm:$0x1] }
  0x24   : > { %v261_v12 = vsel %vm2786_vm2, %v256_v61, %v260_v57  ;;  %v263_v21 = vshrl.u32 %v201_v7, 16  ;;  %v2836_v23 = vunpack.c.l.b16 %v247_v8  ;;  %v591_v24 = vsel %vm2810_vm5, %v2073_v4, %v590_v5  ;;  %v2564_v29 = vld [vmem:[%s3336_s1 + $0xc8] sm:$0xff]  ;;  %v2850_v34 = vld [vmem:[%s2714_s25 + $0x14] sm:$0x1]  ;;  %v2542_v40 = vld [vmem:[%s3336_s1 + $0x38] sm:$0xff] }
  0x25   : > { %2642 = vmatpush.bf16.msra.mxu1 %v2546_v41  ;;  %431 = vmatpush.bf16.msra.mxu0 %v2546_v41  ;;  %v321_v26 = vrot.slane %v319_v6, 4  ;;  %v266_v27 = vshll.u32 %v201_v7, 16  ;;  %v364_v28 = vunpack.c.l.b16 %v261_v12  ;;  %v324_v31 = vrot.slane %v322_v9, 5  ;;  %v2551_v43 = vld [vmem:[%s3336_s1 + $0x80] sm:$0xff]  ;;  %v2863_v45 = vld [vmem:[%s2714_s25 + $0x1c] sm:$0x1] }
  0x26   : > { %701 = vmatpush.bf16.msra.mxu2 %v2554_v46  ;;  %v335_v32 = vrot.slane %v333_v14, 4  ;;  %v338_v33 = vrot.slane %v336_v19, 5  ;;  %v265_v35 = vrot.slane %v263_v21, 4  ;;  %v277_v37 = vshrl.u32 %v202_v20, 16  ;;  %v2578_v49 = vld [vmem:[%s3336_s1 + $0x138] sm:$0xff]  ;;  %v2563_v61 = vld [vmem:[%s3336_s1 + $0xc0] sm:$0xff] }
  0x27   : > { %836 = vmatpush.bf16.msra.mxu3 %v2566_v58  ;;  %v268_v36 = vrot.slane %v266_v27, 5  ;;  %v280_v38 = vshll.u32 %v202_v20, 16  ;;  %v633_v41 = vunpack.c.l.b16 %v587_v18  ;;  %v634_v42 = vunpack.c.l.b16 %v591_v24  ;;  %v2598_v52 = vld [vmem:[%s3336_s1 + $0x1b8] sm:$0xff]  ;;  %v2154_v58 = vld [vmem:[%s2714_s25 + $0x8] sm:$0xf]  ;;  %v2577_v2 = vld [vmem:[%s3336_s1 + $0x130] sm:$0xff] }
  0x28   : > { %v328_v44 = vshll.u32 %v2841_v25, 16  ;;  %v279_v46 = vrot.slane %v277_v37, 4  ;;  %v325_v50 = vor.u32 %v324_v31, %v321_v26  ;;  %v342_v51 = vshll.u32 %v2847_v30, 16  ;;  %v559_v0 = vld [vmem:[%s2714_s25 + $0x10] sm:$0xe]  ;;  %v2606_v5 = vld [vmem:[%s3336_s1 + $0x1f8] sm:$0xff] }
  0x29   : > { %2643 = vmatpush.bf16.msra.mxu1 %v2545_v59  ;;  %432 = vmatpush.bf16.msra.mxu0 %v2545_v59  ;;  %v282_v48 = vrot.slane %v280_v38, 5  ;;  %v272_v53 = vshll.u32 %v2850_v34, 16  ;;  %v373_v54 = vpack.c.b16 %v2828_v17, %v2818_v10  ;;  %v371_v55 = vpack.c.b16 %v364_v28, %v2836_v23  ;;  %v2559_v59 = vld [vmem:[%s2714_s25 + $0xc] sm:$0xf0]  ;;  %v560_v10 = vld [vmem:[%s2714_s25 + $0x18] sm:$0xe] }
  0x2a   : > { %702 = vmatpush.bf16.msra.mxu2 %v2553_v1  ;;  %v339_v56 = vor.u32 %v338_v33, %v335_v32  ;;  %v269_v57 = vor.u32 %v268_v36, %v265_v35  ;;  %v641_v60 = vpack.c.b16 %v634_v42, %v633_v41  ;;  %v286_v63 = vshll.u32 %v2863_v45, 16  ;;  %v2541_v1 = vld [vmem:[%s3336_s1 + $0x30] sm:$0xff]  ;;  %v2200_v20 = vld [vmem:[%s2714_s25 + $0x8] sm:$0xf] }
  0x2b   : > { %837 = vmatpush.bf16.msra.mxu3 %v2565_v13  ;;  %v283_v62 = vor.u32 %v282_v48, %v279_v46  ;;  %v330_v4 = vrot.slane %v328_v44, 5  ;;  %v326_v6 = vrot.slane %v325_v50, 4  ;;  %v344_v7 = vrot.slane %v342_v51, 5  ;;  %v2597_v12 = vld [vmem:[%s3336_s1 + $0x1b0] sm:$0xff]  ;;  %v2540_v21 = vld [vmem:[%s3336_s1 + $0x28] sm:$0xff]  ;;  %v2575_v44 = vld [vmem:[%s3336_s1 + $0x120] sm:$0xff] }
  0x2c   : > { %v274_v8 = vrot.slane %v272_v53, 5  ;;  %v2155_v9 = vor.u32 %v2559_v59, %v2154_v58  ;;  %v340_v13 = vrot.slane %v339_v56, 4  ;;  %v270_v14 = vrot.slane %v269_v57, 4  ;;  %v2202_v24 = vld [vmem:[%s2714_s25 + $0x10] sm:$0xf]  ;;  %v2576_v27 = vld [vmem:[%s3336_s1 + $0x128] sm:$0xff] }
  0x2d   : > { %2644 = vmatpush.bf16.msra.mxu1 %v2544_v15  ;;  %433 = vmatpush.bf16.msra.mxu0 %v2544_v15  ;;  %v2074_v15 = vrot.slane %v559_v0, 9  ;;  %v594_v17 = vrot.slane %v2850_v34, 5  ;;  %v284_v18 = vrot.slane %v283_v62, 4  ;;  %v288_v19 = vrot.slane %v286_v63, 5  ;;  %v2605_v26 = vld [vmem:[%s3336_s1 + $0x1f0] sm:$0xff]  ;;  %v2604_v41 = vld [vmem:[%s3336_s1 + $0x1e8] sm:$0xff] }
  0x2e   : > { %703 = vmatpush.bf16.msra.mxu2 %v2552_v22  ;;  %v2075_v22 = vrot.slane %v560_v10, 9  ;;  %v598_v23 = vrot.slane %v2863_v45, 5  ;;  %v331_v28 = vsel %vm2786_vm2, %v326_v6, %v330_v4  ;;  %v345_v31 = vsel %vm2786_vm2, %v340_v13, %v344_v7  ;;  %v2595_v45 = vld [vmem:[%s3336_s1 + $0x1a0] sm:$0xff]  ;;  %v2538_v56 = vld [vmem:[%s3336_s1 + $0x18] sm:$0xff]  ;;  %v2943_v57 = vld [vmem:[%s2714_s25 + $0x14] sm:$0x1] }
  0x2f   : > { %838 = vmatpush.bf16.msra.mxu3 %v2564_v29  ;;  %v2596_v29 = vld [vmem:[%s3336_s1 + $0x1a8] sm:$0xff]  ;;  %v275_v32 = vsel %vm2786_vm2, %v270_v14, %v274_v8  ;;  %v595_v33 = vsel %vm2810_vm5, %v2074_v15, %v594_v17  ;;  %v886_v34 = vshrl.u32 %v2200_v20, 16  ;;  %v289_v35 = vsel %vm2786_vm2, %v284_v18, %v288_v19  ;;  %v2574_v58 = vld [vmem:[%s3336_s1 + $0x118] sm:$0xff]  ;;  %v2560_v0 = vld [vmem:[%s2714_s25 + $0x1c] sm:$0xf0] }
  0x30   : > { %v889_v36 = vshll.u32 %v2200_v20, 16  ;;  %v900_v37 = vshrl.u32 %v2202_v24, 16  ;;  %v903_v38 = vshll.u32 %v2202_v24, 16  ;;  %v369_v42 = vunpack.c.l.b16 %v331_v28  ;;  %v2158_v63 = vld [vmem:[%s2714_s25 + $0x18] sm:$0xf]  ;;  %v2573_v6 = vld [vmem:[%s3336_s1 + $0x110] sm:$0xff] }
  0x31   : > { %2645 = vmatpush.bf16.msra.mxu1 %v2543_v39  ;;  %434 = vmatpush.bf16.msra.mxu0 %v2543_v39  ;;  %v2539_v39 = vld [vmem:[%s3336_s1 + $0x20] sm:$0xff]  ;;  %v365_v46 = vunpack.c.l.b16 %v275_v32  ;;  %v366_v48 = vunpack.c.l.b16 %v289_v35  ;;  %v888_v50 = vrot.slane %v886_v34, 4  ;;  %v909_v4 = vshll.u32 %v2943_v57, 16  ;;  %v562_v8 = vld [vmem:[%s2714_s25 + $0x28] sm:$0xe]  ;;  %v2594_v13 = vld [vmem:[%s3336_s1 + $0x198] sm:$0xff] }
  0x32   : > { %704 = vmatpush.bf16.msra.mxu2 %v2551_v43  ;;  %v370_v43 = vunpack.c.l.b16 %v345_v31  ;;  %v891_v53 = vrot.slane %v889_v36, 5  ;;  %v561_v7 = vld [vmem:[%s2714_s25 + $0x20] sm:$0xe]  ;;  %v2159_v10 = vor.u32 %v2560_v0, %v2158_v63  ;;  %v2204_v18 = vld [vmem:[%s2714_s25 + $0x18] sm:$0xf] }
  0x33   : > { %839 = vmatpush.bf16.msra.mxu3 %v2563_v61  ;;  %v911_v17 = vrot.slane %v909_v4, 5  ;;  %v2603_v19 = vld [vmem:[%s3336_s1 + $0x1e0] sm:$0xff]  ;;  %v2076_v20 = vrot.slane %v561_v7, 9  ;;  %v2602_v28 = vld [vmem:[%s3336_s1 + $0x1d8] sm:$0xff]  ;;  %v2208_v4 = vld [vmem:[%s2714_s25 + $0x28] sm:$0xf] }
  0x34   : > { %445 = vmatmul.bf16.vlgmr.msra.gmra.mxu1 %v373_v54  ;;  %435 = vmatmul.bf16.vlgmr.msra.gmra.mxu0 %v371_v55  ;;  %v902_v54 = vrot.slane %v900_v37, 4  ;;  %v905_v55 = vrot.slane %v903_v38, 5  ;;  %v374_v59 = vpack.c.b16 %v370_v43, %v369_v42  ;;  %v2206_v24 = vld [vmem:[%s2714_s25 + $0x20] sm:$0xf]  ;;  %v2586_v37 = vld [vmem:[%s3336_s1 + $0x178] sm:$0xff]  ;;  %v2592_v7 = vld [vmem:[%s3336_s1 + $0x188] sm:$0xff] }
  0x35   : > { %528 = vmatpush.bf16.msrb.mxu1 %v2542_v40  ;;  %1078 = vmatpush.bf16.msrb.mxu0 %v2578_v49  ;;  %v599_v40 = vsel %vm2810_vm5, %v2075_v22, %v598_v23  ;;  %v635_v49 = vunpack.c.l.b16 %v595_v33  ;;  %v2077_v22 = vrot.slane %v562_v8, 9  ;;  %v606_v23 = vrot.slane %v2755_v16, 5  ;;  %v2535_v34 = vld [vmem:[%s3336_s1] sm:$0xff]  ;;  %v3003_v42 = vld [vmem:[%s3336_s1 + $0x238] sm:$0xff] }
  0x36   : > { %1387 = vmatpush.bf16.msrb.mxu2 %v2598_v52  ;;  %840 = vmatmul.bf16.vlgmr.msra.gmra.mxu3 %v2155_v9  ;;  %v636_v51 = vunpack.c.l.b16 %v599_v40  ;;  %v2937_v52 = vld [vmem:[%s2714_s25 + $0xc] sm:$0x1]  ;;  %v917_v16 = vshll.u32 %v2204_v18, 16  ;;  %v928_v32 = vshrl.u32 %v2206_v24, 16  ;;  %v931_v33 = vshll.u32 %v2206_v24, 16  ;;  %v2571_v38 = vld [vmem:[%s3336_s1 + $0x100] sm:$0xff] }
  0x37   : > { %705 = vmatmul.bf16.vlgmr.msra.gmra.mxu2 %v641_v60  ;;  %1633 = vmatpush.bf16.msrb.mxu3 %v2606_v5  ;;  %v372_v60 = vpack.c.b16 %v366_v48, %v365_v46  ;;  %v895_v61 = vshll.u32 %v2937_v52, 16  ;;  %v2537_v5 = vld [vmem:[%s3336_s1 + $0x10] sm:$0xff]  ;;  %v2536_v9 = vld [vmem:[%s3336_s1 + $0x8] sm:$0xff]  ;;  %v607_v36 = vsel %vm2810_vm5, %v2077_v22, %v606_v23  ;;  %v614_v23 = vrot.slane %v2847_v30, 5  ;;  %v2591_v24 = vld [vmem:[%s3336_s1 + $0x180] sm:$0xff] }
  0x38   : > { %v642_v62 = vpack.c.b16 %v636_v51, %v635_v49  ;;  %v638_v48 = vunpack.c.l.b16 %v607_v36  ;;  %v3007_v49 = vld [vmem:[%s2714_s25 + $0x1c] sm:$0x1]  ;;  %v933_v51 = vrot.slane %v931_v33, 5 }
  0x39   : > { %529 = vmatpush.bf16.msrb.mxu1 %v2541_v1  ;;  %1079 = vmatpush.bf16.msrb.mxu0 %v2577_v2  ;;  %v892_v1 = vor.u32 %v891_v53, %v888_v50  ;;  %v906_v2 = vor.u32 %v905_v55, %v902_v54  ;;  %v930_v50 = vrot.slane %v928_v32, 4  ;;  %v3010_v53 = vld [vmem:[%s2714_s25 + $0x24] sm:$0x1]  ;;  %v2585_v54 = vld [vmem:[%s3336_s1 + $0x170] sm:$0xff] }
  0x3a   : > { %1388 = vmatpush.bf16.msrb.mxu2 %v2597_v12  ;;  %v897_v12 = vrot.slane %v895_v61, 5  ;;  %v2162_v61 = vld [vmem:[%s2714_s25 + $0x28] sm:$0xf]  ;;  %v937_v0 = vshll.u32 %v3010_v53, 16 }
  0x3b   : > { %1634 = vmatpush.bf16.msrb.mxu3 %v2605_v26  ;;  %v893_v14 = vrot.slane %v892_v1, 4  ;;  %v907_v15 = vrot.slane %v906_v2, 4  ;;  %v2572_v26 = vld [vmem:[%s3336_s1 + $0x108] sm:$0xff]  ;;  %v934_v63 = vor.u32 %v933_v51, %v930_v50  ;;  %v3023_v1 = vld [vmem:[%s3336_s1 + $0x230] sm:$0xff]  ;;  %v2402_v50 = vld [vmem:[%s2714_s25 + $0x18] sm:$0xf] }
  0x3c   : > { %v2584_v2 = vld [vmem:[%s3336_s1 + $0x168] sm:$0xff] }
  0x3d   : > { %530 = vmatpush.bf16.msrb.mxu1 %v2540_v21  ;;  %1080 = vmatpush.bf16.msrb.mxu0 %v2576_v27  ;;  %v602_v21 = vrot.slane %v2749_v11, 5  ;;  %v2593_v27 = vld [vmem:[%s3336_s1 + $0x190] sm:$0xff]  ;;  %v914_v11 = vshrl.u32 %v2204_v18, 16  ;;  %v912_v31 = vsel %vm2786_vm2, %v907_v15, %v911_v17  ;;  %v3039_v15 = vld [vmem:[%s3336_s1 + $0x228] sm:$0xff]  ;;  %v942_v17 = vshrl.u32 %v2208_v4, 16 }
  0x3e   : > { %1389 = vmatpush.bf16.msrb.mxu2 %v2596_v29  ;;  %v898_v29 = vsel %vm2786_vm2, %v893_v14, %v897_v12  ;;  %v2210_v12 = vld [vmem:[%s2714_s25 + $0x30] sm:$0xf]  ;;  %v939_v14 = vrot.slane %v937_v0, 5  ;;  %v945_v18 = vshll.u32 %v2208_v4, 16  ;;  %v2212_v0 = vld [vmem:[%s2714_s25 + $0x38] sm:$0xf] }
  0x3f   : > { %1635 = vmatpush.bf16.msrb.mxu3 %v2604_v41  ;;  %v603_v35 = vsel %vm2810_vm5, %v2076_v20, %v602_v21  ;;  %v1014_v40 = vunpack.c.l.b16 %v898_v29  ;;  %v1015_v41 = vunpack.c.l.b16 %v912_v31  ;;  %v916_v43 = vrot.slane %v914_v11, 4  ;;  %v3063_v31 = vld [vmem:[%s3336_s1 + $0x220] sm:$0xff] }
  0x40   : > { %v637_v46 = vunpack.c.l.b16 %v603_v35  ;;  %v610_v21 = vrot.slane %v2841_v25, 5  ;;  %v2600_v25 = vld [vmem:[%s3336_s1 + $0x1c8] sm:$0xff]  ;;  %v947_v29 = vrot.slane %v945_v18, 5  ;;  %v2214_v18 = vld [vmem:[%s2714_s25 + $0x40] sm:$0xf] }
  0x41   : > { %531 = vmatpush.bf16.msrb.mxu1 %v2539_v39  ;;  %1081 = vmatpush.bf16.msrb.mxu0 %v2575_v44  ;;  %v2026_v39 = vld [vmem:[%s2714_s25] sm:$0xf]  ;;  %v919_v44 = vrot.slane %v917_v16, 5  ;;  %v944_v16 = vrot.slane %v942_v17, 4  ;;  %v3073_v35 = vld [vmem:[%s2714_s25 + $0x2c] sm:$0x1] }
  0x42   : > { %1390 = vmatpush.bf16.msrb.mxu2 %v2595_v45  ;;  %v2531_v45 = vld [vmem:[%s2714_s25 + $0x4] sm:$0xf0]  ;;  %v951_v51 = vshll.u32 %v3073_v35, 16 }
  0x43   : > { %1636 = vmatpush.bf16.msrb.mxu3 %v2603_v19  ;;  %v2027_v55 = vor.u32 %v2531_v45, %v2026_v39  ;;  %v2601_v19 = vld [vmem:[%s3336_s1 + $0x1d0] sm:$0xff] }
  0x44   : > { %450 = vmatmul.bf16.gmra.mxu1 %v374_v59  ;;  %440 = vmatmul.bf16.gmra.mxu0 %v372_v60  ;;  %v923_v59 = vshll.u32 %v3007_v49, 16  ;;  %v643_v60 = vpack.c.b16 %v638_v48, %v637_v46  ;;  %v948_v48 = vor.u32 %v947_v29, %v944_v16  ;;  %v3119_v29 = vld [vmem:[%s3336_s1 + $0x210] sm:$0xff] }
  0x45   : > { %532 = vmatpush.bf16.msrb.mxu1 %v2538_v56  ;;  %1082 = vmatpush.bf16.msrb.mxu0 %v2574_v58  ;;  %v1022_v56 = vpack.c.b16 %v1015_v41, %v1014_v40  ;;  %v920_v58 = vor.u32 %v919_v44, %v916_v43  ;;  %v3076_v40 = vld [vmem:[%s2714_s25 + $0x34] sm:$0x1]  ;;  %v2400_v41 = vld [vmem:[%s2714_s25 + $0x10] sm:$0xf]  ;;  %v2532_v44 = vld [vmem:[%s2714_s25 + $0x14] sm:$0xf0] }
  0x46   : > { %1391 = vmatpush.bf16.msrb.mxu2 %v2594_v13  ;;  %845 = vmatmul.bf16.gmra.mxu3 %v2159_v10  ;;  %v925_v10 = vrot.slane %v923_v59, 5  ;;  %v935_v13 = vrot.slane %v934_v63, 4  ;;  %v2030_v43 = vld [vmem:[%s2714_s25 + $0x10] sm:$0xf]  ;;  %v965_v59 = vshll.u32 %v3076_v40, 16 }
  0x47   : > { %710 = vmatmul.bf16.gmra.mxu2 %v642_v62  ;;  %1637 = vmatpush.bf16.msrb.mxu3 %v2602_v28  ;;  %v2561_v62 = vld [vmem:[%s2714_s25 + $0x2c] sm:$0xf0]  ;;  %v959_v28 = vshll.u32 %v2210_v12, 16  ;;  %v2562_v63 = vld [vmem:[%s2714_s25 + $0x3c] sm:$0xf0] }
  0x48   : > { %v2163_v8 = vor.u32 %v2561_v62, %v2162_v61  ;;  %v940_v11 = vsel %vm2786_vm2, %v935_v13, %v939_v14  ;;  %v2031_v61 = vor.u32 %v2532_v44, %v2030_v43  ;;  %v967_v17 = vrot.slane %v965_v59, 5  ;;  %v3132_v44 = vld [vmem:[%s2714_s25 + $0x3c] sm:$0x1] }
  0x49   : > { %533 = vmatpush.bf16.msrb.mxu1 %v2537_v5  ;;  %1083 = vmatpush.bf16.msrb.mxu0 %v2573_v6  ;;  %v563_v5 = vld [vmem:[%s2714_s25 + $0x30] sm:$0xe]  ;;  %v564_v6 = vld [vmem:[%s2714_s25 + $0x38] sm:$0xe]  ;;  %v1017_v39 = vunpack.c.l.b16 %v940_v11  ;;  %v987_v11 = vshll.u32 %v2214_v18, 16 }
  0x4a   : > { %1392 = vmatpush.bf16.msrb.mxu2 %v2593_v27  ;;  %v2078_v20 = vrot.slane %v563_v5, 9  ;;  %v2079_v22 = vrot.slane %v564_v6, 9  ;;  %v956_v27 = vshrl.u32 %v2210_v12, 16  ;;  %v949_v5 = vrot.slane %v948_v48, 4  ;;  %v3094_v6 = vld [vmem:[%s2714_s25 + $0x14] sm:$0x1] }
  0x4b   : > { %1638 = vmatpush.bf16.msrb.mxu3 %v2601_v19  ;;  %v970_v19 = vshrl.u32 %v2212_v0, 16 }
  0x4c   : > { %v611_v32 = vsel %vm2810_vm5, %v2078_v20, %v610_v21  ;;  %v615_v33 = vsel %vm2810_vm5, %v2079_v22, %v614_v23  ;;  %v958_v36 = vrot.slane %v956_v27, 4  ;;  %v3106_v20 = vld [vmem:[%s3336_s1 + $0x218] sm:$0xff]  ;;  %v2599_v21 = vld [vmem:[%s3336_s1 + $0x1c0] sm:$0xff]  ;;  %v973_v22 = vshll.u32 %v2212_v0, 16 }
  0x4d   : > { %534 = vmatpush.bf16.msrb.mxu1 %v2536_v9  ;;  %1084 = vmatpush.bf16.msrb.mxu0 %v2572_v26  ;;  %v921_v9 = vrot.slane %v920_v58, 4  ;;  %v2583_v26 = vld [vmem:[%s3336_s1 + $0x160] sm:$0xff]  ;;  %v639_v45 = vunpack.c.l.b16 %v611_v32  ;;  %v640_v46 = vunpack.c.l.b16 %v615_v33  ;;  %v1141_v27 = vrot.slane %v2937_v52, 5  ;;  %v2264_v32 = vld [vmem:[%s2714_s25 + $0x8] sm:$0xe] }
  0x4e   : > { %1393 = vmatpush.bf16.msrb.mxu2 %v2592_v7  ;;  %v953_v7 = vrot.slane %v951_v51, 5  ;;  %v989_v51 = vrot.slane %v987_v11, 5 }
  0x4f   : > { %v926_v30 = vsel %vm2786_vm2, %v921_v9, %v925_v10  ;;  %1639 = vmatpush.bf16.msrb.mxu3 %v2600_v25  ;;  %v644_v4 = vpack.c.b16 %v640_v46, %v639_v45  ;;  %v1145_v25 = vrot.slane %v2943_v57, 5  ;;  %v972_v57 = vrot.slane %v970_v19, 4 }
  0x50   : > { %v954_v52 = vsel %vm2786_vm2, %v949_v5, %v953_v7  ;;  %v2354_v5 = vld [vmem:[%s2714_s25 + $0x10] sm:$0xf] }
  0x51   : > { %535 = vmatpush.bf16.msrb.mxu1 %v2535_v34  ;;  %1085 = vmatpush.bf16.msrb.mxu0 %v2571_v38  ;;  %v2582_v34 = vld [vmem:[%s3336_s1 + $0x158] sm:$0xff]  ;;  %v1016_v38 = vunpack.c.l.b16 %v926_v30  ;;  %v984_v30 = vshrl.u32 %v2214_v18, 16 }
  0x52   : > { %1394 = vmatpush.bf16.msrb.mxu2 %v2591_v24  ;;  %v1450_v24 = vshll.u32 %v3094_v6, 16 }
  0x53   : > { %v1023_v62 = vpack.c.b16 %v1017_v39, %v1016_v38  ;;  %1640 = vmatpush.bf16.msrb.mxu3 %v2599_v21  ;;  %v975_v38 = vrot.slane %v973_v22, 5 }
  0x54   : > { %536 = vmatmul.bf16.vlgmr.msrb.gmra.mxu1 %v2027_v55  ;;  %1086 = vmatmul.bf16.vlgmr.msrb.gmra.mxu0 %v1022_v56  ;;  %v1444_v55 = vshll.u32 %v2400_v41, 16  ;;  %v1455_v56 = vshrl.u32 %v2402_v50, 16 }
  0x55   : > { %1252 = vmatpush.bf16.msra.mxu1 %v2586_v37  ;;  %1807 = vmatpush.bf16.msra.mxu0 %v3003_v42  ;;  %v961_v37 = vrot.slane %v959_v28, 5 }
  0x56   : > { %850 = vmatmul.bf16.gmra.mxu3 %v2163_v8  ;;  %2646 = vmatpush.bf16.msra.mxu2 %v3003_v42  ;;  %v2166_v42 = vld [vmem:[%s2714_s25 + $0x38] sm:$0xf]  ;;  %v3097_v8 = vld [vmem:[%s2714_s25 + $0x1c] sm:$0x1]  ;;  %v1446_v10 = vrot.slane %v1444_v55, 5  ;;  %v1457_v12 = vrot.slane %v1455_v56, 4 }
  0x57   : > { %715 = vmatmul.bf16.gmra.mxu2 %v643_v60  ;;  %v962_v58 = vor.u32 %v961_v37, %v958_v36  ;;  %v2581_v60 = vld [vmem:[%s3336_s1 + $0x150] sm:$0xff]  ;;  %v2167_v13 = vor.u32 %v2562_v63, %v2166_v42  ;;  %v1464_v28 = vshll.u32 %v3097_v8, 16  ;;  %v2272_v37 = vrot.slane %v2264_v32, 9  ;;  %v2034_v56 = vld [vmem:[%s2714_s25 + $0x20] sm:$0xf] }
  0x58   : > { %v2265_v36 = vld [vmem:[%s2714_s25 + $0x10] sm:$0xe]  ;;  %v2533_v42 = vld [vmem:[%s2714_s25 + $0x24] sm:$0xf0]  ;;  %v979_v63 = vshll.u32 %v3132_v44, 16 }
  0x59   : > { %1253 = vmatpush.bf16.msra.mxu1 %v2585_v54  ;;  %1808 = vmatpush.bf16.msra.mxu0 %v3023_v1  ;;  %v1441_v54 = vshrl.u32 %v2400_v41, 16  ;;  %v963_v14 = vrot.slane %v962_v58, 4  ;;  %v1452_v41 = vrot.slane %v1450_v24, 5  ;;  %v2273_v43 = vrot.slane %v2265_v36, 9  ;;  %v2607_v36 = vld [vmem:[%s3336_s1 + $0x200] sm:$0xff] }
  0x5a   : > { %2647 = vmatpush.bf16.msra.mxu2 %v3023_v1  ;;  %v2580_v1 = vld [vmem:[%s3336_s1 + $0x148] sm:$0xff]  ;;  %v1466_v46 = vrot.slane %v1464_v28, 5  ;;  %v1142_v48 = vsel %vm2810_vm5, %v2272_v37, %v1141_v27  ;;  %v1018_v58 = vunpack.c.l.b16 %v954_v52  ;;  %v2035_v19 = vor.u32 %v2533_v42, %v2034_v56  ;;  %v2038_v56 = vld [vmem:[%s2714_s25 + $0x30] sm:$0xf] }
  0x5b   : > { %v1443_v9 = vrot.slane %v1441_v54, 4  ;;  %v968_v33 = vsel %vm2786_vm2, %v963_v14, %v967_v17  ;;  %v1146_v54 = vsel %vm2810_vm5, %v2273_v43, %v1145_v25  ;;  %v1188_v55 = vunpack.c.l.b16 %v1142_v48  ;;  %v3165_v27 = vld [vmem:[%s2714_s25 + $0x2c] sm:$0x1] }
  0x5c   : > { %v1019_v59 = vunpack.c.l.b16 %v968_v33 }
  0x5d   : > { %1254 = vmatpush.bf16.msra.mxu1 %v2584_v2  ;;  %1809 = vmatpush.bf16.msra.mxu0 %v3039_v15  ;;  %v1458_v2 = vshll.u32 %v2402_v50, 16  ;;  %v1447_v23 = vor.u32 %v1446_v10, %v1443_v9  ;;  %v986_v50 = vrot.slane %v984_v30, 4 }
  0x5e   : > { %2648 = vmatpush.bf16.msra.mxu2 %v3039_v15  ;;  %v2608_v15 = vld [vmem:[%s3336_s1 + $0x208] sm:$0xff] }
  0x5f   : > { %v1448_v39 = vrot.slane %v1447_v23, 4 }
  0x61   : > { %1255 = vmatpush.bf16.msra.mxu1 %v2583_v26  ;;  %1810 = vmatpush.bf16.msra.mxu0 %v3063_v31  ;;  %v1460_v26 = vrot.slane %v1458_v2, 5  ;;  %v1453_v0 = vsel %vm2786_vm2, %v1448_v39, %v1452_v41  ;;  %v2404_v2 = vld [vmem:[%s2714_s25 + $0x20] sm:$0xf] }
  0x62   : > { %2649 = vmatpush.bf16.msra.mxu2 %v3063_v31  ;;  %v1469_v10 = vshrl.u32 %v2404_v2, 16  ;;  %v990_v31 = vor.u32 %v989_v51, %v986_v50  ;;  %v1569_v23 = vunpack.c.l.b16 %v1453_v0  ;;  %v2267_v39 = vld [vmem:[%s2714_s25 + $0x20] sm:$0xe]  ;;  %v1149_v51 = vrot.slane %v3007_v49, 5 }
  0x63   : > { %v1461_v16 = vor.u32 %v1460_v26, %v1457_v12  ;;  %v1472_v12 = vshll.u32 %v2404_v2, 16  ;;  %v3162_v26 = vld [vmem:[%s2714_s25 + $0x24] sm:$0x1] }
  0x64   : > { %541 = vmatmul.bf16.gmra.mxu1 %v2031_v61  ;;  %1091 = vmatmul.bf16.gmra.mxu0 %v1023_v62  ;;  %v1189_v61 = vunpack.c.l.b16 %v1146_v54  ;;  %v976_v62 = vor.u32 %v975_v38, %v972_v57  ;;  %v1471_v21 = vrot.slane %v1469_v10, 4  ;;  %v991_v32 = vrot.slane %v990_v31, 4  ;;  %v2266_v38 = vld [vmem:[%s2714_s25 + $0x18] sm:$0xe] }
  0x65   : > { %1256 = vmatpush.bf16.msra.mxu1 %v2582_v34  ;;  %1811 = vmatpush.bf16.msra.mxu0 %v3106_v20  ;;  %v2579_v34 = vld [vmem:[%s3336_s1 + $0x140] sm:$0xff]  ;;  %v1462_v45 = vrot.slane %v1461_v16, 4  ;;  %v1474_v22 = vrot.slane %v1472_v12, 5  ;;  %v981_v16 = vrot.slane %v979_v63, 5  ;;  %v1478_v57 = vshll.u32 %v3162_v26, 16 }
  0x66   : > { %855 = vmatmul.bf16.gmra.mxu3 %v2167_v13  ;;  %v3156_v9 = vpack.c.b16 %v1189_v61, %v1188_v55  ;;  %v2587_v13 = vld [vmem:[%s2714_s25 + $0x14] sm:$0xf0]  ;;  %2650 = vmatpush.bf16.msra.mxu2 %v3106_v20  ;;  %v977_v11 = vrot.slane %v976_v62, 4  ;;  %v1492_v20 = vshll.u32 %v3165_v27, 16  ;;  %v2274_v48 = vrot.slane %v2266_v38, 9 }
  0x67   : > { %720 = vmatmul.bf16.gmra.mxu2 %v644_v4  ;;  %v2406_v4 = vld [vmem:[%s2714_s25 + $0x28] sm:$0xf]  ;;  %v1467_v7 = vsel %vm2786_vm2, %v1462_v45, %v1466_v46  ;;  %v2355_v30 = vor.u32 %v2587_v13, %v2354_v5  ;;  %v1475_v33 = vor.u32 %v1474_v22, %v1471_v21  ;;  %v1480_v45 = vrot.slane %v1478_v57, 5  ;;  %v2464_v63 = vld [vmem:[%s2714_s25 + $0x10] sm:$0xe] }
  0x68   : > { %v1483_v17 = vshrl.u32 %v2406_v4, 16  ;;  %v1486_v18 = vshll.u32 %v2406_v4, 16  ;;  %v1570_v24 = vunpack.c.l.b16 %v1467_v7  ;;  %v982_v41 = vsel %vm2786_vm2, %v977_v11, %v981_v16  ;;  %v2465_v4 = vld [vmem:[%s2714_s25 + $0x18] sm:$0xe]  ;;  %v2408_v5 = vld [vmem:[%s2714_s25 + $0x30] sm:$0xf] }
  0x69   : > { %1257 = vmatpush.bf16.msra.mxu1 %v2581_v60  ;;  %1812 = vmatpush.bf16.msra.mxu0 %v3119_v29  ;;  %v3145_v60 = vld [vmem:[%s2714_s25 + $0x44] sm:$0x1]  ;;  %v1494_v46 = vrot.slane %v1492_v20, 5  ;;  %v2275_v54 = vrot.slane %v2267_v39, 9  ;;  %v1153_v55 = vrot.slane %v3010_v53, 5  ;;  %v1020_v42 = vunpack.c.l.b16 %v982_v41 }
  0x6a   : > { %v993_v14 = vshll.u32 %v3145_v60, 16  ;;  %v1485_v28 = vrot.slane %v1483_v17, 4  ;;  %v1488_v25 = vrot.slane %v1486_v18, 5  ;;  %2651 = vmatpush.bf16.msra.mxu2 %v3119_v29  ;;  %v1476_v29 = vrot.slane %v1475_v33, 4  ;;  %v2410_v7 = vld [vmem:[%s2714_s25 + $0x38] sm:$0xf] }
  0x6b   : > { %v1154_v61 = vsel %vm2810_vm5, %v2275_v54, %v1153_v55  ;;  %v1696_v62 = vrot.slane %v3094_v6, 5  ;;  %v1497_v12 = vshrl.u32 %v2408_v5, 16  ;;  %v1500_v13 = vshll.u32 %v2408_v5, 16  ;;  %v2358_v18 = vld [vmem:[%s2714_s25 + $0x20] sm:$0xf] }
  0x6c   : > { %v995_v52 = vrot.slane %v993_v14, 5  ;;  %v1489_v37 = vor.u32 %v1488_v25, %v1485_v28  ;;  %v1191_v0 = vunpack.c.l.b16 %v1154_v61  ;;  %v1481_v53 = vsel %vm2786_vm2, %v1476_v29, %v1480_v45  ;;  %v2268_v54 = vld [vmem:[%s2714_s25 + $0x28] sm:$0xe]  ;;  %v2269_v55 = vld [vmem:[%s2714_s25 + $0x30] sm:$0xe] }
  0x6d   : > { %1258 = vmatpush.bf16.msra.mxu1 %v2580_v1  ;;  %1813 = vmatpush.bf16.msra.mxu0 %v2608_v15  ;;  %v1024_v1 = vpack.c.b16 %v1019_v59, %v1018_v58  ;;  %v1150_v59 = vsel %vm2810_vm5, %v2274_v48, %v1149_v51  ;;  %v1511_v6 = vshrl.u32 %v2410_v7, 16  ;;  %v1700_v17 = vrot.slane %v3097_v8, 5  ;;  %v2362_v48 = vld [vmem:[%s2714_s25 + $0x30] sm:$0xf]  ;;  %v2466_v5 = vld [vmem:[%s2714_s25 + $0x20] sm:$0xe] }
  0x6e   : > { %v996_v43 = vsel %vm2786_vm2, %v991_v32, %v995_v52  ;;  %2652 = vmatpush.bf16.msra.mxu2 %v2608_v15  ;;  %v1490_v50 = vrot.slane %v1489_v37, 4  ;;  %v2534_v15 = vld [vmem:[%s2714_s25 + $0x34] sm:$0xf0]  ;;  %v1190_v49 = vunpack.c.l.b16 %v1150_v59  ;;  %v1571_v21 = vunpack.c.l.b16 %v1481_v53  ;;  %v3202_v32 = vld [vmem:[%s2714_s25 + $0x34] sm:$0x1] }
  0x6f   : > { %v1021_v58 = vunpack.c.l.b16 %v996_v43  ;;  %v2039_v31 = vor.u32 %v2534_v15, %v2038_v56  ;;  %v1499_v28 = vrot.slane %v1497_v12, 4  ;;  %v1502_v25 = vrot.slane %v1500_v13, 5  ;;  %v3205_v52 = vld [vmem:[%s2714_s25 + $0x3c] sm:$0x1]  ;;  %v2412_v56 = vld [vmem:[%s2714_s25 + $0x40] sm:$0xf] }
  0x70   : > { %v1495_v2 = vsel %vm2786_vm2, %v1490_v50, %v1494_v46  ;;  %v3196_v10 = vpack.c.b16 %v1191_v0, %v1190_v49  ;;  %v1520_v37 = vshll.u32 %v3205_v52, 16  ;;  %v2277_v59 = vrot.slane %v2269_v55, 9  ;;  %v2414_v15 = vld [vmem:[%s2714_s25 + $0x48] sm:$0xf] }
  0x71   : > { %1259 = vmatpush.bf16.msra.mxu1 %v2579_v34  ;;  %v1577_v34 = vpack.c.b16 %v1570_v24, %v1569_v23  ;;  %1814 = vmatpush.bf16.msra.mxu0 %v2607_v36  ;;  %v1025_v14 = vpack.c.b16 %v1021_v58, %v1020_v42  ;;  %v1572_v22 = vunpack.c.l.b16 %v1495_v2  ;;  %v2472_v23 = vrot.slane %v2464_v63, 9  ;;  %v2467_v12 = vld [vmem:[%s2714_s25 + $0x28] sm:$0xe] }
  0x72   : > { %2653 = vmatpush.bf16.msra.mxu2 %v2607_v36  ;;  %v2473_v24 = vrot.slane %v2465_v4, 9  ;;  %v1503_v20 = vor.u32 %v1502_v25, %v1499_v28  ;;  %v1522_v45 = vrot.slane %v1520_v37, 5  ;;  %v2276_v42 = vrot.slane %v2268_v54, 9 }
  0x73   : > { %v1578_v33 = vpack.c.b16 %v1572_v22, %v1571_v21  ;;  %v1697_v8 = vsel %vm2810_vm5, %v2472_v23, %v1696_v62  ;;  %v1157_v58 = vrot.slane %v3073_v35, 5  ;;  %v1161_v61 = vrot.slane %v3076_v40, 5  ;;  %v2589_v62 = vld [vmem:[%s2714_s25 + $0x34] sm:$0xf0] }
  0x74   : > { %546 = vmatmul.bf16.gmra.mxu1 %v2035_v19  ;;  %1096 = vmatmul.bf16.gmra.mxu0 %v1024_v1  ;;  %v2588_v19 = vld [vmem:[%s2714_s25 + $0x24] sm:$0xf0]  ;;  %v1514_v1 = vshll.u32 %v2410_v7, 16  ;;  %v1701_v57 = vsel %vm2810_vm5, %v2473_v24, %v1700_v17  ;;  %v1743_v38 = vunpack.c.l.b16 %v1697_v8  ;;  %v1504_v41 = vrot.slane %v1503_v20, 4  ;;  %v3232_v17 = vld [vmem:[%s2714_s25 + $0x44] sm:$0x1] }
  0x75   : > { %v2359_v16 = vor.u32 %v2588_v19, %v2358_v18  ;;  %v1744_v39 = vunpack.c.l.b16 %v1701_v57  ;;  %v1525_v63 = vshrl.u32 %v2412_v56, 16  ;;  %v1528_v49 = vshll.u32 %v2412_v56, 16  ;;  %v3235_v18 = vld [vmem:[%s2714_s25 + $0x4c] sm:$0x1] }
  0x76   : > { %1641 = vmatmul.bf16.vlgmr.msrb.gmra.mxu3 %v1577_v34  ;;  %v1516_v11 = vrot.slane %v1514_v1, 5  ;;  %v1506_v34 = vshll.u32 %v3202_v32, 16  ;;  %v1539_v0 = vshrl.u32 %v2414_v15, 16  ;;  %v1542_v53 = vshll.u32 %v2414_v15, 16 }
  0x77   : > { %1395 = vmatmul.bf16.vlgmr.msrb.gmra.mxu2 %v2355_v30  ;;  %v1513_v30 = vrot.slane %v1511_v6, 4  ;;  %v1751_v46 = vpack.c.b16 %v1744_v39, %v1743_v38  ;;  %v1158_v7 = vsel %vm2810_vm5, %v2276_v42, %v1157_v58  ;;  %v1162_v35 = vsel %vm2810_vm5, %v2277_v59, %v1161_v61  ;;  %v2270_v39 = vld [vmem:[%s2714_s25 + $0x38] sm:$0xe] }
  0x78   : > { %v1508_v43 = vrot.slane %v1506_v34, 5  ;;  %v1192_v13 = vunpack.c.l.b16 %v1158_v7  ;;  %v1193_v40 = vunpack.c.l.b16 %v1162_v35  ;;  %v1527_v6 = vrot.slane %v1525_v63, 4  ;;  %v2469_v61 = vld [vmem:[%s2714_s25 + $0x38] sm:$0xe]  ;;  %v2471_v63 = vld [vmem:[%s2714_s25 + $0x48] sm:$0xe] }
  0x79   : > { %v1517_v36 = vor.u32 %v1516_v11, %v1513_v30  ;;  %v1541_v19 = vrot.slane %v1539_v0, 4  ;;  %v1544_v1 = vrot.slane %v1542_v53, 5  ;;  %v2474_v21 = vrot.slane %v2466_v5, 9 }
  0x7a   : > { %v1509_v50 = vsel %vm2786_vm2, %v1504_v41, %v1508_v43  ;;  %v3237_v22 = vpack.c.b16 %v1193_v40, %v1192_v13  ;;  %v1704_v24 = vrot.slane %v3162_v26, 5  ;;  %v2475_v28 = vrot.slane %v2467_v12, 9  ;;  %v2271_v41 = vld [vmem:[%s2714_s25 + $0x40] sm:$0xe] }
  0x7b   : > { %v1518_v29 = vrot.slane %v1517_v36, 4  ;;  %v1573_v2 = vunpack.c.l.b16 %v1509_v50  ;;  %v1708_v25 = vrot.slane %v3165_v27, 5  ;;  %v1534_v11 = vshll.u32 %v3232_v17, 16  ;;  %v2590_v50 = vld [vmem:[%s2714_s25 + $0x44] sm:$0xf0] }
  0x7c   : > { %v1705_v8 = vsel %vm2810_vm5, %v2474_v21, %v1704_v24  ;;  %v2278_v43 = vrot.slane %v2270_v39, 9  ;;  %v1712_v0 = vrot.slane %v3202_v32, 5  ;;  %v2477_v53 = vrot.slane %v2469_v61, 9 }
  0x7d   : > { %v1523_v51 = vsel %vm2786_vm2, %v1518_v29, %v1522_v45  ;;  %v1709_v26 = vsel %vm2810_vm5, %v2475_v28, %v1708_v25  ;;  %v1536_v27 = vrot.slane %v1534_v11, 5  ;;  %v1745_v34 = vunpack.c.l.b16 %v1705_v8 }
  0x7e   : > { %v1574_v4 = vunpack.c.l.b16 %v1523_v51  ;;  %v1746_v36 = vunpack.c.l.b16 %v1709_v26  ;;  %v1165_v29 = vrot.slane %v3132_v44, 5  ;;  %v2279_v45 = vrot.slane %v2271_v41, 9  ;;  %v2468_v44 = vld [vmem:[%s2714_s25 + $0x30] sm:$0xe] }
  0x7f   : > { %v1724_v5 = vrot.slane %v3235_v18, 5  ;;  %v2479_v35 = vrot.slane %v2471_v63, 9 }
  0x80   : > { %v1579_v23 = vpack.c.b16 %v1574_v4, %v1573_v2  ;;  %v1752_v51 = vpack.c.b16 %v1746_v36, %v1745_v34  ;;  %v1166_v54 = vsel %vm2810_vm5, %v2278_v43, %v1165_v29  ;;  %v1716_v2 = vrot.slane %v3205_v52, 5 }
  0x81   : > { %v1194_v42 = vunpack.c.l.b16 %v1166_v54  ;;  %v1720_v4 = vrot.slane %v3232_v17, 5  ;;  %v1725_v32 = vsel %vm2810_vm5, %v2479_v35, %v1724_v5 }
  0x84   : > { %551 = vmatmul.bf16.gmra.mxu1 %v2039_v31  ;;  %1101 = vmatmul.bf16.gmra.mxu0 %v1025_v14  ;;  %v1530_v31 = vrot.slane %v1528_v49, 5  ;;  %v2363_v14 = vor.u32 %v2589_v62, %v2362_v48  ;;  %v2366_v48 = vld [vmem:[%s2714_s25 + $0x40] sm:$0xf]  ;;  %v2476_v49 = vrot.slane %v2468_v44, 9 }
  0x85   : > { %v2367_v59 = vor.u32 %v2590_v50, %v2366_v48  ;;  %v2470_v62 = vld [vmem:[%s2714_s25 + $0x40] sm:$0xe] }
  0x86   : > { %1646 = vmatmul.bf16.gmra.mxu3 %v1578_v33  ;;  %v1531_v30 = vor.u32 %v1530_v31, %v1527_v6  ;;  %v1548_v33 = vshll.u32 %v3235_v18, 16  ;;  %v2478_v7 = vrot.slane %v2470_v62, 9  ;;  %v1713_v12 = vsel %vm2810_vm5, %v2476_v49, %v1712_v0 }
  0x87   : > { %1400 = vmatmul.bf16.gmra.mxu2 %v2359_v16  ;;  %v1545_v16 = vor.u32 %v1544_v1, %v1541_v19  ;;  %v1747_v52 = vunpack.c.l.b16 %v1713_v12  ;;  %v1750_v31 = vunpack.c.l.b16 %v1725_v32 }
  0x88   : > { %v1550_v20 = vrot.slane %v1548_v33, 5  ;;  %v1721_v13 = vsel %vm2810_vm5, %v2478_v7, %v1720_v4 }
  0x89   : > { %v1546_v57 = vrot.slane %v1545_v16, 4  ;;  %v1749_v6 = vunpack.c.l.b16 %v1721_v13 }
  0x8b   : > { %v1551_v38 = vsel %vm2786_vm2, %v1546_v57, %v1550_v20  ;;  %v1754_v19 = vpack.c.b16 %v1750_v31, %v1749_v6 }
  0x8c   : > { %v1576_v56 = vunpack.c.l.b16 %v1551_v38 }
  0x94   : > { %1260 = vmatmul.bf16.vlgmr.msra.gmra.mxu1 %v3156_v9  ;;  %1815 = vmatmul.bf16.vlgmr.msra.gmra.mxu0 %v1751_v46  ;;  %v1532_v9 = vrot.slane %v1531_v30, 4  ;;  %v1169_v46 = vrot.slane %v3145_v60, 5 }
  0x96   : > { %1651 = vmatmul.bf16.gmra.mxu3 %v1579_v23  ;;  %v1537_v37 = vsel %vm2786_vm2, %v1532_v9, %v1536_v27  ;;  %v1170_v47 = vsel %vm2810_vm5, %v2279_v45, %v1169_v46 }
  0x97   : > { %1405 = vmatmul.bf16.gmra.mxu2 %v2363_v14  ;;  %v1575_v55 = vunpack.c.l.b16 %v1537_v37  ;;  %v1195_v58 = vunpack.c.l.b16 %v1170_v47 }
  0x99   : > { %v1199_v15 = vpack.c.b16 %v1195_v58, %v1194_v42  ;;  %v1580_v60 = vpack.c.b16 %v1576_v56, %v1575_v55 }
  0xa4   : > { %1265 = vmatmul.bf16.gmra.mxu1 %v3196_v10  ;;  %1820 = vmatmul.bf16.gmra.mxu0 %v1752_v51  ;;  %v1717_v10 = vsel %vm2810_vm5, %v2477_v53, %v1716_v2 }
  0xa5   : > { %v1748_v40 = vunpack.c.l.b16 %v1717_v10 }
  0xa6   : > { %1656 = vmatmul.bf16.gmra.mxu3 %v1580_v60 }
  0xa7   : > { %1410 = vmatmul.bf16.gmra.mxu2 %v2367_v59  ;;  %v1753_v14 = vpack.c.b16 %v1748_v40, %v1747_v52 }
  0xb1   : > { %v446_v17 = vpop.f32.mrf.mxu1  ;;  %v436_v18 = vpop.f32.mrf.mxu0 }
  0xb4   : > { %1270 = vmatmul.bf16.gmra.mxu1 %v3237_v22  ;;  %1825 = vmatmul.bf16.gmra.mxu0 %v1753_v14 }
  0xb7   : > { %1830 = vmatmul.bf16.vlgmr.msra.gmra.mxu2 %v1754_v19 }
  0xb9   : > { %v448_v21 = vpop.f32.mrf.mxu1  ;;  %v438_v23 = vpop.f32.mrf.mxu0 }
  0xba   : > { %v706_v1 = vpop.f32.mrf.mxu2  ;;  %v841_v24 = vpop.f32.mrf.mxu3 }
  0xc1   : > { %v451_v25 = vpop.f32.mrf.mxu1  ;;  %v441_v3 = vpop.f32.mrf.mxu0 }
  0xc2   : > { %v708_v28 = vpop.f32.mrf.mxu2  ;;  %v3280_v30 = vpop.f32.mrf.mxu3 }
  0xc4   : > { %1275 = vmatmul.bf16.gmra.mxu1 %v1199_v15 }
  0xc9   : > { %v453_v16 = vpop.f32.mrf.mxu1  ;;  %v443_v33 = vpop.f32.mrf.mxu0 }
  0xca   : > { %v711_v11 = vpop.f32.mrf.mxu2  ;;  %v846_v8 = vpop.f32.mrf.mxu3 }
  0xd1   : > { %v537_v9 = vpop.f32.mrf.mxu1  ;;  %v1087_v27 = vpop.f32.mrf.mxu0 }
  0xd2   : > { %v713_v26 = vpop.f32.mrf.mxu2  ;;  %v538_v22 = vadd.f32 %v537_v9, %v436_v18  ;;  %v3282_v20 = vpop.f32.mrf.mxu3 }
  0xd4   : > { %v726_v57 = vadd.f32 %v706_v1, %v538_v22 }
  0xd6   : > { %v861_v34 = vadd.f32 %v841_v24, %v726_v57 }
  0xd8   : > { %v1107_v36 = vadd.f32 %v1087_v27, %v861_v34 }
  0xd9   : > { %v539_v38 = vpop.f32.mrf.mxu1  ;;  %v1089_v39 = vpop.f32.mrf.mxu0 }
  0xda   : > { %v716_v37 = vpop.f32.mrf.mxu2  ;;  %v540_v41 = vadd.f32 %v539_v38, %v438_v23  ;;  %v851_v29 = vpop.f32.mrf.mxu3 }
  0xdc   : > { %v727_v43 = vadd.f32 %v708_v28, %v540_v41 }
  0xe1   : > { %v542_v46 = vpop.f32.mrf.mxu1  ;;  %v1092_v48 = vpop.f32.mrf.mxu0 }
  0xe2   : > { %v718_v45 = vpop.f32.mrf.mxu2  ;;  %v543_v50 = vadd.f32 %v542_v46, %v441_v3  ;;  %v3284_v56 = vpop.f32.mrf.mxu3  ;;  %v862_v3 = vadd.f32 %v3280_v30, %v727_v43 }
  0xe4   : > { %v728_v51 = vadd.f32 %v711_v11, %v543_v50 }
  0xe6   : > { %v863_v54 = vadd.f32 %v846_v8, %v728_v51 }
  0xe8   : > { %v1109_v47 = vadd.f32 %v1092_v48, %v863_v54 }
  0xe9   : > { %v544_v42 = vpop.f32.mrf.mxu1  ;;  %v1094_v58 = vpop.f32.mrf.mxu0 }
  0xea   : > { %v721_v55 = vpop.f32.mrf.mxu2  ;;  %v545_v59 = vadd.f32 %v544_v42, %v443_v33  ;;  %v3286_v60 = vpop.f32.mrf.mxu3  ;;  %v1108_v33 = vadd.f32 %v1089_v39, %v862_v3 }
  0xec   : > { %v729_v44 = vadd.f32 %v713_v26, %v545_v59 }
  0xee   : > { %v864_v39 = vadd.f32 %v3282_v20, %v729_v44 }
  0xf1   : > { %v547_v15 = vpop.f32.mrf.mxu1  ;;  %v1097_v62 = vpop.f32.mrf.mxu0 }
  0xf2   : > { %v723_v61 = vpop.f32.mrf.mxu2  ;;  %v548_v63 = vadd.f32 %v547_v15, %v446_v17  ;;  %v3294_v12 = vpop.f32.mrf.mxu3 }
  0xf4   : > { %v730_v49 = vadd.f32 %v716_v37, %v548_v63 }
  0xf6   : > { %v865_v0 = vadd.f32 %v851_v29, %v730_v49 }
  0xf8   : > { %v3288_v53 = vadd.f32 %v1097_v62, %v865_v0 }
  0xf9   : > { %v549_v4 = vpop.f32.mrf.mxu1  ;;  %v3290_v5 = vpop.f32.mrf.mxu0 }
  0xfa   : > { %v1396_v2 = vpop.f32.mrf.mxu2  ;;  %v550_v7 = vadd.f32 %v549_v4, %v448_v21  ;;  %v1642_v6 = vpop.f32.mrf.mxu3 }
  0xfc   : > { %v3292_v35 = vadd.f32 %v718_v45, %v550_v7 }
 0x101   : > { %v552_v13 = vpop.f32.mrf.mxu1  ;;  %v3296_v32 = vpop.f32.mrf.mxu0 }
 0x102   : > { %v1398_v10 = vpop.f32.mrf.mxu2  ;;  %v553_v52 = vadd.f32 %v552_v13, %v451_v25  ;;  %v1644_v1 = vpop.f32.mrf.mxu3 }
 0x104   : > { %v3298_v40 = vadd.f32 %v721_v55, %v553_v52  ;;  %v1110_v55 = vadd.f32 %v1094_v58, %v864_v39 }
 0x109   : > { %v554_v14 = vpop.f32.mrf.mxu1  ;;  %v3300_v17 = vpop.f32.mrf.mxu0 }
 0x10a   : > { %v1401_v31 = vpop.f32.mrf.mxu2  ;;  %v555_v18 = vadd.f32 %v554_v14, %v453_v16  ;;  %v1647_v27 = vpop.f32.mrf.mxu3 }
 0x10c   : > { %v3302_v19 = vadd.f32 %v723_v61, %v555_v18 }
 0x111   : > { %v1261_v21 = vpop.f32.mrf.mxu1  ;;  %v1816_v23 = vpop.f32.mrf.mxu0 }
 0x112   : > { %v1281_v24 = vadd.f32 %v1261_v21, %v1107_v36  ;;  %v1403_v28 = vpop.f32.mrf.mxu2  ;;  %v1649_v50 = vpop.f32.mrf.mxu3 }
 0x114   : > { %v1416_v11 = vadd.f32 %v1396_v2, %v1281_v24 }
 0x116   : > { %v1662_v25 = vadd.f32 %v1642_v6, %v1416_v11  ;;  %v866_v6 = vadd.f32 %v3284_v56, %v3292_v35 }
 0x118   : > { %v1836_v57 = vadd.f32 %v1816_v23, %v1662_v25 }
 0x119   : > { %v1263_v8 = vpop.f32.mrf.mxu1  ;;  %v1818_v26 = vpop.f32.mrf.mxu0 }
 0x11a   : > { %v1282_v9 = vadd.f32 %v1263_v8, %v1108_v33  ;;  %v1406_v16 = vpop.f32.mrf.mxu2  ;;  %v1877_v38 = vmul.f32 %v1836_v57, %v1836_v57 }
 0x11c   : > { %v1417_v22 = vadd.f32 %v1398_v10, %v1282_v9 }
 0x11e   : > { %v1663_v34 = vadd.f32 %v1644_v1, %v1417_v22  ;;  %v1112_v1 = vadd.f32 %v3290_v5, %v866_v6 }
 0x120   : > { %v1837_v37 = vadd.f32 %v1818_v26, %v1663_v34 }
 0x121   : > { %v1266_v41 = vpop.f32.mrf.mxu1  ;;  %v1821_v29 = vpop.f32.mrf.mxu0 }
 0x122   : > { %v2618_v36 = vpack.c.bf16 %v1837_v37, %v1836_v57  ;;  %v1861_v45 = vadd.f32 %v1837_v37, %v1836_v57  ;;  %v1878_v46 = vmul.f32 %v1837_v37, %v1837_v37  ;;  %v1283_v30 = vadd.f32 %v1266_v41, %v1109_v47  ;;  %v1408_v54 = vpop.f32.mrf.mxu2  ;;  %v1652_v47 = vpop.f32.mrf.mxu3 }
 0x123   : > { %v868_v37 = vadd.f32 %v3294_v12, %v3302_v19 }
 0x124   : > { %2619 = vst [vmem:[%s2709_s22] sm:$0xff] %v2618_v36   ;;  %v1885_v43 = vadd.f32 %v1878_v46, %v1877_v38  ;;  %v1418_v48 = vadd.f32 %v1401_v31, %v1283_v30 }
 0x126   : > { %v1664_v51 = vadd.f32 %v1647_v27, %v1418_v48 }
 0x128   : > { %v1838_v42 = vadd.f32 %v1821_v29, %v1664_v51  ;;  %v1114_v29 = vadd.f32 %v3300_v17, %v868_v37 }
 0x129   : > { %v1268_v59 = vpop.f32.mrf.mxu1  ;;  %v1823_v61 = vpop.f32.mrf.mxu0 }
 0x12a   : > { %v1862_v15 = vadd.f32 %v1861_v45, %v1838_v42  ;;  %v1879_v62 = vmul.f32 %v1838_v42, %v1838_v42  ;;  %v1284_v63 = vadd.f32 %v1268_v59, %v1110_v55  ;;  %v1411_v20 = vpop.f32.mrf.mxu2  ;;  %v1654_v23 = vpop.f32.mrf.mxu3 }
 0x12c   : > { %v1886_v49 = vadd.f32 %v1885_v43, %v1879_v62  ;;  %v1419_v0 = vadd.f32 %v1403_v28, %v1284_v63 }
 0x12e   : > { %v1665_v2 = vadd.f32 %v1649_v50, %v1419_v0 }
 0x130   : > { %v1839_v4 = vadd.f32 %v1823_v61, %v1665_v2 }
 0x131   : > { %v1271_v44 = vpop.f32.mrf.mxu1  ;;  %v1826_v58 = vpop.f32.mrf.mxu0 }
 0x132   : > { %v2623_v7 = vpack.c.bf16 %v1839_v4, %v1838_v42  ;;  %v1863_v10 = vadd.f32 %v1862_v15, %v1839_v4  ;;  %v1880_v13 = vmul.f32 %v1839_v4, %v1839_v4  ;;  %v1285_v52 = vadd.f32 %v1271_v44, %v3288_v53  ;;  %v1413_v33 = vpop.f32.mrf.mxu2  ;;  %v1657_v34 = vpop.f32.mrf.mxu3  ;;  %v1876_v44 = vld [vmem:[%s3339_s4] sm:$0x1] }
 0x133   : > { %v867_v53 = vadd.f32 %v3286_v60, %v3298_v40 }
 0x134   : > { %2635 = vst [vmem:[%s2709_s22 + $0x8] sm:$0xff] %v2623_v7   ;;  %v1887_v31 = vadd.f32 %v1886_v49, %v1880_v13  ;;  %v1420_v14 = vadd.f32 %v1406_v16, %v1285_v52 }
 0x135   : > { %v1113_v26 = vadd.f32 %v3296_v32, %v867_v53 }
 0x136   : > { %v1666_v18 = vadd.f32 %v1652_v47, %v1420_v14  ;;  %v1860_v47 = vld [vmem:[%s3338_s3] sm:$0x1] }
 0x138   : > { %v1840_v21 = vadd.f32 %v1826_v58, %v1666_v18 }
 0x139   : > { %v1273_v24 = vpop.f32.mrf.mxu1  ;;  %v1828_v56 = vpop.f32.mrf.mxu0 }
 0x13a   : > { %v1864_v28 = vadd.f32 %v1863_v10, %v1840_v21  ;;  %v1881_v3 = vmul.f32 %v1840_v21, %v1840_v21  ;;  %v1286_v11 = vadd.f32 %v1273_v24, %v1112_v1  ;;  %v1831_v60 = vpop.f32.mrf.mxu2  ;;  %v1659_v48 = vpop.f32.mrf.mxu3 }
 0x13c   : > { %v1888_v25 = vadd.f32 %v1887_v31, %v1881_v3  ;;  %v1421_v8 = vadd.f32 %v1408_v54, %v1286_v11 }
 0x13e   : > { %v1667_v35 = vadd.f32 %v1654_v23, %v1421_v8 }
 0x140   : > { %v1841_v9 = vadd.f32 %v1828_v56, %v1667_v35 }
 0x141   : > { %v1276_v27 = vpop.f32.mrf.mxu1 }
 0x142   : > { %v2628_v5 = vpack.c.bf16 %v1841_v9, %v1840_v21  ;;  %v1865_v22 = vadd.f32 %v1864_v28, %v1841_v9  ;;  %v1882_v57 = vmul.f32 %v1841_v9, %v1841_v9  ;;  %v1287_v16 = vadd.f32 %v1276_v27, %v1113_v26  ;;  %v1833_v51 = vpop.f32.mrf.mxu2 }
 0x144   : > { %2636 = vst [vmem:[%s2709_s22 + $0x10] sm:$0xff] %v2628_v5   ;;  %v1889_v38 = vadd.f32 %v1888_v25, %v1882_v57  ;;  %v1422_v41 = vadd.f32 %v1411_v20, %v1287_v16 }
 0x146   : > { %v1668_v40 = vadd.f32 %v1657_v34, %v1422_v41 }
 0x148   : > { %v1842_v36 = vadd.f32 %v1831_v60, %v1668_v40 }
 0x149   : > { %v1278_v32 = vpop.f32.mrf.mxu1 }
 0x14a   : > { %v1866_v45 = vadd.f32 %v1865_v22, %v1842_v36  ;;  %v1883_v46 = vmul.f32 %v1842_v36, %v1842_v36  ;;  %v1288_v30 = vadd.f32 %v1278_v32, %v1114_v29 }
 0x14c   : > { %v1890_v39 = vadd.f32 %v1889_v38, %v1883_v46  ;;  %v1423_v43 = vadd.f32 %v1413_v33, %v1288_v30 }
 0x14e   : > { %v1669_v50 = vadd.f32 %v1659_v48, %v1423_v43 }
 0x150   : > { %v1843_v54 = vadd.f32 %v1833_v51, %v1669_v50 }
 0x152   : > { %v2633_v12 = vpack.c.bf16 %v1843_v54, %v1842_v36  ;;  %v1867_v19 = vadd.f32 %v1866_v45, %v1843_v54  ;;  %v1884_v55 = vmul.f32 %v1843_v54, %v1843_v54 }
 0x154   : > { %2637 = vst [vmem:[%s2709_s22 + $0x18] sm:$0xff] %v2633_v12   ;;  %v1868_v42 = vrot.slane %v1867_v19, 4  ;;  %v1891_v59 = vadd.f32 %v1890_v39, %v1884_v55 }
 0x156   : > { %v1869_v61 = vadd.f32 %v1868_v42, %v1867_v19  ;;  %v1892_v15 = vrot.slane %v1891_v59, 4 }
 0x158   : > { %v1870_v17 = vrot.slane %v1869_v61, 2  ;;  %v1893_v62 = vadd.f32 %v1892_v15, %v1891_v59 }
 0x15a   : > { %v1871_v63 = vadd.f32 %v1870_v17, %v1869_v61  ;;  %v1894_v49 = vrot.slane %v1893_v62, 2 }
 0x15c   : > { %v1872_v0 = vrot.slane %v1871_v63, 1  ;;  %v1895_v2 = vadd.f32 %v1894_v49, %v1893_v62 }
 0x15e   : > { %v1873_v4 = vadd.f32 %v1872_v0, %v1871_v63  ;;  %v1896_v20 = vrot.slane %v1895_v2, 1 }
 0x160   : > { %v1874_v7 = vadd.f32 %v1873_v4, %v1860_v47  ;;  %v1897_v10 = vadd.f32 %v1896_v20, %v1895_v2 }
 0x162   : > { %1875 = vst [vmem:[%s3338_s3] sm:$0x1] %v1874_v7  ;;  %v1898_v13 = vadd.f32 %v1897_v10, %v1876_v44 }
 0x164   : > { %1899 = vst [vmem:[%s3339_s4] sm:$0x1] %v1898_v13 }
 0x165 PF: > { %s15_s15 = sadd.s32 1, %s2670_s15  }
 0x166   : > { %p12_p5 = scmp.ge.s32.totalorder %s15_s15, 4  }
 0x168   :  { %14 = sbr.rel (!%p12_p5) target bundleno = 1 (0x1), region = 88 }

</bundles_post_ra>
